<compile_context>
chip_gen: v7x
topology: tpu7x:2x2x1
jax: 0.10.0
libtpu: 0.0.40
codegen_flags: <defaults>
</compile_context>

<pallas_src>
import functools

import jax
import jax.numpy as jnp
from jax.experimental import pallas as pl
from jax.experimental.pallas import tpu as pltpu

NEG_SLOPE = 0.01  # nn.LeakyReLU() default negative_slope


# ------------------------------ Pallas kernel ------------------------------ #
def _fused_extract_squeeze_kernel(x_ref, w0_ref, w1_ref, w2_ref, o_ref, *,
                                  K, H, W, neg_slope):
    """One batch element: 3 x (Conv2d KxK, replicate pad, no bias) + LeakyReLU.

    x_ref : (H, W, Cin)         input image, channels-last, in VMEM
    w*_ref: (K*K, Cin_l, Cout)  per-tap weight matrices, VMEM-resident
    o_ref : (Cout, H*W)         lane-dense output (== flattened NCHW)
    """
    pad = (K - 1) // 2

    def replicate_pad_hw(x):
        # (H, W, C) -> (H + 2p, W + 2p, C); edges (and corners) replicated.
        x = jnp.concatenate([x[:1]] * pad + [x] + [x[-1:]] * pad, axis=0)
        x = jnp.concatenate([x[:, :1]] * pad + [x] + [x[:, -1:]] * pad, axis=1)
        return x

    def conv_lrelu(x, w_ref):
        cin = x.shape[-1]
        cout = w_ref.shape[-1]
        xp = replicate_pad_hw(x)
        acc = jnp.zeros((H * W, cout), jnp.float32)
        # Conv as a sum over the K*K taps of shifted (H*W, Cin) @ (Cin, Cout) dots.
        for di in range(K):
            for dj in range(K):
                xs = xp[di:di + H, dj:dj + W, :].reshape(H * W, cin)
                acc = acc + jnp.dot(xs, w_ref[di * K + dj],
                                    preferred_element_type=jnp.float32)
        acc = jnp.where(acc >= 0.0, acc, neg_slope * acc)  # LeakyReLU, f32 compute
        return acc.reshape(H, W, cout)

    x = x_ref[...]
    x = conv_lrelu(x, w0_ref)   # conv0 + act
    x = conv_lrelu(x, w1_ref)   # conv1 + act
    x = conv_lrelu(x, w2_ref)   # conv2 + act
    cout = x.shape[-1]
    # Lane-dense store: minor dim is H*W (>= 128 lanes) == flattened NCHW layout.
    o_ref[...] = jnp.transpose(x.reshape(H * W, cout)).astype(o_ref.dtype)


def extract_squeeze_pallas(x_nchw, w0_t, w1_t, w2_t, *, K=3):
    """x_nchw: (N, Cin, H, W); w*_t: (K*K, Cin_l, Cout). Returns (N, Cout, H, W)."""
    N, Cin, H, W = x_nchw.shape
    Cout = w0_t.shape[-1]
    # Single cheap layout change at the boundary; after this, activations live in VMEM.
    x_nhwc = jnp.transpose(x_nchw, (0, 2, 3, 1))
    kernel = functools.partial(_fused_extract_squeeze_kernel,
                               K=K, H=H, W=W, neg_slope=NEG_SLOPE)
    out = pl.pallas_call(
        kernel,
        out_shape=jax.ShapeDtypeStruct((N, Cout, H * W), x_nchw.dtype),
        grid=(N,),
        in_specs=[
            pl.BlockSpec((None, H, W, Cin), lambda n: (n, 0, 0, 0)),
            # Constant index_maps: weights DMA'd once, VMEM-resident across steps.
            pl.BlockSpec(w0_t.shape, lambda n: (0, 0, 0)),
            pl.BlockSpec(w1_t.shape, lambda n: (0, 0, 0)),
            pl.BlockSpec(w2_t.shape, lambda n: (0, 0, 0)),
        ],
        out_specs=pl.BlockSpec((None, Cout, H * W), lambda n: (n, 0, 0)),
        compiler_params=pltpu.CompilerParams(
            dimension_semantics=("parallel",)),  # v7x: batch sharded over both TCs
    )(x_nhwc, w0_t, w1_t, w2_t)
    # TODO(synk): for large H*W, add a spatial tile grid axis with a 1-pixel halo so
    # the per-step block stays inside v7x's smaller VMEM budget.
    return out.reshape(N, Cout, H, W)


# --------------------------------- Module ---------------------------------- #
class ExtractSqueezePallas:
    """Pallas port of ExtractSqueeze (groups=1, bias=False)."""

    def __init__(self, nf1, nf2, K=3, key=None):
        self.K = K
        key = jax.random.PRNGKey(0) if key is None else key
        k0, k1, k2 = jax.random.split(key, 3)

        def init_w(k, cout, cin):
            bound = 1.0 / jnp.sqrt(cin * K * K)  # kaiming-uniform-like bound
            return jax.random.uniform(
                k, (cout, cin, K, K), jnp.float32, minval=-bound, maxval=bound
            )

        self.w0 = init_w(k0, nf2, nf1)
        self.w1 = init_w(k1, nf2, nf2)
        self.w2 = init_w(k2, nf2, nf2)

        # Precompute kernel-layout weights once (not per forward call):
        # (Cout, Cin, K, K) -> (K, K, Cin, Cout) -> (K*K, Cin, Cout), tap-major.
        def to_taps(w):
            cout, cin = w.shape[0], w.shape[1]
            return jnp.transpose(w, (2, 3, 1, 0)).reshape(K * K, cin, cout)

        self.w0_t = to_taps(self.w0)
        self.w1_t = to_taps(self.w1)
        self.w2_t = to_taps(self.w2)

    def __call__(self, x_nchw):
        return extract_squeeze_pallas(x_nchw, self.w0_t, self.w1_t, self.w2_t,
                                      K=self.K)


# ---------------------------- pure-JAX reference ---------------------------- #
def _reference_forward(x_nchw, w0, w1, w2, K):
    pad = (K - 1) // 2

    def conv_act(x, w):
        xp = jnp.pad(x, ((0, 0), (0, 0), (pad, pad), (pad, pad)), mode="edge")
        y = jax.lax.conv_general_dilated(
            xp, w, window_strides=(1, 1), padding="VALID",
            dimension_numbers=("NCHW", "OIHW", "NCHW"),
        )
        return jnp.where(y >= 0.0, y, NEG_SLOPE * y)

    return conv_act(conv_act(conv_act(x_nchw, w0), w1), w2)


if __name__ == "__main__":
    # Small shapes: batch=2, nf1=4 input channels, nf2=8, spatial 16x16.
    N, NF1, NF2, H, W, K = 2, 4, 8, 16, 16, 3

    key = jax.random.PRNGKey(0)
    kx, kw = jax.random.split(key)
    x = jax.random.normal(kx, (N, NF1, H, W), jnp.float32)  # NCHW, like PyTorch

    model = ExtractSqueezePallas(NF1, NF2, K=K, key=kw)

    out = model(x)
    out = jax.block_until_ready(out)

    ref = _reference_forward(x, model.w0, model.w1, model.w2, K)
    ref = jax.block_until_ready(ref)

    assert out.shape == (N, NF2, H, W), out.shape
    assert jnp.allclose(out, ref, atol=1e-4, rtol=1e-4), "mismatch vs reference"

    print("KERNEL_OK")
</pallas_src>

<mosaic_0001>
module attributes {stable_mosaic.version = 11 : i64} {
  func.func @_fused_extract_squeeze_kernel(%arg0: i32, %arg1: memref<1x16x16x4xf32, #tpu.memory_space<vmem>>, %arg2: memref<9x4x8xf32, #tpu.memory_space<vmem>>, %arg3: memref<9x8x8xf32, #tpu.memory_space<vmem>>, %arg4: memref<9x8x8xf32, #tpu.memory_space<vmem>>, %arg5: memref<1x8x256xf32, #tpu.memory_space<vmem>>) attributes {dimension_semantics = [#tpu.dimension_semantics<parallel>], iteration_bounds = array<i64: 2>, scalar_prefetch = 0 : i64, scratch_operands = 0 : i64, tpu.core_type = #tpu.core_type<tc>, window_params = [{transform_indices = @transform_0, window_bounds = array<i64: 1, 16, 16, 4>}, {pipeline_mode = #tpu.pipeline_mode<synchronous>, transform_indices = @transform_1, window_bounds = array<i64: 9, 4, 8>}, {pipeline_mode = #tpu.pipeline_mode<synchronous>, transform_indices = @transform_2, window_bounds = array<i64: 9, 8, 8>}, {pipeline_mode = #tpu.pipeline_mode<synchronous>, transform_indices = @transform_3, window_bounds = array<i64: 9, 8, 8>}, {transform_indices = @transform_4, window_bounds = array<i64: 1, 8, 256>}]} {
    %c0 = arith.constant 0 : index
    %c0_0 = arith.constant 0 : index
    %c0_1 = arith.constant 0 : index
    %c0_2 = arith.constant 0 : index
    %0 = vector.load %arg1[%c0, %c0_0, %c0_1, %c0_2] : memref<1x16x16x4xf32, #tpu.memory_space<vmem>>, vector<1x16x16x4xf32>
    %1 = vector.shape_cast %0 : vector<1x16x16x4xf32> to vector<16x16x4xf32>
    %2 = vector.extract_strided_slice %1 {offsets = [0, 0, 0], sizes = [1, 16, 4], strides = [1, 1, 1]} : vector<16x16x4xf32> to vector<1x16x4xf32>
    %3 = vector.extract_strided_slice %1 {offsets = [15, 0, 0], sizes = [1, 16, 4], strides = [1, 1, 1]} : vector<16x16x4xf32> to vector<1x16x4xf32>
    %4 = tpu.concatenate %2, %1, %3 in 0 : vector<1x16x4xf32>, vector<16x16x4xf32>, vector<1x16x4xf32> -> vector<18x16x4xf32>
    %5 = vector.extract_strided_slice %4 {offsets = [0, 0, 0], sizes = [18, 1, 4], strides = [1, 1, 1]} : vector<18x16x4xf32> to vector<18x1x4xf32>
    %6 = vector.extract_strided_slice %4 {offsets = [0, 15, 0], sizes = [18, 1, 4], strides = [1, 1, 1]} : vector<18x16x4xf32> to vector<18x1x4xf32>
    %7 = tpu.concatenate %5, %4, %6 in 1 : vector<18x1x4xf32>, vector<18x16x4xf32>, vector<18x1x4xf32> -> vector<18x18x4xf32>
    %cst = arith.constant 0.000000e+00 : f32
    %8 = vector.broadcast %cst : f32 to vector<256x8xf32>
    %9 = vector.extract_strided_slice %7 {offsets = [0, 0, 0], sizes = [16, 16, 4], strides = [1, 1, 1]} : vector<18x18x4xf32> to vector<16x16x4xf32>
    %10 = vector.shape_cast %9 : vector<16x16x4xf32> to vector<256x4xf32>
    %c0_3 = arith.constant 0 : index
    %c0_4 = arith.constant 0 : index
    %c0_5 = arith.constant 0 : index
    %11 = vector.load %arg2[%c0_3, %c0_4, %c0_5] : memref<9x4x8xf32, #tpu.memory_space<vmem>>, vector<1x4x8xf32>
    %12 = vector.shape_cast %11 : vector<1x4x8xf32> to vector<4x8xf32>
    %cst_6 = arith.constant dense<0.000000e+00> : vector<256x8xf32>
    %13 = tpu.matmul %10, %12, %cst_6 {dimension_numbers = #tpu.dot_dimension_numbers<[1], [0], [0], [1], [0, 0, 1, 1], [], []>} : vector<256x4xf32>, vector<4x8xf32>, vector<256x8xf32> -> vector<256x8xf32>
    %14 = arith.addf %8, %13 : vector<256x8xf32>
    %15 = vector.extract_strided_slice %7 {offsets = [0, 1, 0], sizes = [16, 16, 4], strides = [1, 1, 1]} : vector<18x18x4xf32> to vector<16x16x4xf32>
    %16 = vector.shape_cast %15 : vector<16x16x4xf32> to vector<256x4xf32>
    %c1 = arith.constant 1 : index
    %c0_7 = arith.constant 0 : index
    %c0_8 = arith.constant 0 : index
    %17 = vector.load %arg2[%c1, %c0_7, %c0_8] : memref<9x4x8xf32, #tpu.memory_space<vmem>>, vector<1x4x8xf32>
    %18 = vector.shape_cast %17 : vector<1x4x8xf32> to vector<4x8xf32>
    %cst_9 = arith.constant dense<0.000000e+00> : vector<256x8xf32>
    %19 = tpu.matmul %16, %18, %cst_9 {dimension_numbers = #tpu.dot_dimension_numbers<[1], [0], [0], [1], [0, 0, 1, 1], [], []>} : vector<256x4xf32>, vector<4x8xf32>, vector<256x8xf32> -> vector<256x8xf32>
    %20 = arith.addf %14, %19 : vector<256x8xf32>
    %21 = vector.extract_strided_slice %7 {offsets = [0, 2, 0], sizes = [16, 16, 4], strides = [1, 1, 1]} : vector<18x18x4xf32> to vector<16x16x4xf32>
    %22 = vector.shape_cast %21 : vector<16x16x4xf32> to vector<256x4xf32>
    %c2 = arith.constant 2 : index
    %c0_10 = arith.constant 0 : index
    %c0_11 = arith.constant 0 : index
    %23 = vector.load %arg2[%c2, %c0_10, %c0_11] : memref<9x4x8xf32, #tpu.memory_space<vmem>>, vector<1x4x8xf32>
    %24 = vector.shape_cast %23 : vector<1x4x8xf32> to vector<4x8xf32>
    %cst_12 = arith.constant dense<0.000000e+00> : vector<256x8xf32>
    %25 = tpu.matmul %22, %24, %cst_12 {dimension_numbers = #tpu.dot_dimension_numbers<[1], [0], [0], [1], [0, 0, 1, 1], [], []>} : vector<256x4xf32>, vector<4x8xf32>, vector<256x8xf32> -> vector<256x8xf32>
    %26 = arith.addf %20, %25 : vector<256x8xf32>
    %27 = vector.extract_strided_slice %7 {offsets = [1, 0, 0], sizes = [16, 16, 4], strides = [1, 1, 1]} : vector<18x18x4xf32> to vector<16x16x4xf32>
    %28 = vector.shape_cast %27 : vector<16x16x4xf32> to vector<256x4xf32>
    %c3 = arith.constant 3 : index
    %c0_13 = arith.constant 0 : index
    %c0_14 = arith.constant 0 : index
    %29 = vector.load %arg2[%c3, %c0_13, %c0_14] : memref<9x4x8xf32, #tpu.memory_space<vmem>>, vector<1x4x8xf32>
    %30 = vector.shape_cast %29 : vector<1x4x8xf32> to vector<4x8xf32>
    %cst_15 = arith.constant dense<0.000000e+00> : vector<256x8xf32>
    %31 = tpu.matmul %28, %30, %cst_15 {dimension_numbers = #tpu.dot_dimension_numbers<[1], [0], [0], [1], [0, 0, 1, 1], [], []>} : vector<256x4xf32>, vector<4x8xf32>, vector<256x8xf32> -> vector<256x8xf32>
    %32 = arith.addf %26, %31 : vector<256x8xf32>
    %33 = vector.extract_strided_slice %7 {offsets = [1, 1, 0], sizes = [16, 16, 4], strides = [1, 1, 1]} : vector<18x18x4xf32> to vector<16x16x4xf32>
    %34 = vector.shape_cast %33 : vector<16x16x4xf32> to vector<256x4xf32>
    %c4 = arith.constant 4 : index
    %c0_16 = arith.constant 0 : index
    %c0_17 = arith.constant 0 : index
    %35 = vector.load %arg2[%c4, %c0_16, %c0_17] : memref<9x4x8xf32, #tpu.memory_space<vmem>>, vector<1x4x8xf32>
    %36 = vector.shape_cast %35 : vector<1x4x8xf32> to vector<4x8xf32>
    %cst_18 = arith.constant dense<0.000000e+00> : vector<256x8xf32>
    %37 = tpu.matmul %34, %36, %cst_18 {dimension_numbers = #tpu.dot_dimension_numbers<[1], [0], [0], [1], [0, 0, 1, 1], [], []>} : vector<256x4xf32>, vector<4x8xf32>, vector<256x8xf32> -> vector<256x8xf32>
    %38 = arith.addf %32, %37 : vector<256x8xf32>
    %39 = vector.extract_strided_slice %7 {offsets = [1, 2, 0], sizes = [16, 16, 4], strides = [1, 1, 1]} : vector<18x18x4xf32> to vector<16x16x4xf32>
    %40 = vector.shape_cast %39 : vector<16x16x4xf32> to vector<256x4xf32>
    %c5 = arith.constant 5 : index
    %c0_19 = arith.constant 0 : index
    %c0_20 = arith.constant 0 : index
    %41 = vector.load %arg2[%c5, %c0_19, %c0_20] : memref<9x4x8xf32, #tpu.memory_space<vmem>>, vector<1x4x8xf32>
    %42 = vector.shape_cast %41 : vector<1x4x8xf32> to vector<4x8xf32>
    %cst_21 = arith.constant dense<0.000000e+00> : vector<256x8xf32>
    %43 = tpu.matmul %40, %42, %cst_21 {dimension_numbers = #tpu.dot_dimension_numbers<[1], [0], [0], [1], [0, 0, 1, 1], [], []>} : vector<256x4xf32>, vector<4x8xf32>, vector<256x8xf32> -> vector<256x8xf32>
    %44 = arith.addf %38, %43 : vector<256x8xf32>
    %45 = vector.extract_strided_slice %7 {offsets = [2, 0, 0], sizes = [16, 16, 4], strides = [1, 1, 1]} : vector<18x18x4xf32> to vector<16x16x4xf32>
    %46 = vector.shape_cast %45 : vector<16x16x4xf32> to vector<256x4xf32>
    %c6 = arith.constant 6 : index
    %c0_22 = arith.constant 0 : index
    %c0_23 = arith.constant 0 : index
    %47 = vector.load %arg2[%c6, %c0_22, %c0_23] : memref<9x4x8xf32, #tpu.memory_space<vmem>>, vector<1x4x8xf32>
    %48 = vector.shape_cast %47 : vector<1x4x8xf32> to vector<4x8xf32>
    %cst_24 = arith.constant dense<0.000000e+00> : vector<256x8xf32>
    %49 = tpu.matmul %46, %48, %cst_24 {dimension_numbers = #tpu.dot_dimension_numbers<[1], [0], [0], [1], [0, 0, 1, 1], [], []>} : vector<256x4xf32>, vector<4x8xf32>, vector<256x8xf32> -> vector<256x8xf32>
    %50 = arith.addf %44, %49 : vector<256x8xf32>
    %51 = vector.extract_strided_slice %7 {offsets = [2, 1, 0], sizes = [16, 16, 4], strides = [1, 1, 1]} : vector<18x18x4xf32> to vector<16x16x4xf32>
    %52 = vector.shape_cast %51 : vector<16x16x4xf32> to vector<256x4xf32>
    %c7 = arith.constant 7 : index
    %c0_25 = arith.constant 0 : index
    %c0_26 = arith.constant 0 : index
    %53 = vector.load %arg2[%c7, %c0_25, %c0_26] : memref<9x4x8xf32, #tpu.memory_space<vmem>>, vector<1x4x8xf32>
    %54 = vector.shape_cast %53 : vector<1x4x8xf32> to vector<4x8xf32>
    %cst_27 = arith.constant dense<0.000000e+00> : vector<256x8xf32>
    %55 = tpu.matmul %52, %54, %cst_27 {dimension_numbers = #tpu.dot_dimension_numbers<[1], [0], [0], [1], [0, 0, 1, 1], [], []>} : vector<256x4xf32>, vector<4x8xf32>, vector<256x8xf32> -> vector<256x8xf32>
    %56 = arith.addf %50, %55 : vector<256x8xf32>
    %57 = vector.extract_strided_slice %7 {offsets = [2, 2, 0], sizes = [16, 16, 4], strides = [1, 1, 1]} : vector<18x18x4xf32> to vector<16x16x4xf32>
    %58 = vector.shape_cast %57 : vector<16x16x4xf32> to vector<256x4xf32>
    %c8 = arith.constant 8 : index
    %c0_28 = arith.constant 0 : index
    %c0_29 = arith.constant 0 : index
    %59 = vector.load %arg2[%c8, %c0_28, %c0_29] : memref<9x4x8xf32, #tpu.memory_space<vmem>>, vector<1x4x8xf32>
    %60 = vector.shape_cast %59 : vector<1x4x8xf32> to vector<4x8xf32>
    %cst_30 = arith.constant dense<0.000000e+00> : vector<256x8xf32>
    %61 = tpu.matmul %58, %60, %cst_30 {dimension_numbers = #tpu.dot_dimension_numbers<[1], [0], [0], [1], [0, 0, 1, 1], [], []>} : vector<256x4xf32>, vector<4x8xf32>, vector<256x8xf32> -> vector<256x8xf32>
    %62 = arith.addf %56, %61 : vector<256x8xf32>
    %cst_31 = arith.constant 0.000000e+00 : f32
    %63 = vector.broadcast %cst_31 : f32 to vector<256x8xf32>
    %64 = arith.cmpf oge, %62, %63 : vector<256x8xf32>
    %cst_32 = arith.constant 0.00999999977 : f32
    %65 = vector.broadcast %cst_32 : f32 to vector<256x8xf32>
    %66 = arith.mulf %65, %62 : vector<256x8xf32>
    %67 = arith.select %64, %62, %66 : vector<256x8xi1>, vector<256x8xf32>
    %68 = vector.shape_cast %67 : vector<256x8xf32> to vector<16x16x8xf32>
    %69 = vector.extract_strided_slice %68 {offsets = [0, 0, 0], sizes = [1, 16, 8], strides = [1, 1, 1]} : vector<16x16x8xf32> to vector<1x16x8xf32>
    %70 = vector.extract_strided_slice %68 {offsets = [15, 0, 0], sizes = [1, 16, 8], strides = [1, 1, 1]} : vector<16x16x8xf32> to vector<1x16x8xf32>
    %71 = tpu.concatenate %69, %68, %70 in 0 : vector<1x16x8xf32>, vector<16x16x8xf32>, vector<1x16x8xf32> -> vector<18x16x8xf32>
    %72 = vector.extract_strided_slice %71 {offsets = [0, 0, 0], sizes = [18, 1, 8], strides = [1, 1, 1]} : vector<18x16x8xf32> to vector<18x1x8xf32>
    %73 = vector.extract_strided_slice %71 {offsets = [0, 15, 0], sizes = [18, 1, 8], strides = [1, 1, 1]} : vector<18x16x8xf32> to vector<18x1x8xf32>
    %74 = tpu.concatenate %72, %71, %73 in 1 : vector<18x1x8xf32>, vector<18x16x8xf32>, vector<18x1x8xf32> -> vector<18x18x8xf32>
    %cst_33 = arith.constant 0.000000e+00 : f32
    %75 = vector.broadcast %cst_33 : f32 to vector<256x8xf32>
    %76 = vector.extract_strided_slice %74 {offsets = [0, 0, 0], sizes = [16, 16, 8], strides = [1, 1, 1]} : vector<18x18x8xf32> to vector<16x16x8xf32>
    %77 = vector.shape_cast %76 : vector<16x16x8xf32> to vector<256x8xf32>
    %c0_34 = arith.constant 0 : index
    %c0_35 = arith.constant 0 : index
    %c0_36 = arith.constant 0 : index
    %78 = vector.load %arg3[%c0_34, %c0_35, %c0_36] : memref<9x8x8xf32, #tpu.memory_space<vmem>>, vector<1x8x8xf32>
    %79 = vector.shape_cast %78 : vector<1x8x8xf32> to vector<8x8xf32>
    %cst_37 = arith.constant dense<0.000000e+00> : vector<256x8xf32>
    %80 = tpu.matmul %77, %79, %cst_37 {dimension_numbers = #tpu.dot_dimension_numbers<[1], [0], [0], [1], [0, 0, 1, 1], [], []>} : vector<256x8xf32>, vector<8x8xf32>, vector<256x8xf32> -> vector<256x8xf32>
    %81 = arith.addf %75, %80 : vector<256x8xf32>
    %82 = vector.extract_strided_slice %74 {offsets = [0, 1, 0], sizes = [16, 16, 8], strides = [1, 1, 1]} : vector<18x18x8xf32> to vector<16x16x8xf32>
    %83 = vector.shape_cast %82 : vector<16x16x8xf32> to vector<256x8xf32>
    %c1_38 = arith.constant 1 : index
    %c0_39 = arith.constant 0 : index
    %c0_40 = arith.constant 0 : index
    %84 = vector.load %arg3[%c1_38, %c0_39, %c0_40] : memref<9x8x8xf32, #tpu.memory_space<vmem>>, vector<1x8x8xf32>
    %85 = vector.shape_cast %84 : vector<1x8x8xf32> to vector<8x8xf32>
    %cst_41 = arith.constant dense<0.000000e+00> : vector<256x8xf32>
    %86 = tpu.matmul %83, %85, %cst_41 {dimension_numbers = #tpu.dot_dimension_numbers<[1], [0], [0], [1], [0, 0, 1, 1], [], []>} : vector<256x8xf32>, vector<8x8xf32>, vector<256x8xf32> -> vector<256x8xf32>
    %87 = arith.addf %81, %86 : vector<256x8xf32>
    %88 = vector.extract_strided_slice %74 {offsets = [0, 2, 0], sizes = [16, 16, 8], strides = [1, 1, 1]} : vector<18x18x8xf32> to vector<16x16x8xf32>
    %89 = vector.shape_cast %88 : vector<16x16x8xf32> to vector<256x8xf32>
    %c2_42 = arith.constant 2 : index
    %c0_43 = arith.constant 0 : index
    %c0_44 = arith.constant 0 : index
    %90 = vector.load %arg3[%c2_42, %c0_43, %c0_44] : memref<9x8x8xf32, #tpu.memory_space<vmem>>, vector<1x8x8xf32>
    %91 = vector.shape_cast %90 : vector<1x8x8xf32> to vector<8x8xf32>
    %cst_45 = arith.constant dense<0.000000e+00> : vector<256x8xf32>
    %92 = tpu.matmul %89, %91, %cst_45 {dimension_numbers = #tpu.dot_dimension_numbers<[1], [0], [0], [1], [0, 0, 1, 1], [], []>} : vector<256x8xf32>, vector<8x8xf32>, vector<256x8xf32> -> vector<256x8xf32>
    %93 = arith.addf %87, %92 : vector<256x8xf32>
    %94 = vector.extract_strided_slice %74 {offsets = [1, 0, 0], sizes = [16, 16, 8], strides = [1, 1, 1]} : vector<18x18x8xf32> to vector<16x16x8xf32>
    %95 = vector.shape_cast %94 : vector<16x16x8xf32> to vector<256x8xf32>
    %c3_46 = arith.constant 3 : index
    %c0_47 = arith.constant 0 : index
    %c0_48 = arith.constant 0 : index
    %96 = vector.load %arg3[%c3_46, %c0_47, %c0_48] : memref<9x8x8xf32, #tpu.memory_space<vmem>>, vector<1x8x8xf32>
    %97 = vector.shape_cast %96 : vector<1x8x8xf32> to vector<8x8xf32>
    %cst_49 = arith.constant dense<0.000000e+00> : vector<256x8xf32>
    %98 = tpu.matmul %95, %97, %cst_49 {dimension_numbers = #tpu.dot_dimension_numbers<[1], [0], [0], [1], [0, 0, 1, 1], [], []>} : vector<256x8xf32>, vector<8x8xf32>, vector<256x8xf32> -> vector<256x8xf32>
    %99 = arith.addf %93, %98 : vector<256x8xf32>
    %100 = vector.extract_strided_slice %74 {offsets = [1, 1, 0], sizes = [16, 16, 8], strides = [1, 1, 1]} : vector<18x18x8xf32> to vector<16x16x8xf32>
    %101 = vector.shape_cast %100 : vector<16x16x8xf32> to vector<256x8xf32>
    %c4_50 = arith.constant 4 : index
    %c0_51 = arith.constant 0 : index
    %c0_52 = arith.constant 0 : index
    %102 = vector.load %arg3[%c4_50, %c0_51, %c0_52] : memref<9x8x8xf32, #tpu.memory_space<vmem>>, vector<1x8x8xf32>
    %103 = vector.shape_cast %102 : vector<1x8x8xf32> to vector<8x8xf32>
    %cst_53 = arith.constant dense<0.000000e+00> : vector<256x8xf32>
    %104 = tpu.matmul %101, %103, %cst_53 {dimension_numbers = #tpu.dot_dimension_numbers<[1], [0], [0], [1], [0, 0, 1, 1], [], []>} : vector<256x8xf32>, vector<8x8xf32>, vector<256x8xf32> -> vector<256x8xf32>
    %105 = arith.addf %99, %104 : vector<256x8xf32>
    %106 = vector.extract_strided_slice %74 {offsets = [1, 2, 0], sizes = [16, 16, 8], strides = [1, 1, 1]} : vector<18x18x8xf32> to vector<16x16x8xf32>
    %107 = vector.shape_cast %106 : vector<16x16x8xf32> to vector<256x8xf32>
    %c5_54 = arith.constant 5 : index
    %c0_55 = arith.constant 0 : index
    %c0_56 = arith.constant 0 : index
    %108 = vector.load %arg3[%c5_54, %c0_55, %c0_56] : memref<9x8x8xf32, #tpu.memory_space<vmem>>, vector<1x8x8xf32>
    %109 = vector.shape_cast %108 : vector<1x8x8xf32> to vector<8x8xf32>
    %cst_57 = arith.constant dense<0.000000e+00> : vector<256x8xf32>
    %110 = tpu.matmul %107, %109, %cst_57 {dimension_numbers = #tpu.dot_dimension_numbers<[1], [0], [0], [1], [0, 0, 1, 1], [], []>} : vector<256x8xf32>, vector<8x8xf32>, vector<256x8xf32> -> vector<256x8xf32>
    %111 = arith.addf %105, %110 : vector<256x8xf32>
    %112 = vector.extract_strided_slice %74 {offsets = [2, 0, 0], sizes = [16, 16, 8], strides = [1, 1, 1]} : vector<18x18x8xf32> to vector<16x16x8xf32>
    %113 = vector.shape_cast %112 : vector<16x16x8xf32> to vector<256x8xf32>
    %c6_58 = arith.constant 6 : index
    %c0_59 = arith.constant 0 : index
    %c0_60 = arith.constant 0 : index
    %114 = vector.load %arg3[%c6_58, %c0_59, %c0_60] : memref<9x8x8xf32, #tpu.memory_space<vmem>>, vector<1x8x8xf32>
    %115 = vector.shape_cast %114 : vector<1x8x8xf32> to vector<8x8xf32>
    %cst_61 = arith.constant dense<0.000000e+00> : vector<256x8xf32>
    %116 = tpu.matmul %113, %115, %cst_61 {dimension_numbers = #tpu.dot_dimension_numbers<[1], [0], [0], [1], [0, 0, 1, 1], [], []>} : vector<256x8xf32>, vector<8x8xf32>, vector<256x8xf32> -> vector<256x8xf32>
    %117 = arith.addf %111, %116 : vector<256x8xf32>
    %118 = vector.extract_strided_slice %74 {offsets = [2, 1, 0], sizes = [16, 16, 8], strides = [1, 1, 1]} : vector<18x18x8xf32> to vector<16x16x8xf32>
    %119 = vector.shape_cast %118 : vector<16x16x8xf32> to vector<256x8xf32>
    %c7_62 = arith.constant 7 : index
    %c0_63 = arith.constant 0 : index
    %c0_64 = arith.constant 0 : index
    %120 = vector.load %arg3[%c7_62, %c0_63, %c0_64] : memref<9x8x8xf32, #tpu.memory_space<vmem>>, vector<1x8x8xf32>
    %121 = vector.shape_cast %120 : vector<1x8x8xf32> to vector<8x8xf32>
    %cst_65 = arith.constant dense<0.000000e+00> : vector<256x8xf32>
    %122 = tpu.matmul %119, %121, %cst_65 {dimension_numbers = #tpu.dot_dimension_numbers<[1], [0], [0], [1], [0, 0, 1, 1], [], []>} : vector<256x8xf32>, vector<8x8xf32>, vector<256x8xf32> -> vector<256x8xf32>
    %123 = arith.addf %117, %122 : vector<256x8xf32>
    %124 = vector.extract_strided_slice %74 {offsets = [2, 2, 0], sizes = [16, 16, 8], strides = [1, 1, 1]} : vector<18x18x8xf32> to vector<16x16x8xf32>
    %125 = vector.shape_cast %124 : vector<16x16x8xf32> to vector<256x8xf32>
    %c8_66 = arith.constant 8 : index
    %c0_67 = arith.constant 0 : index
    %c0_68 = arith.constant 0 : index
    %126 = vector.load %arg3[%c8_66, %c0_67, %c0_68] : memref<9x8x8xf32, #tpu.memory_space<vmem>>, vector<1x8x8xf32>
    %127 = vector.shape_cast %126 : vector<1x8x8xf32> to vector<8x8xf32>
    %cst_69 = arith.constant dense<0.000000e+00> : vector<256x8xf32>
    %128 = tpu.matmul %125, %127, %cst_69 {dimension_numbers = #tpu.dot_dimension_numbers<[1], [0], [0], [1], [0, 0, 1, 1], [], []>} : vector<256x8xf32>, vector<8x8xf32>, vector<256x8xf32> -> vector<256x8xf32>
    %129 = arith.addf %123, %128 : vector<256x8xf32>
    %cst_70 = arith.constant 0.000000e+00 : f32
    %130 = vector.broadcast %cst_70 : f32 to vector<256x8xf32>
    %131 = arith.cmpf oge, %129, %130 : vector<256x8xf32>
    %cst_71 = arith.constant 0.00999999977 : f32
    %132 = vector.broadcast %cst_71 : f32 to vector<256x8xf32>
    %133 = arith.mulf %132, %129 : vector<256x8xf32>
    %134 = arith.select %131, %129, %133 : vector<256x8xi1>, vector<256x8xf32>
    %135 = vector.shape_cast %134 : vector<256x8xf32> to vector<16x16x8xf32>
    %136 = vector.extract_strided_slice %135 {offsets = [0, 0, 0], sizes = [1, 16, 8], strides = [1, 1, 1]} : vector<16x16x8xf32> to vector<1x16x8xf32>
    %137 = vector.extract_strided_slice %135 {offsets = [15, 0, 0], sizes = [1, 16, 8], strides = [1, 1, 1]} : vector<16x16x8xf32> to vector<1x16x8xf32>
    %138 = tpu.concatenate %136, %135, %137 in 0 : vector<1x16x8xf32>, vector<16x16x8xf32>, vector<1x16x8xf32> -> vector<18x16x8xf32>
    %139 = vector.extract_strided_slice %138 {offsets = [0, 0, 0], sizes = [18, 1, 8], strides = [1, 1, 1]} : vector<18x16x8xf32> to vector<18x1x8xf32>
    %140 = vector.extract_strided_slice %138 {offsets = [0, 15, 0], sizes = [18, 1, 8], strides = [1, 1, 1]} : vector<18x16x8xf32> to vector<18x1x8xf32>
    %141 = tpu.concatenate %139, %138, %140 in 1 : vector<18x1x8xf32>, vector<18x16x8xf32>, vector<18x1x8xf32> -> vector<18x18x8xf32>
    %cst_72 = arith.constant 0.000000e+00 : f32
    %142 = vector.broadcast %cst_72 : f32 to vector<256x8xf32>
    %143 = vector.extract_strided_slice %141 {offsets = [0, 0, 0], sizes = [16, 16, 8], strides = [1, 1, 1]} : vector<18x18x8xf32> to vector<16x16x8xf32>
    %144 = vector.shape_cast %143 : vector<16x16x8xf32> to vector<256x8xf32>
    %c0_73 = arith.constant 0 : index
    %c0_74 = arith.constant 0 : index
    %c0_75 = arith.constant 0 : index
    %145 = vector.load %arg4[%c0_73, %c0_74, %c0_75] : memref<9x8x8xf32, #tpu.memory_space<vmem>>, vector<1x8x8xf32>
    %146 = vector.shape_cast %145 : vector<1x8x8xf32> to vector<8x8xf32>
    %cst_76 = arith.constant dense<0.000000e+00> : vector<256x8xf32>
    %147 = tpu.matmul %144, %146, %cst_76 {dimension_numbers = #tpu.dot_dimension_numbers<[1], [0], [0], [1], [0, 0, 1, 1], [], []>} : vector<256x8xf32>, vector<8x8xf32>, vector<256x8xf32> -> vector<256x8xf32>
    %148 = arith.addf %142, %147 : vector<256x8xf32>
    %149 = vector.extract_strided_slice %141 {offsets = [0, 1, 0], sizes = [16, 16, 8], strides = [1, 1, 1]} : vector<18x18x8xf32> to vector<16x16x8xf32>
    %150 = vector.shape_cast %149 : vector<16x16x8xf32> to vector<256x8xf32>
    %c1_77 = arith.constant 1 : index
    %c0_78 = arith.constant 0 : index
    %c0_79 = arith.constant 0 : index
    %151 = vector.load %arg4[%c1_77, %c0_78, %c0_79] : memref<9x8x8xf32, #tpu.memory_space<vmem>>, vector<1x8x8xf32>
    %152 = vector.shape_cast %151 : vector<1x8x8xf32> to vector<8x8xf32>
    %cst_80 = arith.constant dense<0.000000e+00> : vector<256x8xf32>
    %153 = tpu.matmul %150, %152, %cst_80 {dimension_numbers = #tpu.dot_dimension_numbers<[1], [0], [0], [1], [0, 0, 1, 1], [], []>} : vector<256x8xf32>, vector<8x8xf32>, vector<256x8xf32> -> vector<256x8xf32>
    %154 = arith.addf %148, %153 : vector<256x8xf32>
    %155 = vector.extract_strided_slice %141 {offsets = [0, 2, 0], sizes = [16, 16, 8], strides = [1, 1, 1]} : vector<18x18x8xf32> to vector<16x16x8xf32>
    %156 = vector.shape_cast %155 : vector<16x16x8xf32> to vector<256x8xf32>
    %c2_81 = arith.constant 2 : index
    %c0_82 = arith.constant 0 : index
    %c0_83 = arith.constant 0 : index
    %157 = vector.load %arg4[%c2_81, %c0_82, %c0_83] : memref<9x8x8xf32, #tpu.memory_space<vmem>>, vector<1x8x8xf32>
    %158 = vector.shape_cast %157 : vector<1x8x8xf32> to vector<8x8xf32>
    %cst_84 = arith.constant dense<0.000000e+00> : vector<256x8xf32>
    %159 = tpu.matmul %156, %158, %cst_84 {dimension_numbers = #tpu.dot_dimension_numbers<[1], [0], [0], [1], [0, 0, 1, 1], [], []>} : vector<256x8xf32>, vector<8x8xf32>, vector<256x8xf32> -> vector<256x8xf32>
    %160 = arith.addf %154, %159 : vector<256x8xf32>
    %161 = vector.extract_strided_slice %141 {offsets = [1, 0, 0], sizes = [16, 16, 8], strides = [1, 1, 1]} : vector<18x18x8xf32> to vector<16x16x8xf32>
    %162 = vector.shape_cast %161 : vector<16x16x8xf32> to vector<256x8xf32>
    %c3_85 = arith.constant 3 : index
    %c0_86 = arith.constant 0 : index
    %c0_87 = arith.constant 0 : index
    %163 = vector.load %arg4[%c3_85, %c0_86, %c0_87] : memref<9x8x8xf32, #tpu.memory_space<vmem>>, vector<1x8x8xf32>
    %164 = vector.shape_cast %163 : vector<1x8x8xf32> to vector<8x8xf32>
    %cst_88 = arith.constant dense<0.000000e+00> : vector<256x8xf32>
    %165 = tpu.matmul %162, %164, %cst_88 {dimension_numbers = #tpu.dot_dimension_numbers<[1], [0], [0], [1], [0, 0, 1, 1], [], []>} : vector<256x8xf32>, vector<8x8xf32>, vector<256x8xf32> -> vector<256x8xf32>
    %166 = arith.addf %160, %165 : vector<256x8xf32>
    %167 = vector.extract_strided_slice %141 {offsets = [1, 1, 0], sizes = [16, 16, 8], strides = [1, 1, 1]} : vector<18x18x8xf32> to vector<16x16x8xf32>
    %168 = vector.shape_cast %167 : vector<16x16x8xf32> to vector<256x8xf32>
    %c4_89 = arith.constant 4 : index
    %c0_90 = arith.constant 0 : index
    %c0_91 = arith.constant 0 : index
    %169 = vector.load %arg4[%c4_89, %c0_90, %c0_91] : memref<9x8x8xf32, #tpu.memory_space<vmem>>, vector<1x8x8xf32>
    %170 = vector.shape_cast %169 : vector<1x8x8xf32> to vector<8x8xf32>
    %cst_92 = arith.constant dense<0.000000e+00> : vector<256x8xf32>
    %171 = tpu.matmul %168, %170, %cst_92 {dimension_numbers = #tpu.dot_dimension_numbers<[1], [0], [0], [1], [0, 0, 1, 1], [], []>} : vector<256x8xf32>, vector<8x8xf32>, vector<256x8xf32> -> vector<256x8xf32>
    %172 = arith.addf %166, %171 : vector<256x8xf32>
    %173 = vector.extract_strided_slice %141 {offsets = [1, 2, 0], sizes = [16, 16, 8], strides = [1, 1, 1]} : vector<18x18x8xf32> to vector<16x16x8xf32>
    %174 = vector.shape_cast %173 : vector<16x16x8xf32> to vector<256x8xf32>
    %c5_93 = arith.constant 5 : index
    %c0_94 = arith.constant 0 : index
    %c0_95 = arith.constant 0 : index
    %175 = vector.load %arg4[%c5_93, %c0_94, %c0_95] : memref<9x8x8xf32, #tpu.memory_space<vmem>>, vector<1x8x8xf32>
    %176 = vector.shape_cast %175 : vector<1x8x8xf32> to vector<8x8xf32>
    %cst_96 = arith.constant dense<0.000000e+00> : vector<256x8xf32>
    %177 = tpu.matmul %174, %176, %cst_96 {dimension_numbers = #tpu.dot_dimension_numbers<[1], [0], [0], [1], [0, 0, 1, 1], [], []>} : vector<256x8xf32>, vector<8x8xf32>, vector<256x8xf32> -> vector<256x8xf32>
    %178 = arith.addf %172, %177 : vector<256x8xf32>
    %179 = vector.extract_strided_slice %141 {offsets = [2, 0, 0], sizes = [16, 16, 8], strides = [1, 1, 1]} : vector<18x18x8xf32> to vector<16x16x8xf32>
    %180 = vector.shape_cast %179 : vector<16x16x8xf32> to vector<256x8xf32>
    %c6_97 = arith.constant 6 : index
    %c0_98 = arith.constant 0 : index
    %c0_99 = arith.constant 0 : index
    %181 = vector.load %arg4[%c6_97, %c0_98, %c0_99] : memref<9x8x8xf32, #tpu.memory_space<vmem>>, vector<1x8x8xf32>
    %182 = vector.shape_cast %181 : vector<1x8x8xf32> to vector<8x8xf32>
    %cst_100 = arith.constant dense<0.000000e+00> : vector<256x8xf32>
    %183 = tpu.matmul %180, %182, %cst_100 {dimension_numbers = #tpu.dot_dimension_numbers<[1], [0], [0], [1], [0, 0, 1, 1], [], []>} : vector<256x8xf32>, vector<8x8xf32>, vector<256x8xf32> -> vector<256x8xf32>
    %184 = arith.addf %178, %183 : vector<256x8xf32>
    %185 = vector.extract_strided_slice %141 {offsets = [2, 1, 0], sizes = [16, 16, 8], strides = [1, 1, 1]} : vector<18x18x8xf32> to vector<16x16x8xf32>
    %186 = vector.shape_cast %185 : vector<16x16x8xf32> to vector<256x8xf32>
    %c7_101 = arith.constant 7 : index
    %c0_102 = arith.constant 0 : index
    %c0_103 = arith.constant 0 : index
    %187 = vector.load %arg4[%c7_101, %c0_102, %c0_103] : memref<9x8x8xf32, #tpu.memory_space<vmem>>, vector<1x8x8xf32>
    %188 = vector.shape_cast %187 : vector<1x8x8xf32> to vector<8x8xf32>
    %cst_104 = arith.constant dense<0.000000e+00> : vector<256x8xf32>
    %189 = tpu.matmul %186, %188, %cst_104 {dimension_numbers = #tpu.dot_dimension_numbers<[1], [0], [0], [1], [0, 0, 1, 1], [], []>} : vector<256x8xf32>, vector<8x8xf32>, vector<256x8xf32> -> vector<256x8xf32>
    %190 = arith.addf %184, %189 : vector<256x8xf32>
    %191 = vector.extract_strided_slice %141 {offsets = [2, 2, 0], sizes = [16, 16, 8], strides = [1, 1, 1]} : vector<18x18x8xf32> to vector<16x16x8xf32>
    %192 = vector.shape_cast %191 : vector<16x16x8xf32> to vector<256x8xf32>
    %c8_105 = arith.constant 8 : index
    %c0_106 = arith.constant 0 : index
    %c0_107 = arith.constant 0 : index
    %193 = vector.load %arg4[%c8_105, %c0_106, %c0_107] : memref<9x8x8xf32, #tpu.memory_space<vmem>>, vector<1x8x8xf32>
    %194 = vector.shape_cast %193 : vector<1x8x8xf32> to vector<8x8xf32>
    %cst_108 = arith.constant dense<0.000000e+00> : vector<256x8xf32>
    %195 = tpu.matmul %192, %194, %cst_108 {dimension_numbers = #tpu.dot_dimension_numbers<[1], [0], [0], [1], [0, 0, 1, 1], [], []>} : vector<256x8xf32>, vector<8x8xf32>, vector<256x8xf32> -> vector<256x8xf32>
    %196 = arith.addf %190, %195 : vector<256x8xf32>
    %cst_109 = arith.constant 0.000000e+00 : f32
    %197 = vector.broadcast %cst_109 : f32 to vector<256x8xf32>
    %198 = arith.cmpf oge, %196, %197 : vector<256x8xf32>
    %cst_110 = arith.constant 0.00999999977 : f32
    %199 = vector.broadcast %cst_110 : f32 to vector<256x8xf32>
    %200 = arith.mulf %199, %196 : vector<256x8xf32>
    %201 = arith.select %198, %196, %200 : vector<256x8xi1>, vector<256x8xf32>
    %202 = vector.shape_cast %201 : vector<256x8xf32> to vector<16x16x8xf32>
    %203 = vector.shape_cast %202 : vector<16x16x8xf32> to vector<256x8xf32>
    %204 = tpu.transpose %203, [1, 0] : vector<256x8xf32> -> vector<8x256xf32>
    %c0_111 = arith.constant 0 : index
    %c0_112 = arith.constant 0 : index
    %c0_113 = arith.constant 0 : index
    %205 = vector.load %arg5[%c0_111, %c0_112, %c0_113] : memref<1x8x256xf32, #tpu.memory_space<vmem>>, vector<1x8x256xf32>
    %206 = vector.shape_cast %205 : vector<1x8x256xf32> to vector<8x256xf32>
    %207 = vector.shape_cast %204 : vector<8x256xf32> to vector<1x8x256xf32>
    tpu.vector_store %arg5[%c0_111, %c0_112, %c0_113], %207 {strides = array<i32>} : memref<1x8x256xf32, #tpu.memory_space<vmem>>, vector<1x8x256xf32>,
    return
  }
  func.func @transform_0(%arg0: i32) -> (i32, i32, i32, i32) {
    %c0_i32 = arith.constant 0 : i32
    %c0_i32_0 = arith.constant 0 : i32
    %c0_i32_1 = arith.constant 0 : i32
    %c0_i32_2 = arith.constant 0 : i32
    return %arg0, %c0_i32, %c0_i32_0, %c0_i32_1 : i32, i32, i32, i32
  }
  func.func @transform_1(%arg0: i32) -> (i32, i32, i32) {
    %c0_i32 = arith.constant 0 : i32
    %c0_i32_0 = arith.constant 0 : i32
    %c0_i32_1 = arith.constant 0 : i32
    %c0_i32_2 = arith.constant 0 : i32
    return %c0_i32, %c0_i32_0, %c0_i32_1 : i32, i32, i32
  }
  func.func @transform_2(%arg0: i32) -> (i32, i32, i32) {
    %c0_i32 = arith.constant 0 : i32
    %c0_i32_0 = arith.constant 0 : i32
    %c0_i32_1 = arith.constant 0 : i32
    %c0_i32_2 = arith.constant 0 : i32
    return %c0_i32, %c0_i32_0, %c0_i32_1 : i32, i32, i32
  }
  func.func @transform_3(%arg0: i32) -> (i32, i32, i32) {
    %c0_i32 = arith.constant 0 : i32
    %c0_i32_0 = arith.constant 0 : i32
    %c0_i32_1 = arith.constant 0 : i32
    %c0_i32_2 = arith.constant 0 : i32
    return %c0_i32, %c0_i32_0, %c0_i32_1 : i32, i32, i32
  }
  func.func @transform_4(%arg0: i32) -> (i32, i32, i32) {
    %c0_i32 = arith.constant 0 : i32
    %c0_i32_0 = arith.constant 0 : i32
    %c0_i32_1 = arith.constant 0 : i32
    return %arg0, %c0_i32, %c0_i32_0 : i32, i32, i32
  }
}

</mosaic_0001>

<bundles_post_ra>
// kernel: tpu_custom_call.1
= control target key start
LH: loop header
LB: loop body
LE: loop exit
PB: predicated region body
PF: predicated region fallthrough
CT: control target
= control target key end

     0   :  { %9 = vsyncpa [#allocation3], 0  ;;  %s16647_s0 = inlined_call_operand.vmem [shape: f32[2,16,16,4], index: 0, kind: input, shape index: {}]   ;;  %s16648_s1 = inlined_call_operand.vmem [shape: f32[9,4,8], index: 1, kind: input, shape index: {}]   ;;  %s16649_s2 = inlined_call_operand.vmem [shape: f32[9,8,8], index: 2, kind: input, shape index: {}]   ;;  %s16650_s3 = inlined_call_operand.vmem [shape: f32[9,8,8], index: 3, kind: input, shape index: {}]   ;;  %s16651_s4 = inlined_call_operand.hbm [shape: f32[2,8,256], index: 4, kind: output, shape index: {}]  }
   0x1   :  { %11 = vsyncpa [#allocation3 + $0x1], 0  ;;  %s13219_s15 = smov 0   ;;  %s13221_s16 = smov 0  }
   0x2   :  { %s13223_s17 = smov 0   ;;  %s13225_s18 = smov 0  }
   0x3 LB: > { %s13240_s19 = sadd.s32 4294967295, %s13191_s18   ;;  %s9167_s20 = sadd.s32 4294967294, %s13191_s18   ;;  %s13191_s18 = sphi %s13225_s18, %s17246_s18   ;;  %s13187_s17 = sphi %s13223_s17, %s17245_s17   ;;  %s13183_s16 = sphi %s13221_s16, %s17244_s16   ;;  %s13179_s15 = sphi %s13219_s15, %s17243_s15  }
   0x4   : > { %s13244_s21 = sadd.s32 1, %s13191_s18   ;;  %s113_s22 = sadd.s32 1, %s13187_s17 }
   0x5   : > { %s110_s23 = ssub.s32 %s13191_s18, %s13244_s21  ;;  %p123_p0 = scmp.ne.s32.totalorder %s13187_s17, %s13183_s16 }
   0x6   : > { %p111_p1 = scmp.eq.s32.totalorder %s110_s23, 0  ;;  %p124_p2 = scmp.eq.s32.totalorder %s13240_s19, 1 }
   0x7   : > { %p129_p3 = scmp.ne.s32.totalorder %s13183_s16, %s13179_s15  ;;  %p130_p4 = scmp.eq.s32.totalorder %s9167_s20, 1 }
   0x8   : > { %s13255_s24 = scalar_select %p111_p1, %s13187_s17, %s113_s22  }
   0x9   : > { %p13257_p5 = por %p124_p2, %p123_p0  ;;  %p13261_p6 = por %p130_p4, %p129_p3 }
   0xa   : > { %p9170_p7 = scmp.ge.s32.totalorder %s13191_s18, 1  ;;  %p165_p8 = scmp.lt.s32.totalorder %s13191_s18, 3 }
   0xc   : > { %p166_p9 = pnand %p9170_p7, %p165_p8 }
   0xe   : > { %169 = sbr.rel (%p166_p9) target bundleno = 2141 (0x85d), region = 36 }
  0x15   : > { %vm575_vm0 = vcmask 1043456   ;;  %v13270_v0 = vld [vmem:[%s16648_s1 + $0x10] sm:$0xf]  ;;  %v9174_v1 = vld [vmem:[%s16648_s1 + $0x4] sm:$0xf]  ;;  %p191_p10 = scmp.lt.s32.totalorder %s13240_s19, 1 }
  0x16   : > { %16898 = vst [vmem:[#allocation5_spill] sm:$0xff] %v13270_v0  ;;  %11169 = vmatprep.subr.msk.mxu0 %vm575_vm0, %v13270_v0  ;;  %10969 = vmatprep.subr.msk.mxu1 %vm575_vm0, %v9174_v1  ;;  %v9343_v2 = vld [vmem:[%s16648_s1 + $0x14] sm:$0xf]  ;;  %v405_v3 = vld [vmem:[%s16648_s1] sm:$0xf]  ;;  %vm260_vm1 = vcmask 1040384  }
  0x17   : > { %11170 = vmatpush3.msk.msra.mxu0 %vm575_vm0, %v13270_v0  ;;  %10970 = vmatpush3.msk.msra.mxu1 %vm575_vm0, %v9174_v1  ;;  %s192_s7 = scalar_select %p191_p10, %s13240_s19, 1  ;;  %vm436_vm2 = vcmask 1046528   ;;  %vm514_vm3 = vcmask 31744   ;;  %v13342_v39 = vld [vmem:[%s16648_s1 + $0x18] sm:$0xf]  ;;  %vm1092_vm4 = vcmask 1045504  }
  0x18   : > { %11219 = vmatprep.subr.msk.mxu0 %vm575_vm0, %v9343_v2  ;;  %11019 = vmatprep.subr.msk.mxu1 %vm575_vm0, %v405_v3  ;;  %v13358_v45 = vld [vmem:[%s16648_s1 + $0x8] sm:$0xf]  ;;  %vm3466_vm11 = vcmask 64512   ;;  %s188_s11 = sand.u32 1, %s13183_s16   ;;  %s10077_s20 = sshll.u32 %s13240_s19, 8 }
  0x19   : > { %s10076_s10 = sshll.u32 %s192_s7, 8  ;;  %s9171_s12 = sshll.u32 %s188_s11, 4 }
  0x1a   : > { %s13294_s13 = scalar_lea.vmem %s16647_s0, %s10076_s10  ;;  %s16607_s27 = scalar_lea.hbm %s16651_s4, %s10077_s20 }
  0x1b   : > { %v196_v4 = vld [vmem:[%s13294_s13] sm:$0xff]  ;;  %v197_v5 = vld [vmem:[%s13294_s13 + $0x8] sm:$0xff]  ;;  %v198_v6 = vld [vmem:[%s13294_s13 + $0x10] sm:$0xff]  ;;  %s9094_s28 = scalar_lea.sflag [#allocation3], %s188_s11  ;;  %s13193_s30 = smov [#allocation2]  }
  0x1c   : > { %v261_v7 = vrot.slane %v196_v4, 7  ;;  %v262_v8 = vrot.slane %v197_v5, 7  ;;  %v341_v9 = vrot.slane %v197_v5, 6  ;;  %v199_v10 = vld [vmem:[%s13294_s13 + $0x18] sm:$0xff]  ;;  %v264_v11 = vrot.slane %v198_v6, 7  ;;  %v200_v12 = vld [vmem:[%s13294_s13 + $0x20] sm:$0xff] }
  0x1d   : > { %v265_v13 = vrot.slane %v199_v10, 7  ;;  %v342_v14 = vrot.slane %v199_v10, 6  ;;  %v201_v15 = vld [vmem:[%s13294_s13 + $0x28] sm:$0xff]  ;;  %v267_v16 = vrot.slane %v200_v12, 7  ;;  %v202_v24 = vld [vmem:[%s13294_s13 + $0x30] sm:$0xff]  ;;  %v203_v33 = vld [vmem:[%s13294_s13 + $0x38] sm:$0xff] }
  0x1e   : > { %v13303_v17 = vsel %vm260_vm1, %v261_v7, %v262_v8  ;;  %v13306_v18 = vsel %vm260_vm1, %v196_v4, %v261_v7  ;;  %v13309_v19 = vsel %vm260_vm1, %v262_v8, %v341_v9  ;;  %v13312_v20 = vsel %vm260_vm1, %v198_v6, %v264_v11  ;;  %v204_v38 = vld [vmem:[%s13294_s13 + $0x40] sm:$0xff]  ;;  %v205_v44 = vld [vmem:[%s13294_s13 + $0x48] sm:$0xff]  ;;  %v206_v54 = vld [vmem:[%s13294_s13 + $0x50] sm:$0xff]  ;;  %s13133_s19 = sshll.u32 %s13193_s30, 4  ;;  %s13134_s19 = int_to_ptr.vmem [resolvable:$false] %s13133_s19 }
  0x1f   : > { %16899 = vst [vmem:[#allocation6_spill] sm:$0xff] %v13303_v17  ;;  %16900 = vst [vmem:[#allocation7_spill] sm:$0xff] %v13306_v18  ;;  %v437_v21 = vrot.slane %v13306_v18, 1  ;;  %v438_v22 = vrot.slane %v13303_v17, 1  ;;  %v440_v23 = vrot.slane %v13309_v19, 1  ;;  %v13319_v25 = vsel %vm260_vm1, %v264_v11, %v265_v13  ;;  %v207_v63 = vld [vmem:[%s13294_s13 + $0x58] sm:$0xff] }
  0x20   : > { %v442_v26 = vrot.slane %v13312_v20, 1  ;;  %v13323_v27 = vsel %vm260_vm1, %v265_v13, %v342_v14  ;;  %v268_v28 = vrot.slane %v201_v15, 7  ;;  %v443_v31 = vrot.slane %v13319_v25, 1  ;;  %v208_v1 = vld [vmem:[%s13294_s13 + $0x60] sm:$0xff]  ;;  %v209_v6 = vld [vmem:[%s13294_s13 + $0x68] sm:$0xff]  ;;  %s13135_s5 = scalar_lea.vmem %s13134_s19, 512 }
  0x21   : > { %v439_v29 = vsel %vm436_vm2, %v437_v21, %v438_v22  ;;  %v441_v30 = vsel %vm436_vm2, %v438_v22, %v440_v23  ;;  %v445_v32 = vrot.slane %v13323_v27, 1  ;;  %v13336_v35 = vsel %vm260_vm1, %v200_v12, %v267_v16  ;;  %v211_v21 = vld [vmem:[%s13294_s13 + $0x78] sm:$0xff] }
  0x22   : > { %10971 = vmatprep.mubr.msk.f32.mxu1 %vm514_vm3, %v439_v29  ;;  %11171 = vmatprep.mubr.msk.f32.mxu0 %vm514_vm3, %v439_v29  ;;  %v13333_v34 = vsel %vm260_vm1, %v267_v16, %v268_v28  ;;  %v343_v36 = vrot.slane %v201_v15, 6  ;;  %v270_v37 = vrot.slane %v202_v24, 7  ;;  %v13347_v40 = vsel %vm436_vm2, %v442_v26, %v443_v31  ;;  %v210_v16 = vld [vmem:[%s13294_s13 + $0x70] sm:$0xff] }
  0x23   : > { %10972 = vmatmul.mubr.msk.f32.vlgmr.msra.gmra.mrb[0].mxu1 %vm514_vm3, %v441_v30  ;;  %11172 = vmatmul.mubr.msk.f32.vlgmr.msra.gmra.mrb[0].mxu0 %vm514_vm3, %v441_v30  ;;  %16901 = vst [vmem:[#allocation8_spill] sm:$0xff] %v13347_v40  ;;  %v13350_v41 = vsel %vm436_vm2, %v443_v31, %v445_v32  ;;  %v447_v42 = vrot.slane %v13336_v35, 1  ;;  %v448_v43 = vrot.slane %v13333_v34, 1  ;;  %v271_v47 = vrot.slane %v203_v33, 7 }
  0x24   : > { %16902 = vst [vmem:[#allocation9_spill] sm:$0xff] %v13350_v41  ;;  %11220 = vmatpush3.msk.msra.mxu0 %vm575_vm0, %v9343_v2  ;;  %10974 = vmatprep.mubr.msk.f32.mxu1 %vm514_vm3, %v439_v29  ;;  %v13363_v46 = vsel %vm260_vm1, %v268_v28, %v343_v36  ;;  %v13366_v48 = vsel %vm260_vm1, %v202_v24, %v270_v37  ;;  %v344_v49 = vrot.slane %v203_v33, 6  ;;  %v273_v53 = vrot.slane %v204_v38, 7 }
  0x25   : > { %11174 = vmatprep.mubr.msk.f32.mxu0 %vm514_vm3, %v13347_v40  ;;  %11020 = vmatpush3.msk.msra.mxu1 %vm575_vm0, %v405_v3  ;;  %v13372_v50 = vsel %vm436_vm2, %v447_v42, %v448_v43  ;;  %v450_v51 = vrot.slane %v13363_v46, 1  ;;  %v452_v52 = vrot.slane %v13366_v48, 1  ;;  %v13378_v55 = vsel %vm260_vm1, %v270_v37, %v271_v47 }
  0x26   : > { %16903 = vst [vmem:[#allocation10_spill] sm:$0xff] %v13372_v50  ;;  %v13381_v56 = vsel %vm260_vm1, %v271_v47, %v344_v49  ;;  %v274_v57 = vrot.slane %v205_v44, 7  ;;  %v345_v58 = vrot.slane %v205_v44, 6  ;;  %11269 = vmatprep.subr.msk.mxu0 %vm575_vm0, %v13342_v39  ;;  %11069 = vmatprep.subr.msk.mxu1 %vm575_vm0, %v13358_v45  ;;  %v453_v60 = vrot.slane %v13378_v55, 1 }
  0x27   : > { %10975 = vmatmul.mubr.msk.f32.gmra.mrb[2].mxu1 %vm514_vm3, %v441_v30  ;;  %11175 = vmatmul.mubr.msk.f32.gmra.mrb[2].mxu0 %vm514_vm3, %v13350_v41  ;;  %v13391_v59 = vsel %vm436_vm2, %v448_v43, %v450_v51  ;;  %v455_v61 = vrot.slane %v13381_v56, 1  ;;  %v13396_v62 = vsel %vm260_vm1, %v204_v38, %v273_v53  ;;  %v276_v5 = vrot.slane %v206_v54, 7 }
  0x28   : > { %16904 = vst [vmem:[#allocation11_spill] sm:$0xff] %v13391_v59  ;;  %10977 = vmatprep.mubr.msk.f32.mxu1 %vm514_vm3, %v13347_v40  ;;  %11177 = vmatprep.mubr.msk.f32.mxu0 %vm514_vm3, %v13372_v50  ;;  %v13405_v2 = vsel %vm260_vm1, %v273_v53, %v274_v57  ;;  %v457_v3 = vrot.slane %v13396_v62, 1  ;;  %v13409_v4 = vsel %vm260_vm1, %v274_v57, %v345_v58  ;;  %v277_v9 = vrot.slane %v207_v63, 7  ;;  %v213_v53 = vld [vmem:[%s13294_s13 + $0x88] sm:$0xff] }
  0x29   : > { %v13413_v7 = vsel %vm436_vm2, %v452_v52, %v453_v60  ;;  %v458_v8 = vrot.slane %v13405_v2, 1  ;;  %v13417_v10 = vsel %vm260_vm1, %v206_v54, %v276_v5  ;;  %v346_v11 = vrot.slane %v207_v63, 6  ;;  %v212_v52 = vld [vmem:[%s13294_s13 + $0x80] sm:$0xff] }
  0x2a   : > { %16905 = vst [vmem:[#allocation12_spill] sm:$0xff] %v13413_v7  ;;  %v279_v12 = vrot.slane %v208_v1, 7  ;;  %v13424_v13 = vsel %vm436_vm2, %v453_v60, %v455_v61  ;;  %v460_v14 = vrot.slane %v13409_v4, 1  ;;  %v280_v15 = vrot.slane %v209_v6, 7 }
  0x2b   : > { %10978 = vmatmul.mubr.msk.f32.gmra.mrb[4].mxu1 %vm514_vm3, %v13350_v41  ;;  %11178 = vmatmul.mubr.msk.f32.gmra.mrb[4].mxu0 %vm514_vm3, %v13391_v59  ;;  %16906 = vst [vmem:[#allocation13_spill] sm:$0xff] %v13424_v13  ;;  %v13434_v22 = vsel %vm436_vm2, %v457_v3, %v458_v8  ;;  %v13437_v23 = vsel %vm260_vm1, %v276_v5, %v277_v9  ;;  %v462_v24 = vrot.slane %v13417_v10, 1  ;;  %v347_v31 = vrot.slane %v209_v6, 6  ;;  %v214_v5 = vld [vmem:[%s13294_s13 + $0x90] sm:$0xff]  ;;  %v215_v6 = vld [vmem:[%s13294_s13 + $0x98] sm:$0xff] }
  0x2c   : > { %10980 = vmatprep.mubr.msk.f32.mxu1 %vm514_vm3, %v13372_v50  ;;  %11180 = vmatprep.mubr.msk.f32.mxu0 %vm514_vm3, %v13413_v7  ;;  %16907 = vst [vmem:[#allocation14_spill] sm:$0xff] %v13434_v22  ;;  %v13441_v26 = vsel %vm260_vm1, %v277_v9, %v346_v11  ;;  %v463_v28 = vrot.slane %v13437_v23, 1  ;;  %v13445_v29 = vsel %vm260_vm1, %v279_v12, %v280_v15  ;;  %v282_v32 = vrot.slane %v210_v16, 7  ;;  %v222_v50 = vld [vmem:[%s13294_s13 + $0xd0] sm:$0xff]  ;;  %v223_v41 = vld [vmem:[%s13294_s13 + $0xd8] sm:$0xff] }
  0x2d   : > { %v13448_v30 = vsel %vm260_vm1, %v208_v1, %v279_v12  ;;  %v283_v33 = vrot.slane %v211_v21, 7  ;;  %v13459_v36 = vsel %vm436_vm2, %v458_v8, %v460_v14  ;;  %v465_v37 = vrot.slane %v13441_v26, 1 }
  0x2e   : > { %16908 = vst [vmem:[#allocation15_spill] sm:$0xff] %v13459_v36  ;;  %v467_v38 = vrot.slane %v13448_v30, 1  ;;  %v468_v42 = vrot.slane %v13445_v29, 1  ;;  %v13465_v43 = vsel %vm436_vm2, %v462_v24, %v463_v28  ;;  %v13468_v44 = vsel %vm260_vm1, %v280_v15, %v347_v31  ;;  %v216_v31 = vld [vmem:[%s13294_s13 + $0xa0] sm:$0xff] }
  0x2f   : > { %10981 = vmatmul.mubr.msk.f32.gmra.mrb[6].mxu1 %vm514_vm3, %v13391_v59  ;;  %11181 = vmatmul.mubr.msk.f32.gmra.mrb[6].mxu0 %vm514_vm3, %v13424_v13  ;;  %16909 = vst [vmem:[#allocation16_spill] sm:$0xff] %v13465_v43  ;;  %v348_v47 = vrot.slane %v211_v21, 6  ;;  %v13471_v49 = vsel %vm260_vm1, %v282_v32, %v283_v33  ;;  %v13474_v51 = vsel %vm260_vm1, %v210_v16, %v282_v32  ;;  %v470_v58 = vrot.slane %v13468_v44, 1 }
  0x30   : > { %10983 = vmatprep.mubr.msk.f32.mxu1 %vm514_vm3, %v13413_v7  ;;  %11183 = vmatprep.mubr.msk.f32.mxu0 %vm514_vm3, %v13434_v22  ;;  %v13487_v54 = vsel %vm436_vm2, %v463_v28, %v465_v37  ;;  %v13490_v57 = vsel %vm436_vm2, %v467_v38, %v468_v42  ;;  %v472_v60 = vrot.slane %v13474_v51, 1  ;;  %v473_v61 = vrot.slane %v13471_v49, 1 }
  0x31   : > { %16910 = vst [vmem:[#allocation17_spill] sm:$0xff] %v13487_v54  ;;  %16911 = vst [vmem:[#allocation18_spill] sm:$0xff] %v13490_v57  ;;  %v13496_v63 = vsel %vm260_vm1, %v283_v33, %v348_v47  ;;  %v285_v1 = vrot.slane %v212_v52, 7  ;;  %v286_v3 = vrot.slane %v213_v53, 7  ;;  %v349_v8 = vrot.slane %v213_v53, 6 }
  0x32   : > { %v13509_v9 = vsel %vm436_vm2, %v468_v42, %v470_v58  ;;  %v475_v11 = vrot.slane %v13496_v63, 1  ;;  %v1093_v12 = vrot.slane %v13306_v18, 2  ;;  %v1094_v14 = vrot.slane %v13303_v17, 2  ;;  %v217_v42 = vld [vmem:[%s13294_s13 + $0xa8] sm:$0xff] }
  0x33   : > { %10984 = vmatmul.mubr.msk.f32.gmra.mrb[8].mxu1 %vm514_vm3, %v13424_v13  ;;  %11184 = vmatmul.mubr.msk.f32.gmra.mrb[8].mxu0 %vm514_vm3, %v13459_v36  ;;  %16912 = vst [vmem:[#allocation19_spill] sm:$0xff] %v13509_v9  ;;  %v13515_v15 = vsel %vm436_vm2, %v472_v60, %v473_v61  ;;  %v13518_v16 = vsel %vm260_vm1, %v212_v52, %v285_v1  ;;  %v288_v21 = vrot.slane %v214_v5, 7  ;;  %v289_v24 = vrot.slane %v215_v6, 7 }
  0x34   : > { %10986 = vmatprep.mubr.msk.f32.mxu1 %vm514_vm3, %v13434_v22  ;;  %11186 = vmatprep.mubr.msk.f32.mxu0 %vm514_vm3, %v13465_v43  ;;  %16913 = vst [vmem:[#allocation20_spill] sm:$0xff] %v13515_v15  ;;  %v13521_v28 = vsel %vm260_vm1, %v285_v1, %v286_v3  ;;  %v1096_v32 = vrot.slane %v13309_v19, 2  ;;  %v1098_v33 = vrot.slane %v13312_v20, 2  ;;  %v1099_v37 = vrot.slane %v13319_v25, 2 }
  0x35   : > { %v13532_v38 = vsel %vm260_vm1, %v286_v3, %v349_v8  ;;  %v13540_v19 = vsel %vm436_vm2, %v473_v61, %v475_v11  ;;  %v13543_v47 = vsel %vm1092_vm4, %v1093_v12, %v1094_v14  ;;  %v477_v52 = vrot.slane %v13518_v16, 1  ;;  %v219_v12 = vld [vmem:[%s13294_s13 + $0xb8] sm:$0xff] }
  0x36   : > { %16914 = vst [vmem:[#allocation21_spill] sm:$0xff] %v13540_v19  ;;  %v350_v53 = vrot.slane %v215_v6, 6  ;;  %v478_v58 = vrot.slane %v13521_v28, 1  ;;  %v13548_v60 = vsel %vm260_vm1, %v288_v21, %v289_v24  ;;  %v13551_v1 = vsel %vm260_vm1, %v214_v5, %v288_v21 }
  0x37   : > { %10987 = vmatmul.mubr.msk.f32.gmra.mrb[10].mxu1 %vm514_vm3, %v13459_v36  ;;  %11187 = vmatmul.mubr.msk.f32.gmra.mrb[10].mxu0 %vm514_vm3, %v13487_v54  ;;  %v291_v3 = vrot.slane %v216_v31, 7  ;;  %v480_v8 = vrot.slane %v13532_v38, 1  ;;  %v1101_v61 = vrot.slane %v13323_v27, 2  ;;  %v292_v11 = vrot.slane %v217_v42, 7 }
  0x38   : > { %10989 = vmatprep.mubr.msk.f32.mxu1 %vm514_vm3, %v13465_v43  ;;  %11189 = vmatprep.mubr.msk.f32.mxu0 %vm514_vm3, %v13490_v57  ;;  %v13562_v6 = vsel %vm1092_vm4, %v1094_v14, %v1096_v32  ;;  %v13565_v5 = vsel %vm1092_vm4, %v1098_v33, %v1099_v37  ;;  %v1103_v21 = vrot.slane %v13336_v35, 2  ;;  %v482_v27 = vrot.slane %v13551_v1, 1 }
  0x39   : > { %16915 = vst [vmem:[#allocation22_spill] sm:$0xff] %v13565_v5  ;;  %v1104_v14 = vrot.slane %v13333_v34, 2  ;;  %v13576_v32 = vsel %vm260_vm1, %v289_v24, %v350_v53  ;;  %v13579_v33 = vsel %vm436_vm2, %v477_v52, %v478_v58  ;;  %v295_v43 = vrot.slane %v219_v12, 7  ;;  %v220_v53 = vld [vmem:[%s13294_s13 + $0xc0] sm:$0xff]  ;;  %v13598_v52 = vld [vmem:[%s16648_s1 + $0x1c] sm:$0xf] }
  0x3a   : > { %16916 = vst [vmem:[#allocation23_spill] sm:$0xff] %v13579_v33  ;;  %v13585_v36 = vsel %vm436_vm2, %v478_v58, %v480_v8  ;;  %v13588_v22 = vsel %vm1092_vm4, %v1099_v37, %v1101_v61  ;;  %v1106_v13 = vrot.slane %v13363_v46, 2  ;;  %v13592_v24 = vsel %vm260_vm1, %v291_v3, %v292_v11 }
  0x3b   : > { %10990 = vmatmul.mubr.msk.f32.gmra.mrb[12].mxu1 %vm514_vm3, %v13487_v54  ;;  %11190 = vmatmul.mubr.msk.f32.gmra.mrb[12].mxu0 %vm514_vm3, %v13509_v9  ;;  %v351_v54 = vrot.slane %v217_v42, 6  ;;  %v13582_v42 = vsel %vm260_vm1, %v216_v31, %v291_v3  ;;  %16917 = vst [vmem:[#allocation24_spill] sm:$0xff] %v13585_v36  ;;  %16918 = vst [vmem:[#allocation25_spill] sm:$0xff] %v13588_v22  ;;  %v485_v31 = vrot.slane %v13576_v32, 1  ;;  %v1108_v37 = vrot.slane %v13366_v48, 2  ;;  %v221_v3 = vld [vmem:[%s13294_s13 + $0xc8] sm:$0xff] }
  0x3c   : > { %10992 = vmatprep.mubr.msk.f32.mxu1 %vm514_vm3, %v13490_v57  ;;  %11192 = vmatprep.mubr.msk.f32.mxu0 %vm514_vm3, %v13515_v15  ;;  %v218_v57 = vld [vmem:[%s13294_s13 + $0xb0] sm:$0xff]  ;;  %v1109_v46 = vrot.slane %v13378_v55, 2  ;;  %v13619_v61 = vsel %vm1092_vm4, %v1103_v21, %v1104_v14  ;;  %v352_v7 = vrot.slane %v219_v12, 6  ;;  %v13634_v21 = vsel %vm1092_vm4, %v1104_v14, %v1106_v13 }
  0x3d   : > { %v13608_v58 = vsel %vm260_vm1, %v292_v11, %v351_v54  ;;  %16920 = vst [vmem:[#allocation27_spill] sm:$0xff] %v13619_v61  ;;  %v488_v54 = vrot.slane %v13592_v24, 1  ;;  %16921 = vst [vmem:[#allocation28_spill] sm:$0xff] %v13634_v21  ;;  %v298_v59 = vrot.slane %v221_v3, 7  ;;  %v1113_v13 = vrot.slane %v13396_v62, 2 }
  0x3e   : > { %v490_v12 = vrot.slane %v13608_v58, 1  ;;  %v1114_v14 = vrot.slane %v13405_v2, 2 }
  0x3f   : > { %10993 = vmatmul.mubr.msk.f32.gmra.mrb[14].mxu1 %vm514_vm3, %v13509_v9  ;;  %11193 = vmatmul.mubr.msk.f32.gmra.mrb[14].mxu0 %vm514_vm3, %v13540_v19  ;;  %v483_v9 = vrot.slane %v13548_v60, 1 }
  0x40   : > { %10995 = vmatprep.mubr.msk.f32.mxu1 %vm514_vm3, %v13515_v15  ;;  %11221 = vmatprep.mubr.msk.f32.mxu0 %vm514_vm3, %v13543_v47  ;;  %v294_v15 = vrot.slane %v218_v57, 7 }
  0x41   : > { %v13616_v8 = vsel %vm436_vm2, %v482_v27, %v483_v9  ;;  %v1111_v27 = vrot.slane %v13381_v56, 2 }
  0x42   : > { %16919 = vst [vmem:[#allocation26_spill] sm:$0xff] %v13616_v8  ;;  %v13629_v11 = vsel %vm260_vm1, %v218_v57, %v294_v15  ;;  %v13645_v57 = vsel %vm436_vm2, %v483_v9, %v485_v31  ;;  %v13659_v9 = vsel %vm260_vm1, %v295_v43, %v352_v7  ;;  %v353_v31 = vrot.slane %v221_v3, 6  ;;  %v225_v3 = vld [vmem:[%s13294_s13 + $0xe8] sm:$0xff] }
  0x43   : > { %10996 = vmatmul.mubr.msk.f32.gmra.mrb[16].mxu1 %vm514_vm3, %v13540_v19  ;;  %11222 = vmatmul.mubr.msk.f32.vlgmr.msra.gmra.mrb[0].mxu0 %vm514_vm3, %v13562_v6  ;;  %v487_v19 = vrot.slane %v13582_v42, 1  ;;  %16922 = vst [vmem:[#allocation29_spill] sm:$0xff] %v13645_v57  ;;  %v492_v56 = vrot.slane %v13629_v11, 1  ;;  %v13681_v7 = vsel %vm1092_vm4, %v1113_v13, %v1114_v14 }
  0x44   : > { %11270 = vmatpush3.msk.msra.mxu0 %vm575_vm0, %v13342_v39  ;;  %10998 = vmatprep.mubr.msk.f32.mxu1 %vm514_vm3, %v13579_v33  ;;  %v13626_v39 = vsel %vm260_vm1, %v294_v15, %v295_v43  ;;  %v297_v33 = vrot.slane %v220_v53, 7  ;;  %v13648_v15 = vsel %vm1092_vm4, %v1108_v37, %v1109_v46  ;;  %16926 = vst [vmem:[#allocation33_spill] sm:$0xff] %v13681_v7  ;;  %v495_v43 = vrot.slane %v13659_v9, 1 }
  0x45   : > { %11224 = vmatprep.mubr.msk.f32.mxu0 %vm514_vm3, %v13565_v5  ;;  %11319 = vmatprep.subr.msk.mxu0 %vm575_vm0, %v13598_v52  ;;  %16923 = vst [vmem:[#allocation30_spill] sm:$0xff] %v13648_v15  ;;  %v13662_v37 = vsel %vm436_vm2, %v487_v19, %v488_v54  ;;  %v13671_v5 = vsel %vm1092_vm4, %v1109_v46, %v1111_v27  ;;  %v1116_v19 = vrot.slane %v13409_v4, 2  ;;  %v224_v46 = vld [vmem:[%s13294_s13 + $0xe0] sm:$0xff] }
  0x46   : > { %16924 = vst [vmem:[#allocation31_spill] sm:$0xff] %v13662_v37  ;;  %v13665_v40 = vsel %vm260_vm1, %v220_v53, %v297_v33  ;;  %v13674_v0 = vsel %vm260_vm1, %v297_v33, %v298_v59  ;;  %v1118_v53 = vrot.slane %v13417_v10, 2  ;;  %v13698_v27 = vsel %vm260_vm1, %v298_v59, %v353_v31 }
  0x47   : > { %10999 = vmatmul.mubr.msk.f32.gmra.mrb[18].mxu1 %vm514_vm3, %v13585_v36  ;;  %11225 = vmatmul.mubr.msk.f32.gmra.mrb[2].mxu0 %vm514_vm3, %v13588_v22  ;;  %v493_v36 = vrot.slane %v13626_v39, 1  ;;  %v301_v22 = vrot.slane %v223_v41, 7  ;;  %v498_v4 = vrot.slane %v13674_v0, 1  ;;  %v500_v31 = vrot.slane %v13698_v27, 1 }
  0x48   : > { %11001 = vmatprep.mubr.msk.f32.mxu1 %vm514_vm3, %v13616_v8  ;;  %11227 = vmatprep.mubr.msk.f32.mxu0 %vm514_vm3, %v13619_v61  ;;  %v300_v8 = vrot.slane %v222_v50, 7  ;;  %v13668_v61 = vsel %vm436_vm2, %v488_v54, %v490_v12  ;;  %v497_v54 = vrot.slane %v13665_v40, 1  ;;  %v1119_v12 = vrot.slane %v13437_v23, 2 }
  0x49   : > { %16925 = vst [vmem:[#allocation32_spill] sm:$0xff] %v13668_v61  ;;  %v13693_v33 = vsel %vm436_vm2, %v492_v56, %v493_v36  ;;  %v13712_v59 = vsel %vm436_vm2, %v493_v36, %v495_v43  ;;  %v13715_v56 = vsel %vm1092_vm4, %v1114_v14, %v1116_v19  ;;  %v1123_v36 = vrot.slane %v13448_v30, 2 }
  0x4a   : > { %16927 = vst [vmem:[#allocation34_spill] sm:$0xff] %v13693_v33  ;;  %v13702_v13 = vsel %vm260_vm1, %v300_v8, %v301_v22  ;;  %16928 = vst [vmem:[#allocation35_spill] sm:$0xff] %v13712_v59  ;;  %v1124_v43 = vrot.slane %v13445_v29, 2  ;;  %v13728_v14 = vsel %vm436_vm2, %v497_v54, %v498_v4  ;;  %v13731_v19 = vsel %vm1092_vm4, %v1118_v53, %v1119_v12 }
  0x4b   : > { %11002 = vmatmul.mubr.msk.f32.gmra.mrb[20].mxu1 %vm514_vm3, %v13645_v57  ;;  %11228 = vmatmul.mubr.msk.f32.gmra.mrb[4].mxu0 %vm514_vm3, %v13634_v21  ;;  %v354_v57 = vrot.slane %v223_v41, 6  ;;  %v304_v21 = vrot.slane %v225_v3, 7  ;;  %16929 = vst [vmem:[#allocation36_spill] sm:$0xff] %v13728_v14  ;;  %v13747_v54 = vsel %vm436_vm2, %v498_v4, %v500_v31  ;;  %v1129_v4 = vrot.slane %v13471_v49, 2 }
  0x4c   : > { %11004 = vmatprep.mubr.msk.f32.mxu1 %vm514_vm3, %v13662_v37  ;;  %11230 = vmatprep.mubr.msk.f32.mxu0 %vm514_vm3, %v13648_v15  ;;  %v13705_v37 = vsel %vm260_vm1, %v222_v50, %v300_v8  ;;  %v303_v15 = vrot.slane %v224_v46, 7  ;;  %v1121_v50 = vrot.slane %v13441_v26, 2  ;;  %v503_v8 = vrot.slane %v13702_v13, 1  ;;  %16930 = vst [vmem:[#allocation37_spill] sm:$0xff] %v13747_v54 }
  0x4d   : > { %v502_v41 = vrot.slane %v13705_v37, 1  ;;  %v13734_v26 = vsel %vm260_vm1, %v301_v22, %v354_v57  ;;  %v1126_v22 = vrot.slane %v13468_v44, 2 }
  0x4e   : > { %v13750_v53 = vsel %vm1092_vm4, %v1119_v12, %v1121_v50 }
  0x4f   : > { %11005 = vmatmul.mubr.msk.f32.gmra.mrb[22].mxu1 %vm514_vm3, %v13668_v61  ;;  %11231 = vmatmul.mubr.msk.f32.gmra.mrb[6].mxu0 %vm514_vm3, %v13671_v5  ;;  %v13737_v61 = vsel %vm260_vm1, %v303_v15, %v304_v21  ;;  %v13758_v57 = vsel %vm436_vm2, %v502_v41, %v503_v8  ;;  %v13783_v41 = vsel %vm1092_vm4, %v1124_v43, %v1126_v22 }
  0x50   : > { %11007 = vmatprep.mubr.msk.f32.mxu1 %vm514_vm3, %v13693_v33  ;;  %11233 = vmatprep.mubr.msk.f32.mxu0 %vm514_vm3, %v13681_v7  ;;  %v355_v33 = vrot.slane %v225_v3, 6  ;;  %v13740_v7 = vsel %vm260_vm1, %v224_v46, %v303_v15  ;;  %16931 = vst [vmem:[#allocation38_spill] sm:$0xff] %v13758_v57  ;;  %v13761_v15 = vsel %vm1092_vm4, %v1123_v36, %v1124_v43  ;;  %v505_v46 = vrot.slane %v13734_v26, 1 }
  0x51   : > { %v1128_v3 = vrot.slane %v13474_v51, 2  ;;  %v507_v12 = vrot.slane %v13740_v7, 1  ;;  %v508_v44 = vrot.slane %v13737_v61, 1  ;;  %v1136_v43 = vrot.slane %v13532_v38, 2 }
  0x52   : > { %v13769_v31 = vsel %vm260_vm1, %v304_v21, %v355_v33  ;;  %v13780_v50 = vsel %vm436_vm2, %v503_v8, %v505_v46  ;;  %v1131_v33 = vrot.slane %v13496_v63, 2  ;;  %v1138_v46 = vrot.slane %v13551_v1, 2 }
  0x53   : > { %11008 = vmatmul.mubr.msk.f32.gmra.mrb[24].mxu1 %vm514_vm3, %v13712_v59  ;;  %11234 = vmatmul.mubr.msk.f32.gmra.mrb[8].mxu0 %vm514_vm3, %v13715_v56  ;;  %16932 = vst [vmem:[#allocation39_spill] sm:$0xff] %v13780_v50  ;;  %v510_v21 = vrot.slane %v13769_v31, 1  ;;  %v13788_v36 = vsel %vm436_vm2, %v507_v12, %v508_v44 }
  0x54   : > { %11010 = vmatprep.mubr.msk.f32.mxu1 %vm514_vm3, %v13728_v14  ;;  %11236 = vmatprep.mubr.msk.f32.mxu0 %vm514_vm3, %v13731_v19  ;;  %16933 = vst [vmem:[#allocation40_spill] sm:$0xff] %v13788_v36  ;;  %v1134_v14 = vrot.slane %v13521_v28, 2  ;;  %v13807_v8 = vsel %vm1092_vm4, %v1129_v4, %v1131_v33 }
  0x55   : > { %v13804_v63 = vsel %vm436_vm2, %v508_v44, %v510_v21  ;;  %v1143_v44 = vrot.slane %v13582_v42, 2  ;;  %v1146_v21 = vrot.slane %v13608_v58, 2  ;;  %v1151_v58 = vrot.slane %v13659_v9, 2 }
  0x56   : > { %16934 = vst [vmem:[#allocation41_spill] sm:$0xff] %v13804_v63  ;;  %v13824_v38 = vsel %vm1092_vm4, %v1134_v14, %v1136_v43  ;;  %v1148_v43 = vrot.slane %v13629_v11, 2 }
  0x57   : > { %11011 = vmatmul.mubr.msk.f32.gmra.mrb[26].mxu1 %vm514_vm3, %v13747_v54  ;;  %11237 = vmatmul.mubr.msk.f32.gmra.mrb[10].mxu0 %vm514_vm3, %v13750_v53  ;;  %v13791_v54 = vsel %vm1092_vm4, %v1128_v3, %v1129_v4  ;;  %v1139_v3 = vrot.slane %v13548_v60, 2  ;;  %v1144_v4 = vrot.slane %v13592_v24, 2 }
  0x58   : > { %11013 = vmatprep.mubr.msk.f32.mxu1 %vm514_vm3, %v13758_v57  ;;  %11239 = vmatprep.mubr.msk.f32.mxu0 %vm514_vm3, %v13761_v15  ;;  %v1133_v57 = vrot.slane %v13518_v16, 2 }
  0x59   : > { %v13828_v12 = vsel %vm1092_vm4, %v1138_v46, %v1139_v3  ;;  %v13852_v33 = vsel %vm1092_vm4, %v1143_v44, %v1144_v4  ;;  %v1149_v46 = vrot.slane %v13626_v39, 2  ;;  %v1154_v44 = vrot.slane %v13674_v0, 2 }
  0x5a   : > { %v13811_v22 = vsel %vm1092_vm4, %v1133_v57, %v1134_v14  ;;  %v1141_v57 = vrot.slane %v13576_v32, 2  ;;  %v13839_v14 = vld [vmem:[%s16648_s1 + $0xc] sm:$0xf] }
  0x5b   : > { %11014 = vmatmul.mubr.msk.f32.gmra.mrb[28].mxu1 %vm514_vm3, %v13780_v50  ;;  %11240 = vmatmul.mubr.msk.f32.gmra.mrb[12].mxu0 %vm514_vm3, %v13783_v41  ;;  %v13886_v9 = vsel %vm1092_vm4, %v1149_v46, %v1151_v58  ;;  %v1159_v50 = vrot.slane %v13702_v13, 2 }
  0x5c   : > { %11016 = vmatprep.mubr.msk.f32.mxu1 %vm514_vm3, %v13788_v36  ;;  %11242 = vmatprep.mubr.msk.f32.mxu0 %vm514_vm3, %v13791_v54  ;;  %v13846_v32 = vsel %vm1092_vm4, %v1139_v3, %v1141_v57  ;;  %v13871_v3 = vsel %vm1092_vm4, %v1148_v43, %v1149_v46  ;;  %v1153_v57 = vrot.slane %v13665_v40, 2  ;;  %v227_v36 = vld [vmem:[%s13294_s13 + $0xf8] sm:$0xff]  ;;  %16937 = vst [vmem:[#allocation44_spill] sm:$0xff] %v13886_v9  ;;  %v1158_v43 = vrot.slane %v13705_v37, 2 }
  0x5d   : > { %16936 = vst [vmem:[#allocation43_spill] sm:$0xff] %v13871_v3  ;;  %v1161_v46 = vrot.slane %v13734_v26, 2 }
  0x5e   : > { %v13907_v58 = vsel %vm1092_vm4, %v1158_v43, %v1159_v50  ;;  %v16945_v43 = vld [vmem:[#allocation22_spill] sm:$0xff] }
  0x5f   : > { %11017 = vmatmul.mubr.msk.f32.gmra.mrb[30].mxu1 %vm514_vm3, %v13804_v63  ;;  %11243 = vmatmul.mubr.msk.f32.gmra.mrb[14].mxu0 %vm514_vm3, %v13807_v8  ;;  %v226_v63 = vld [vmem:[%s13294_s13 + $0xf0] sm:$0xff]  ;;  %16938 = vst [vmem:[#allocation45_spill] sm:$0xff] %v13907_v58  ;;  %v13926_v26 = vsel %vm1092_vm4, %v1159_v50, %v1161_v46  ;;  %v16949_v46 = vld [vmem:[#allocation30_spill] sm:$0xff]  ;;  %s190_s13 = scalar_lea.vmem [#allocation2], %s9171_s12 }
  0x60   : > { %11021 = vmatprep.mubr.msk.f32.mxu1 %vm514_vm3, %v13306_v18  ;;  %11245 = vmatprep.mubr.msk.f32.mxu0 %vm514_vm3, %v13811_v22  ;;  %v306_v59 = vrot.slane %v226_v63, 7  ;;  %16939 = vst [vmem:[#allocation46_spill] sm:$0xff] %v13926_v26  ;;  %s9108_s14 = sshll.u32 %s190_s13, 4  ;;  %s16602_s14 = int_to_ptr.vmem [resolvable:$true] %s9108_s14 }
  0x61   : > { %s13129_s29 = scalar_lea.vmem %s16602_s14, 256  ;;  %p13136_p0 = scmp.lt.s32.totalorder %s16602_s14, %s13134_s19 }
  0x62   : > { %p13130_p11 = scmp.ne.s32.totalorder %s16602_s14, %s13129_s29  ;;  %p13137_p1 = scmp.lt.s32.totalorder %s13135_s5, %s13129_s29 }
  0x63   : > { %11022 = vmatmul.mubr.msk.f32.vlgmr.msra.gmra.mrb[0].mxu1 %vm514_vm3, %v13303_v17  ;;  %11246 = vmatmul.mubr.msk.f32.gmra.mrb[16].mxu0 %vm514_vm3, %v13824_v38 }
  0x64   : > { %11024 = vmatprep.mubr.msk.f32.mxu1 %vm514_vm3, %v13306_v18  ;;  %11248 = vmatprep.mubr.msk.f32.mxu0 %vm514_vm3, %v13828_v12  ;;  %v1164_v18 = vrot.slane %v13737_v61, 2  ;;  %p13131_p12 = pnand %p13130_p11, %p13257_p5  ;;  %p13138_p2 = por %p13137_p1, %p13136_p0 }
  0x65   : > { %11070 = vmatpush3.msk.msra.mxu1 %vm575_vm0, %v13358_v45  ;;  %v13867_v45 = vsel %vm1092_vm4, %v1144_v4, %v1146_v21  ;;  %v1156_v4 = vrot.slane %v13698_v27, 2  ;;  %v13890_v21 = vsel %vm1092_vm4, %v1153_v57, %v1154_v44  ;;  %v1163_v57 = vrot.slane %v13740_v7, 2 }
  0x66   : > { %11119 = vmatprep.subr.msk.mxu1 %vm575_vm0, %v13839_v14  ;;  %16935 = vst [vmem:[#allocation42_spill] sm:$0xff] %v13867_v45  ;;  %p13132_p13 = pneg %p13131_p12 }
  0x67   : > { %11025 = vmatmul.mubr.msk.f32.gmra.mrb[2].mxu1 %vm514_vm3, %v13303_v17  ;;  %11249 = vmatmul.mubr.msk.f32.gmra.mrb[18].mxu0 %vm514_vm3, %v13846_v32  ;;  %v307_v17 = vrot.slane %v227_v36, 7  ;;  %v13903_v27 = vsel %vm1092_vm4, %v1154_v44, %v1156_v4 }
  0x68   : > { %11027 = vmatprep.mubr.msk.f32.mxu1 %vm514_vm3, %v13312_v20  ;;  %11251 = vmatprep.mubr.msk.f32.mxu0 %vm514_vm3, %v13852_v33  ;;  %p13139_p3 = pnand %p13138_p2, %p13132_p13 }
  0x6b   : > { %11028 = vmatmul.mubr.msk.f32.gmra.mrb[4].mxu1 %vm514_vm3, %v13319_v25  ;;  %11252 = vmatmul.mubr.msk.f32.gmra.mrb[20].mxu0 %vm514_vm3, %v13867_v45  ;;  %v13915_v45 = vsel %vm260_vm1, %v226_v63, %v306_v59 }
  0x6c   : > { %11030 = vmatprep.mubr.msk.f32.mxu1 %vm514_vm3, %v13336_v35  ;;  %11254 = vmatprep.mubr.msk.f32.mxu0 %vm514_vm3, %v13871_v3  ;;  %v356_v3 = vrot.slane %v227_v36, 6  ;;  %v1166_v36 = vrot.slane %v13769_v31, 2  ;;  %v2029_v63 = vrot.slane %v13915_v45, 2 }
  0x6e   : > { %v13935_v4 = vsel %vm260_vm1, %v307_v17, %v356_v3  ;;  %v13946_v31 = vsel %vm1092_vm4, %v1164_v18, %v1166_v36  ;;  %v13974_v3 = vld [vmem:[%s16648_s1 + $0x20] sm:$0xf]  ;;  %v16951_v36 = vld [vmem:[#allocation8_spill] sm:$0xff] }
  0x6f   : > { %11031 = vmatmul.mubr.msk.f32.gmra.mrb[6].mxu1 %vm514_vm3, %v13333_v34  ;;  %11255 = vmatmul.mubr.msk.f32.gmra.mrb[22].mxu0 %vm514_vm3, %v13886_v9  ;;  %v13912_v9 = vsel %vm260_vm1, %v306_v59, %v307_v17  ;;  %v13930_v59 = vsel %vm1092_vm4, %v1163_v57, %v1164_v18  ;;  %16941 = vst [vmem:[#allocation48_spill] sm:$0xff] %v13946_v31  ;;  %v2032_v50 = vrot.slane %v13935_v4, 2  ;;  %v16950_v57 = vld [vmem:[#allocation33_spill] sm:$0xff] }
  0x70   : > { %11033 = vmatprep.mubr.msk.f32.mxu1 %vm514_vm3, %v13366_v48  ;;  %11257 = vmatprep.mubr.msk.f32.mxu0 %vm514_vm3, %v13890_v21  ;;  %16940 = vst [vmem:[#allocation47_spill] sm:$0xff] %v13930_v59  ;;  %v2030_v44 = vrot.slane %v13912_v9, 2 }
  0x72   : > { %v13950_v17 = vsel %vm1092_vm4, %v2029_v63, %v2030_v44  ;;  %v13961_v18 = vsel %vm1092_vm4, %v2030_v44, %v2032_v50  ;;  %v16952_v63 = vld [vmem:[#allocation9_spill] sm:$0xff]  ;;  %v16953_v44 = vld [vmem:[#allocation10_spill] sm:$0xff]  ;;  %v16954_v50 = vld [vmem:[#allocation11_spill] sm:$0xff] }
  0x73   : > { %11034 = vmatmul.mubr.msk.f32.gmra.mrb[8].mxu1 %vm514_vm3, %v13378_v55  ;;  %11258 = vmatmul.mubr.msk.f32.gmra.mrb[24].mxu0 %vm514_vm3, %v13903_v27  ;;  %16942 = vst [vmem:[#allocation49_spill] sm:$0xff] %v13950_v17  ;;  %16943 = vst [vmem:[#allocation50_spill] sm:$0xff] %v13961_v18 }
  0x74   : > { %11036 = vmatprep.mubr.msk.f32.mxu1 %vm514_vm3, %v13396_v62  ;;  %11260 = vmatprep.mubr.msk.f32.mxu0 %vm514_vm3, %v13907_v58 }
  0x77   : > { %11037 = vmatmul.mubr.msk.f32.gmra.mrb[10].mxu1 %vm514_vm3, %v13405_v2  ;;  %11261 = vmatmul.mubr.msk.f32.gmra.mrb[26].mxu0 %vm514_vm3, %v13926_v26 }
  0x78   : > { %11039 = vmatprep.mubr.msk.f32.mxu1 %vm514_vm3, %v13417_v10  ;;  %11263 = vmatprep.mubr.msk.f32.mxu0 %vm514_vm3, %v13930_v59 }
  0x7b   : > { %11040 = vmatmul.mubr.msk.f32.gmra.mrb[12].mxu1 %vm514_vm3, %v13437_v23  ;;  %11264 = vmatmul.mubr.msk.f32.gmra.mrb[28].mxu0 %vm514_vm3, %v13946_v31 }
  0x7c   : > { %11042 = vmatprep.mubr.msk.f32.mxu1 %vm514_vm3, %v13448_v30  ;;  %11266 = vmatprep.mubr.msk.f32.mxu0 %vm514_vm3, %v13950_v17  ;;  %v16970_v17 = vld [vmem:[#allocation7_spill] sm:$0xff] }
  0x7f   : > { %11043 = vmatmul.mubr.msk.f32.gmra.mrb[14].mxu1 %vm514_vm3, %v13445_v29  ;;  %11267 = vmatmul.mubr.msk.f32.gmra.mrb[30].mxu0 %vm514_vm3, %v13961_v18  ;;  %v16962_v18 = vld [vmem:[#allocation44_spill] sm:$0xff] }
  0x80   : > { %11045 = vmatprep.mubr.msk.f32.mxu1 %vm514_vm3, %v13474_v51  ;;  %11271 = vmatprep.mubr.msk.f32.mxu0 %vm514_vm3, %v13312_v20 }
  0x83   : > { %11046 = vmatmul.mubr.msk.f32.gmra.mrb[16].mxu1 %vm514_vm3, %v13471_v49  ;;  %11272 = vmatmul.mubr.msk.f32.vlgmr.msra.gmra.mrb[0].mxu0 %vm514_vm3, %v13319_v25 }
  0x84   : > { %11320 = vmatpush3.msk.msra.mxu0 %vm575_vm0, %v13598_v52  ;;  %11048 = vmatprep.mubr.msk.f32.mxu1 %vm514_vm3, %v13518_v16  ;;  %v16944_v52 = vld [vmem:[#allocation5_spill] sm:$0xff] }
  0x85   : > { %11274 = vmatprep.mubr.msk.f32.mxu0 %vm514_vm3, %v13336_v35  ;;  %11369 = vmatprep.subr.msk.mxu0 %vm575_vm0, %v13974_v3 }
  0x87   : > { %11049 = vmatmul.mubr.msk.f32.gmra.mrb[18].mxu1 %vm514_vm3, %v13521_v28  ;;  %11275 = vmatmul.mubr.msk.f32.gmra.mrb[2].mxu0 %vm514_vm3, %v13333_v34 }
  0x88   : > { %11051 = vmatprep.mubr.msk.f32.mxu1 %vm514_vm3, %v13551_v1  ;;  %11277 = vmatprep.mubr.msk.f32.mxu0 %vm514_vm3, %v13366_v48 }
  0x8b   : > { %11052 = vmatmul.mubr.msk.f32.gmra.mrb[20].mxu1 %vm514_vm3, %v13548_v60  ;;  %11278 = vmatmul.mubr.msk.f32.gmra.mrb[4].mxu0 %vm514_vm3, %v13378_v55 }
  0x8c   : > { %11054 = vmatprep.mubr.msk.f32.mxu1 %vm514_vm3, %v13582_v42  ;;  %11280 = vmatprep.mubr.msk.f32.mxu0 %vm514_vm3, %v13396_v62 }
  0x8f   : > { %11055 = vmatmul.mubr.msk.f32.gmra.mrb[22].mxu1 %vm514_vm3, %v13592_v24  ;;  %11281 = vmatmul.mubr.msk.f32.gmra.mrb[6].mxu0 %vm514_vm3, %v13405_v2 }
  0x90   : > { %11057 = vmatprep.mubr.msk.f32.mxu1 %vm514_vm3, %v13629_v11  ;;  %11283 = vmatprep.mubr.msk.f32.mxu0 %vm514_vm3, %v13417_v10 }
  0x93   : > { %11058 = vmatmul.mubr.msk.f32.gmra.mrb[24].mxu1 %vm514_vm3, %v13626_v39  ;;  %11284 = vmatmul.mubr.msk.f32.gmra.mrb[8].mxu0 %vm514_vm3, %v13437_v23 }
  0x94   : > { %11060 = vmatprep.mubr.msk.f32.mxu1 %vm514_vm3, %v13665_v40  ;;  %11286 = vmatprep.mubr.msk.f32.mxu0 %vm514_vm3, %v13448_v30 }
  0x97   : > { %11061 = vmatmul.mubr.msk.f32.gmra.mrb[26].mxu1 %vm514_vm3, %v13674_v0  ;;  %11287 = vmatmul.mubr.msk.f32.gmra.mrb[10].mxu0 %vm514_vm3, %v13445_v29 }
  0x98   : > { %11063 = vmatprep.mubr.msk.f32.mxu1 %vm514_vm3, %v13705_v37  ;;  %11289 = vmatprep.mubr.msk.f32.mxu0 %vm514_vm3, %v13474_v51 }
  0x9b   : > { %11064 = vmatmul.mubr.msk.f32.gmra.mrb[28].mxu1 %vm514_vm3, %v13702_v13  ;;  %11290 = vmatmul.mubr.msk.f32.gmra.mrb[12].mxu0 %vm514_vm3, %v13471_v49 }
  0x9c   : > { %11066 = vmatprep.mubr.msk.f32.mxu1 %vm514_vm3, %v13740_v7  ;;  %11292 = vmatprep.mubr.msk.f32.mxu0 %vm514_vm3, %v13518_v16 }
  0x9f   : > { %11067 = vmatmul.mubr.msk.f32.gmra.mrb[30].mxu1 %vm514_vm3, %v13737_v61  ;;  %11293 = vmatmul.mubr.msk.f32.gmra.mrb[14].mxu0 %vm514_vm3, %v13521_v28 }
  0xa0   : > { %11071 = vmatprep.mubr.msk.f32.mxu1 %vm514_vm3, %v13543_v47  ;;  %11295 = vmatprep.mubr.msk.f32.mxu0 %vm514_vm3, %v13551_v1 }
  0xa3   : > { %11072 = vmatmul.mubr.msk.f32.vlgmr.msra.gmra.mrb[0].mxu1 %vm514_vm3, %v13562_v6  ;;  %11296 = vmatmul.mubr.msk.f32.gmra.mrb[16].mxu0 %vm514_vm3, %v13548_v60 }
  0xa4   : > { %11074 = vmatprep.mubr.msk.f32.mxu1 %vm514_vm3, %v13543_v47  ;;  %11298 = vmatprep.mubr.msk.f32.mxu0 %vm514_vm3, %v13582_v42  ;;  %v16946_v47 = vld [vmem:[#allocation25_spill] sm:$0xff] }
  0xa5   : > { %11120 = vmatpush3.msk.msra.mxu1 %vm575_vm0, %v13839_v14  ;;  %v16947_v14 = vld [vmem:[#allocation27_spill] sm:$0xff] }
  0xa6   : > { %12319 = vmatprep.subr.msk.mxu1 %vm575_vm0, %v16944_v52  ;;  %v16955_v52 = vld [vmem:[#allocation12_spill] sm:$0xff] }
  0xa7   : > { %11075 = vmatmul.mubr.msk.f32.gmra.mrb[2].mxu1 %vm514_vm3, %v13562_v6  ;;  %11299 = vmatmul.mubr.msk.f32.gmra.mrb[18].mxu0 %vm514_vm3, %v13592_v24  ;;  %v16948_v6 = vld [vmem:[#allocation28_spill] sm:$0xff] }
  0xa8   : > { %11077 = vmatprep.mubr.msk.f32.mxu1 %vm514_vm3, %v16945_v43  ;;  %11301 = vmatprep.mubr.msk.f32.mxu0 %vm514_vm3, %v13629_v11 }
  0xab   : > { %11078 = vmatmul.mubr.msk.f32.gmra.mrb[4].mxu1 %vm514_vm3, %v16946_v47  ;;  %11302 = vmatmul.mubr.msk.f32.gmra.mrb[20].mxu0 %vm514_vm3, %v13626_v39 }
  0xac   : > { %11080 = vmatprep.mubr.msk.f32.mxu1 %vm514_vm3, %v16947_v14  ;;  %11304 = vmatprep.mubr.msk.f32.mxu0 %vm514_vm3, %v13665_v40 }
  0xaf   : > { %11081 = vmatmul.mubr.msk.f32.gmra.mrb[6].mxu1 %vm514_vm3, %v16948_v6  ;;  %11305 = vmatmul.mubr.msk.f32.gmra.mrb[22].mxu0 %vm514_vm3, %v13674_v0 }
  0xb0   : > { %11083 = vmatprep.mubr.msk.f32.mxu1 %vm514_vm3, %v16949_v46  ;;  %11307 = vmatprep.mubr.msk.f32.mxu0 %vm514_vm3, %v13705_v37 }
  0xb3   : > { %11084 = vmatmul.mubr.msk.f32.gmra.mrb[8].mxu1 %vm514_vm3, %v13671_v5  ;;  %11308 = vmatmul.mubr.msk.f32.gmra.mrb[24].mxu0 %vm514_vm3, %v13702_v13 }
  0xb4   : > { %11086 = vmatprep.mubr.msk.f32.mxu1 %vm514_vm3, %v16950_v57  ;;  %11310 = vmatprep.mubr.msk.f32.mxu0 %vm514_vm3, %v13740_v7 }
  0xb7   : > { %11087 = vmatmul.mubr.msk.f32.gmra.mrb[10].mxu1 %vm514_vm3, %v13715_v56  ;;  %11311 = vmatmul.mubr.msk.f32.gmra.mrb[26].mxu0 %vm514_vm3, %v13737_v61 }
  0xb8   : > { %11089 = vmatprep.mubr.msk.f32.mxu1 %vm514_vm3, %v13731_v19  ;;  %11313 = vmatprep.mubr.msk.f32.mxu0 %vm514_vm3, %v13915_v45 }
  0xbb   : > { %11090 = vmatmul.mubr.msk.f32.gmra.mrb[12].mxu1 %vm514_vm3, %v13750_v53  ;;  %11314 = vmatmul.mubr.msk.f32.gmra.mrb[28].mxu0 %vm514_vm3, %v13912_v9 }
  0xbc   : > { %11092 = vmatprep.mubr.msk.f32.mxu1 %vm514_vm3, %v13761_v15  ;;  %11316 = vmatprep.mubr.msk.f32.mxu0 %vm514_vm3, %v13915_v45 }
  0xbf   : > { %11093 = vmatmul.mubr.msk.f32.gmra.mrb[14].mxu1 %vm514_vm3, %v13783_v41  ;;  %11317 = vmatmul.mubr.msk.f32.gmra.mrb[30].mxu0 %vm514_vm3, %v13912_v9 }
  0xc0   : > { %11095 = vmatprep.mubr.msk.f32.mxu1 %vm514_vm3, %v13791_v54  ;;  %11321 = vmatprep.mubr.msk.f32.mxu0 %vm514_vm3, %v16951_v36  ;;  %v16957_v36 = vld [vmem:[#allocation14_spill] sm:$0xff] }
  0xc3   : > { %11096 = vmatmul.mubr.msk.f32.gmra.mrb[16].mxu1 %vm514_vm3, %v13807_v8  ;;  %11322 = vmatmul.mubr.msk.f32.vlgmr.msra.gmra.mrb[0].mxu0 %vm514_vm3, %v16952_v63  ;;  %v16958_v63 = vld [vmem:[#allocation42_spill] sm:$0xff] }
  0xc4   : > { %11370 = vmatpush3.msk.msra.mxu0 %vm575_vm0, %v13974_v3  ;;  %11098 = vmatprep.mubr.msk.f32.mxu1 %vm514_vm3, %v13811_v22  ;;  %v16956_v3 = vld [vmem:[#allocation13_spill] sm:$0xff] }
  0xc5   : > { %11324 = vmatprep.mubr.msk.f32.mxu0 %vm514_vm3, %v16953_v44  ;;  %v16959_v44 = vld [vmem:[#allocation15_spill] sm:$0xff] }
  0xc7   : > { %11099 = vmatmul.mubr.msk.f32.gmra.mrb[18].mxu1 %vm514_vm3, %v13824_v38  ;;  %11325 = vmatmul.mubr.msk.f32.gmra.mrb[2].mxu0 %vm514_vm3, %v16954_v50  ;;  %v16960_v50 = vld [vmem:[#allocation43_spill] sm:$0xff] }
  0xc8   : > { %11101 = vmatprep.mubr.msk.f32.mxu1 %vm514_vm3, %v13828_v12  ;;  %11327 = vmatprep.mubr.msk.f32.mxu0 %vm514_vm3, %v16955_v52  ;;  %v16961_v52 = vld [vmem:[#allocation16_spill] sm:$0xff] }
  0xcb   : > { %11102 = vmatmul.mubr.msk.f32.gmra.mrb[20].mxu1 %vm514_vm3, %v13846_v32  ;;  %11328 = vmatmul.mubr.msk.f32.gmra.mrb[4].mxu0 %vm514_vm3, %v16956_v3  ;;  %v16963_v3 = vld [vmem:[#allocation17_spill] sm:$0xff] }
  0xcc   : > { %11104 = vmatprep.mubr.msk.f32.mxu1 %vm514_vm3, %v13852_v33  ;;  %11330 = vmatprep.mubr.msk.f32.mxu0 %vm514_vm3, %v16957_v36  ;;  %v16964_v36 = vld [vmem:[#allocation18_spill] sm:$0xff] }
  0xcf   : > { %11105 = vmatmul.mubr.msk.f32.gmra.mrb[22].mxu1 %vm514_vm3, %v16958_v63  ;;  %11331 = vmatmul.mubr.msk.f32.gmra.mrb[6].mxu0 %vm514_vm3, %v16959_v44  ;;  %v16965_v44 = vld [vmem:[#allocation19_spill] sm:$0xff] }
  0xd0   : > { %11107 = vmatprep.mubr.msk.f32.mxu1 %vm514_vm3, %v16960_v50  ;;  %11333 = vmatprep.mubr.msk.f32.mxu0 %vm514_vm3, %v16961_v52  ;;  %v16966_v52 = vld [vmem:[#allocation20_spill] sm:$0xff] }
  0xd3   : > { %11108 = vmatmul.mubr.msk.f32.gmra.mrb[24].mxu1 %vm514_vm3, %v16962_v18  ;;  %11334 = vmatmul.mubr.msk.f32.gmra.mrb[8].mxu0 %vm514_vm3, %v16963_v3  ;;  %v16967_v3 = vld [vmem:[#allocation21_spill] sm:$0xff] }
  0xd4   : > { %11110 = vmatprep.mubr.msk.f32.mxu1 %vm514_vm3, %v13890_v21  ;;  %11336 = vmatprep.mubr.msk.f32.mxu0 %vm514_vm3, %v16964_v36  ;;  %v16968_v36 = vld [vmem:[#allocation23_spill] sm:$0xff] }
  0xd7   : > { %11111 = vmatmul.mubr.msk.f32.gmra.mrb[26].mxu1 %vm514_vm3, %v13903_v27  ;;  %11337 = vmatmul.mubr.msk.f32.gmra.mrb[10].mxu0 %vm514_vm3, %v16965_v44  ;;  %v16969_v44 = vld [vmem:[#allocation24_spill] sm:$0xff] }
  0xd8   : > { %11113 = vmatprep.mubr.msk.f32.mxu1 %vm514_vm3, %v13907_v58  ;;  %11339 = vmatprep.mubr.msk.f32.mxu0 %vm514_vm3, %v16966_v52  ;;  %v16971_v52 = vld [vmem:[#allocation26_spill] sm:$0xff]  ;;  %v1759_v58 = vrot.slane %v13912_v9, 1 }
  0xdb   : > { %11114 = vmatmul.mubr.msk.f32.gmra.mrb[28].mxu1 %vm514_vm3, %v13926_v26  ;;  %11340 = vmatmul.mubr.msk.f32.gmra.mrb[12].mxu0 %vm514_vm3, %v16967_v3  ;;  %v16972_v26 = vld [vmem:[#allocation6_spill] sm:$0xff]  ;;  %v16973_v3 = vld [vmem:[#allocation29_spill] sm:$0xff] }
  0xdc   : > { %11116 = vmatprep.mubr.msk.f32.mxu1 %vm514_vm3, %v13930_v59  ;;  %11342 = vmatprep.mubr.msk.f32.mxu0 %vm514_vm3, %v16968_v36  ;;  %v16974_v59 = vld [vmem:[#allocation31_spill] sm:$0xff] }
  0xdf   : > { %11117 = vmatmul.mubr.msk.f32.gmra.mrb[30].mxu1 %vm514_vm3, %v13946_v31  ;;  %11343 = vmatmul.mubr.msk.f32.gmra.mrb[14].mxu0 %vm514_vm3, %v16969_v44  ;;  %v13128_v31 = vld [vmem:[%s16648_s1 + $0x10] sm:$0xf] }
  0xe0   : > { %11121 = vmatprep.mubr.msk.f32.mxu1 %vm514_vm3, %v16970_v17  ;;  %11345 = vmatprep.mubr.msk.f32.mxu0 %vm514_vm3, %v16971_v52  ;;  %v16975_v17 = vld [vmem:[#allocation32_spill] sm:$0xff] }
  0xe3   : > { %11122 = vmatmul.mubr.msk.f32.vlgmr.msra.gmra.mrb[0].mxu1 %vm514_vm3, %v16972_v26  ;;  %11346 = vmatmul.mubr.msk.f32.gmra.mrb[16].mxu0 %vm514_vm3, %v16973_v3  ;;  %v16976_v26 = vld [vmem:[#allocation34_spill] sm:$0xff] }
  0xe4   : > { %11124 = vmatprep.mubr.msk.f32.mxu1 %vm514_vm3, %v13312_v20  ;;  %11348 = vmatprep.mubr.msk.f32.mxu0 %vm514_vm3, %v16974_v59  ;;  %v16977_v20 = vld [vmem:[#allocation35_spill] sm:$0xff] }
  0xe5   : > { %12320 = vmatpush3.msk.msra.mxu1 %vm575_vm0, %v13128_v31  ;;  %v16978_v31 = vld [vmem:[#allocation36_spill] sm:$0xff] }
  0xe7   : > { %11125 = vmatmul.mubr.msk.f32.gmra.mrb[2].mxu1 %vm514_vm3, %v13319_v25  ;;  %11349 = vmatmul.mubr.msk.f32.gmra.mrb[18].mxu0 %vm514_vm3, %v16975_v17  ;;  %v16979_v25 = vld [vmem:[#allocation37_spill] sm:$0xff] }
  0xe8   : > { %11127 = vmatprep.mubr.msk.f32.mxu1 %vm514_vm3, %v13336_v35  ;;  %11351 = vmatprep.mubr.msk.f32.mxu0 %vm514_vm3, %v16976_v26  ;;  %v16980_v35 = vld [vmem:[#allocation38_spill] sm:$0xff] }
  0xeb   : > { %11128 = vmatmul.mubr.msk.f32.gmra.mrb[4].mxu1 %vm514_vm3, %v13333_v34  ;;  %11352 = vmatmul.mubr.msk.f32.gmra.mrb[20].mxu0 %vm514_vm3, %v16977_v20  ;;  %v1758_v34 = vrot.slane %v13915_v45, 1 }
  0xec   : > { %11130 = vmatprep.mubr.msk.f32.mxu1 %vm514_vm3, %v13366_v48  ;;  %11354 = vmatprep.mubr.msk.f32.mxu0 %vm514_vm3, %v16978_v31  ;;  %v16981_v48 = vld [vmem:[#allocation39_spill] sm:$0xff] }
  0xef   : > { %11131 = vmatmul.mubr.msk.f32.gmra.mrb[6].mxu1 %vm514_vm3, %v13378_v55  ;;  %11355 = vmatmul.mubr.msk.f32.gmra.mrb[22].mxu0 %vm514_vm3, %v16979_v25  ;;  %v16982_v55 = vld [vmem:[#allocation40_spill] sm:$0xff]  ;;  %v16983_v25 = vld [vmem:[#allocation41_spill] sm:$0xff] }
  0xf0   : > { %11133 = vmatprep.mubr.msk.f32.mxu1 %vm514_vm3, %v13396_v62  ;;  %11357 = vmatprep.mubr.msk.f32.mxu0 %vm514_vm3, %v16980_v35  ;;  %v1761_v62 = vrot.slane %v13935_v4, 1  ;;  %v14226_v35 = vsel %vm436_vm2, %v1758_v34, %v1759_v58 }
  0xf3   : > { %11134 = vmatmul.mubr.msk.f32.gmra.mrb[8].mxu1 %vm514_vm3, %v13405_v2  ;;  %11358 = vmatmul.mubr.msk.f32.gmra.mrb[24].mxu0 %vm514_vm3, %v16981_v48  ;;  %v14237_v2 = vsel %vm436_vm2, %v1759_v58, %v1761_v62 }
  0xf4   : > { %11136 = vmatprep.mubr.msk.f32.mxu1 %vm514_vm3, %v13417_v10  ;;  %11360 = vmatprep.mubr.msk.f32.mxu0 %vm514_vm3, %v16982_v55  ;;  %v16986_v10 = vld [vmem:[#allocation46_spill] sm:$0xff] }
  0xf7   : > { %11137 = vmatmul.mubr.msk.f32.gmra.mrb[10].mxu1 %vm514_vm3, %v13437_v23  ;;  %11361 = vmatmul.mubr.msk.f32.gmra.mrb[26].mxu0 %vm514_vm3, %v16983_v25  ;;  %v16987_v23 = vld [vmem:[#allocation38_spill] sm:$0xff] }
  0xf8   : > { %11139 = vmatprep.mubr.msk.f32.mxu1 %vm514_vm3, %v13448_v30  ;;  %11363 = vmatprep.mubr.msk.f32.mxu0 %vm514_vm3, %v14226_v35  ;;  %v16989_v30 = vld [vmem:[#allocation48_spill] sm:$0xff] }
  0xfb   : > { %11140 = vmatmul.mubr.msk.f32.gmra.mrb[12].mxu1 %vm514_vm3, %v13445_v29  ;;  %11364 = vmatmul.mubr.msk.f32.gmra.mrb[28].mxu0 %vm514_vm3, %v14237_v2  ;;  %v16988_v29 = vld [vmem:[#allocation47_spill] sm:$0xff] }
  0xfc   : > { %11142 = vmatprep.mubr.msk.f32.mxu1 %vm514_vm3, %v13474_v51  ;;  %11366 = vmatprep.mubr.msk.f32.mxu0 %vm514_vm3, %v14226_v35  ;;  %v16991_v51 = vld [vmem:[#allocation50_spill] sm:$0xff] }
  0xff   : > { %11143 = vmatmul.mubr.msk.f32.gmra.mrb[14].mxu1 %vm514_vm3, %v13471_v49  ;;  %11367 = vmatmul.mubr.msk.f32.gmra.mrb[30].mxu0 %vm514_vm3, %v14237_v2  ;;  %v16990_v49 = vld [vmem:[#allocation49_spill] sm:$0xff] }
 0x100   : > { %11145 = vmatprep.mubr.msk.f32.mxu1 %vm514_vm3, %v13518_v16  ;;  %11371 = vmatprep.mubr.msk.f32.mxu0 %vm514_vm3, %v16945_v43  ;;  %v9479_v16 = vld [vmem:[%s16649_s2 + $0x8] sm:$0xff] }
 0x101   : > { %11419 = vmatprep.subr.mxu1 %v9479_v16 }
 0x103   : > { %11146 = vmatmul.mubr.msk.f32.gmra.mrb[16].mxu1 %vm514_vm3, %v13521_v28  ;;  %11372 = vmatmul.mubr.msk.f32.vlgmr.msra.gmra.mrb[0].mxu0 %vm514_vm3, %v16946_v47  ;;  %v14385_v28 = vld [vmem:[%s16649_s2] sm:$0xff] }
 0x104   : > { %11148 = vmatprep.mubr.msk.f32.mxu1 %vm514_vm3, %v13551_v1  ;;  %11374 = vmatprep.mubr.msk.f32.mxu0 %vm514_vm3, %v16947_v14 }
 0x107   : > { %11149 = vmatmul.mubr.msk.f32.gmra.mrb[18].mxu1 %vm514_vm3, %v13548_v60  ;;  %11375 = vmatmul.mubr.msk.f32.gmra.mrb[2].mxu0 %vm514_vm3, %v16948_v6 }
 0x108   : > { %11151 = vmatprep.mubr.msk.f32.mxu1 %vm514_vm3, %v13582_v42  ;;  %11377 = vmatprep.mubr.msk.f32.mxu0 %vm514_vm3, %v16949_v46 }
 0x10b   : > { %11152 = vmatmul.mubr.msk.f32.gmra.mrb[20].mxu1 %vm514_vm3, %v13592_v24  ;;  %11378 = vmatmul.mubr.msk.f32.gmra.mrb[4].mxu0 %vm514_vm3, %v13671_v5 }
 0x10c   : > { %11154 = vmatprep.mubr.msk.f32.mxu1 %vm514_vm3, %v13629_v11  ;;  %11380 = vmatprep.mubr.msk.f32.mxu0 %vm514_vm3, %v16950_v57 }
 0x10f   : > { %11155 = vmatmul.mubr.msk.f32.gmra.mrb[22].mxu1 %vm514_vm3, %v13626_v39  ;;  %11381 = vmatmul.mubr.msk.f32.gmra.mrb[6].mxu0 %vm514_vm3, %v13715_v56 }
 0x110   : > { %11157 = vmatprep.mubr.msk.f32.mxu1 %vm514_vm3, %v13665_v40  ;;  %11383 = vmatprep.mubr.msk.f32.mxu0 %vm514_vm3, %v13731_v19  ;;  %v16985_v40 = vld [vmem:[#allocation37_spill] sm:$0xff] }
 0x113   : > { %11158 = vmatmul.mubr.msk.f32.gmra.mrb[24].mxu1 %vm514_vm3, %v13674_v0  ;;  %11384 = vmatmul.mubr.msk.f32.gmra.mrb[8].mxu0 %vm514_vm3, %v13750_v53  ;;  %v16984_v0 = vld [vmem:[#allocation45_spill] sm:$0xff] }
 0x114   : > { %11160 = vmatprep.mubr.msk.f32.mxu1 %vm514_vm3, %v13705_v37  ;;  %11386 = vmatprep.mubr.msk.f32.mxu0 %vm514_vm3, %v13761_v15 }
 0x117   : > { %11161 = vmatmul.mubr.msk.f32.gmra.mrb[26].mxu1 %vm514_vm3, %v13702_v13  ;;  %11387 = vmatmul.mubr.msk.f32.gmra.mrb[10].mxu0 %vm514_vm3, %v13783_v41 }
 0x118   : > { %11163 = vmatprep.mubr.msk.f32.mxu1 %vm514_vm3, %v13740_v7  ;;  %11389 = vmatprep.mubr.msk.f32.mxu0 %vm514_vm3, %v13791_v54 }
 0x11b   : > { %11164 = vmatmul.mubr.msk.f32.gmra.mrb[28].mxu1 %vm514_vm3, %v13737_v61  ;;  %11390 = vmatmul.mubr.msk.f32.gmra.mrb[12].mxu0 %vm514_vm3, %v13807_v8 }
 0x11c   : > { %11166 = vmatprep.mubr.msk.f32.mxu1 %vm514_vm3, %v13915_v45  ;;  %11392 = vmatprep.mubr.msk.f32.mxu0 %vm514_vm3, %v13811_v22 }
 0x11f   : > { %11167 = vmatmul.mubr.msk.f32.gmra.mrb[30].mxu1 %vm514_vm3, %v13912_v9  ;;  %11393 = vmatmul.mubr.msk.f32.gmra.mrb[14].mxu0 %vm514_vm3, %v13824_v38 }
 0x120   : > { %11195 = vmatprep.mubr.msk.f32.mxu1 %vm514_vm3, %v16968_v36  ;;  %11395 = vmatprep.mubr.msk.f32.mxu0 %vm514_vm3, %v13828_v12 }
 0x123   : > { %11196 = vmatmul.mubr.msk.f32.vlgmr.msra.gmra.mrb[16].mxu1 %vm514_vm3, %v16969_v44  ;;  %11396 = vmatmul.mubr.msk.f32.gmra.mrb[16].mxu0 %vm514_vm3, %v13846_v32 }
 0x124   : > { %11198 = vmatprep.mubr.msk.f32.mxu1 %vm514_vm3, %v16971_v52  ;;  %11398 = vmatprep.mubr.msk.f32.mxu0 %vm514_vm3, %v13852_v33 }
 0x125   : > { %11420 = vmatpush3.msra.mxu1 %v9479_v16 }
 0x126   : > { %11469 = vmatprep.subr.mxu1 %v14385_v28 }
 0x127   : > { %11199 = vmatmul.mubr.msk.f32.gmra.mrb[18].mxu1 %vm514_vm3, %v16973_v3  ;;  %11399 = vmatmul.mubr.msk.f32.gmra.mrb[18].mxu0 %vm514_vm3, %v16958_v63 }
 0x128   : > { %11201 = vmatprep.mubr.msk.f32.mxu1 %vm514_vm3, %v16974_v59  ;;  %11401 = vmatprep.mubr.msk.f32.mxu0 %vm514_vm3, %v16960_v50 }
 0x12b   : > { %11202 = vmatmul.mubr.msk.f32.gmra.mrb[20].mxu1 %vm514_vm3, %v16975_v17  ;;  %11402 = vmatmul.mubr.msk.f32.gmra.mrb[20].mxu0 %vm514_vm3, %v16962_v18 }
 0x12c   : > { %11204 = vmatprep.mubr.msk.f32.mxu1 %vm514_vm3, %v16976_v26  ;;  %11404 = vmatprep.mubr.msk.f32.mxu0 %vm514_vm3, %v13890_v21 }
 0x12f   : > { %11205 = vmatmul.mubr.msk.f32.gmra.mrb[22].mxu1 %vm514_vm3, %v16977_v20  ;;  %11405 = vmatmul.mubr.msk.f32.gmra.mrb[22].mxu0 %vm514_vm3, %v13903_v27 }
 0x130   : > { %11207 = vmatprep.mubr.msk.f32.mxu1 %vm514_vm3, %v16978_v31  ;;  %11407 = vmatprep.mubr.msk.f32.mxu0 %vm514_vm3, %v16984_v0 }
 0x133   : > { %11208 = vmatmul.mubr.msk.f32.gmra.mrb[24].mxu1 %vm514_vm3, %v16985_v40  ;;  %11408 = vmatmul.mubr.msk.f32.gmra.mrb[24].mxu0 %vm514_vm3, %v16986_v10 }
 0x134   : > { %11210 = vmatprep.mubr.msk.f32.mxu1 %vm514_vm3, %v16987_v23  ;;  %11410 = vmatprep.mubr.msk.f32.mxu0 %vm514_vm3, %v16988_v29 }
 0x137   : > { %11211 = vmatmul.mubr.msk.f32.gmra.mrb[26].mxu1 %vm514_vm3, %v16981_v48  ;;  %11411 = vmatmul.mubr.msk.f32.gmra.mrb[26].mxu0 %vm514_vm3, %v16989_v30 }
 0x138   : > { %11213 = vmatprep.mubr.msk.f32.mxu1 %vm514_vm3, %v16982_v55  ;;  %11413 = vmatprep.mubr.msk.f32.mxu0 %vm514_vm3, %v16990_v49 }
 0x13b   : > { %11214 = vmatmul.mubr.msk.f32.gmra.mrb[28].mxu1 %vm514_vm3, %v16983_v25  ;;  %11414 = vmatmul.mubr.msk.f32.gmra.mrb[28].mxu0 %vm514_vm3, %v16991_v51 }
 0x13c   : > { %11216 = vmatprep.mubr.msk.f32.mxu1 %vm514_vm3, %v14226_v35  ;;  %11416 = vmatprep.mubr.msk.f32.mxu0 %vm514_vm3, %v16990_v49 }
 0x13f   : > { %11217 = vmatmul.mubr.msk.f32.gmra.mrb[30].mxu1 %vm514_vm3, %v14237_v2  ;;  %11417 = vmatmul.mubr.msk.f32.gmra.mrb[30].mxu0 %vm514_vm3, %v16991_v51 }
 0x1b6   : > { %v11123_v60 = vpop.f32.mrb[0].mxu1 }
 0x1b7   : > { %v1566_v1 = vpop.f32.mrb[1].mxu1 }
 0x1ba   : > { %v11126_v5 = vpop.f32.mrb[2].mxu1 }
 0x1bb   : > { %v1576_v42 = vpop.f32.mrb[3].mxu1 }
 0x1be   : > { %v11129_v24 = vpop.f32.mrb[4].mxu1 }
 0x1bf   : > { %v1586_v61 = vpop.f32.mrb[5].mxu1 }
 0x1c2   : > { %v11132_v39 = vpop.f32.mrb[6].mxu1 }
 0x1c3   : > { %v1596_v11 = vpop.f32.mrb[7].mxu1 }
 0x1c6   : > { %v14388_v37 = vpop.f32.mrb[8].mxu1 }
 0x1c7   : > { %v14390_v7 = vpop.f32.mrb[9].mxu1 }
 0x1ca   : > { %v14392_v13 = vpop.f32.mrb[10].mxu1 }
 0x1cb   : > { %v14394_v56 = vpop.f32.mrb[11].mxu1 }
 0x1ce   : > { %v14396_v19 = vpop.f32.mrb[12].mxu1 }
 0x1cf   : > { %v14398_v54 = vpop.f32.mrb[13].mxu1 }
 0x1d2   : > { %v14400_v53 = vpop.f32.mrb[14].mxu1 }
 0x1d3   : > { %v14402_v15 = vpop.f32.mrb[15].mxu1 }
 0x1d6   : > { %v11373_v41 = vpop.f32.mrb[0].mxu0 }
 0x1d7   : > { %v12321_v8 = vadd.f32 %v11373_v41, %v11123_v60  ;;  %v2895_v22 = vpop.f32.mrb[1].mxu0 }
 0x1d8   : > { %v12322_v38 = vadd.f32 %v2895_v22, %v1566_v1 }
 0x1d9   : > { %vm3087_vm5 = vcmp.ge.f32.partialorder %v12321_v8, 0.0  ;;  %v3119_v12 = vmul.f32 0.01, %v12321_v8 }
 0x1da   : > { %vm3086_vm6 = vcmp.ge.f32.partialorder %v12322_v38, 0.0  ;;  %v3118_v32 = vmul.f32 0.01, %v12322_v38  ;;  %v11376_v33 = vpop.f32.mrb[2].mxu0 }
 0x1db   : > { %v3151_v45 = vsel %vm3087_vm5, %v12321_v8, %v3119_v12  ;;  %v12323_v9 = vadd.f32 %v11376_v33, %v11126_v5  ;;  %v2905_v21 = vpop.f32.mrb[3].mxu0 }
 0x1dc   : > { %v3215_v27 = vrot.slane %v3151_v45, 7  ;;  %v3294_v58 = vrot.slane %v3151_v45, 6  ;;  %v3150_v59 = vsel %vm3086_vm6, %v12322_v38, %v3118_v32  ;;  %v12324_v4 = vadd.f32 %v2905_v21, %v1576_v42 }
 0x1dd   : > { %v3214_v18 = vrot.slane %v3150_v59, 7  ;;  %vm3089_vm7 = vcmp.ge.f32.partialorder %v12323_v9, 0.0  ;;  %v3121_v43 = vmul.f32 0.01, %v12323_v9 }
 0x1de   : > { %v14405_v47 = vsel %vm260_vm1, %v3215_v27, %v3294_v58  ;;  %vm3088_vm8 = vcmp.ge.f32.partialorder %v12324_v4, 0.0  ;;  %v3120_v14 = vmul.f32 0.01, %v12324_v4  ;;  %v11379_v6 = vpop.f32.mrb[4].mxu0 }
 0x1df   : > { %v3392_v46 = vrot.slane %v14405_v47, 1  ;;  %v14409_v57 = vsel %vm260_vm1, %v3214_v18, %v3215_v27  ;;  %v14412_v63 = vsel %vm260_vm1, %v3150_v59, %v3214_v18  ;;  %v2915_v50 = vpop.f32.mrb[5].mxu0  ;;  %v3153_v36 = vsel %vm3089_vm7, %v12323_v9, %v3121_v43 }
 0x1e0   : > { %v3152_v44 = vsel %vm3088_vm8, %v12324_v4, %v3120_v14  ;;  %v12325_v52 = vadd.f32 %v11379_v6, %v11129_v24  ;;  %v12326_v3 = vadd.f32 %v2915_v50, %v1586_v61  ;;  %v3218_v17 = vrot.slane %v3153_v36, 7 }
 0x1e1   : > { %v3295_v26 = vrot.slane %v3153_v36, 6  ;;  %v3217_v20 = vrot.slane %v3152_v44, 7  ;;  %v3389_v31 = vrot.slane %v14412_v63, 1  ;;  %v3390_v55 = vrot.slane %v14409_v57, 1 }
 0x1e2   : > { %vm3091_vm9 = vcmp.ge.f32.partialorder %v12325_v52, 0.0  ;;  %v3123_v25 = vmul.f32 0.01, %v12325_v52  ;;  %vm3090_vm10 = vcmp.ge.f32.partialorder %v12326_v3, 0.0  ;;  %v3122_v35 = vmul.f32 0.01, %v12326_v3 }
 0x1e3   : > { %v14416_v34 = vsel %vm260_vm1, %v3217_v20, %v3218_v17  ;;  %v11382_v48 = vpop.f32.mrb[6].mxu0  ;;  %v14420_v62 = vsel %vm260_vm1, %v3152_v44, %v3217_v20  ;;  %v14423_v49 = vsel %vm260_vm1, %v3218_v17, %v3295_v26  ;;  %v14426_v16 = vsel %vm436_vm2, %v3389_v31, %v3390_v55 }
 0x1e4   : > { %v3155_v2 = vsel %vm3091_vm9, %v12325_v52, %v3123_v25  ;;  %v3154_v0 = vsel %vm3090_vm10, %v12326_v3, %v3122_v35  ;;  %v12327_v40 = vadd.f32 %v11382_v48, %v11132_v39  ;;  %v2925_v10 = vpop.f32.mrb[7].mxu0  ;;  %16992 = vst [vmem:[#allocation5_spill] sm:$0xff] %v14426_v16  ;;  %v14429_v60 = vsel %vm436_vm2, %v3390_v55, %v3392_v46  ;;  %v14440_v39 = vld [vmem:[%s16649_s2 + $0x10] sm:$0xff] }
 0x1e5   : > { %v3221_v23 = vrot.slane %v3155_v2, 7  ;;  %v3220_v29 = vrot.slane %v3154_v0, 7  ;;  %v12328_v30 = vadd.f32 %v2925_v10, %v1596_v11  ;;  %16993 = vst [vmem:[#allocation22_spill] sm:$0xff] %v14429_v60  ;;  %11421 = vmatprep.mubr.msk.f32.mxu1 %vm3466_vm11, %v14426_v16  ;;  %v3394_v61 = vrot.slane %v14420_v62, 1 }
 0x1e6   : > { %vm3093_vm12 = vcmp.ge.f32.partialorder %v12327_v40, 0.0  ;;  %v3125_v51 = vmul.f32 0.01, %v12327_v40  ;;  %v11385_v1 = vpop.f32.mrb[8].mxu0  ;;  %11422 = vmatmul.mubr.msk.f32.vlgmr.msra.gmra.mrb[32].mxu1 %vm3466_vm11, %v14429_v60  ;;  %v3395_v22 = vrot.slane %v14416_v34, 1  ;;  %v3296_v38 = vrot.slane %v3155_v2, 6 }
 0x1e7   : > { %v14432_v5 = vsel %vm260_vm1, %v3220_v29, %v3221_v23  ;;  %vm3092_vm13 = vcmp.ge.f32.partialorder %v12328_v30, 0.0  ;;  %v3124_v42 = vmul.f32 0.01, %v12328_v30  ;;  %v2935_v24 = vpop.f32.mrb[9].mxu0  ;;  %v12329_v41 = vadd.f32 %v11385_v1, %v14388_v37  ;;  %11470 = vmatpush3.msra.mxu1 %v14385_v28  ;;  %11424 = vmatprep.mubr.msk.f32.mxu1 %vm3466_vm11, %v14426_v16 }
 0x1e8   : > { %v3157_v11 = vsel %vm3093_vm12, %v12327_v40, %v3125_v51  ;;  %v12330_v8 = vadd.f32 %v2935_v24, %v14390_v7  ;;  %v14448_v12 = vsel %vm260_vm1, %v3154_v0, %v3220_v29  ;;  %11519 = vmatprep.subr.mxu1 %v14440_v39  ;;  %v3397_v59 = vrot.slane %v14423_v49, 1 }
 0x1e9   : > { %v3224_v32 = vrot.slane %v3157_v11, 7  ;;  %v3156_v33 = vsel %vm3092_vm13, %v12328_v30, %v3124_v42  ;;  %vm3095_vm14 = vcmp.ge.f32.partialorder %v12329_v41, 0.0  ;;  %v3127_v9 = vmul.f32 0.01, %v12329_v41 }
 0x1ea   : > { %v3223_v45 = vrot.slane %v3156_v33, 7  ;;  %vm3094_vm15 = vcmp.ge.f32.partialorder %v12330_v8, 0.0  ;;  %v11388_v37 = vpop.f32.mrb[10].mxu0  ;;  %v3297_v7 = vrot.slane %v3157_v11, 6  ;;  %v3126_v21 = vmul.f32 0.01, %v12330_v8  ;;  %11425 = vmatmul.mubr.msk.f32.gmra.mrb[34].mxu1 %vm3466_vm11, %v14429_v60 }
 0x1eb   : > { %v12331_v27 = vadd.f32 %v11388_v37, %v14392_v13  ;;  %v2945_v58 = vpop.f32.mrb[11].mxu0  ;;  %v14459_v28 = vsel %vm3095_vm14, %v12329_v41, %v3127_v9  ;;  %v14464_v18 = vsel %vm436_vm2, %v3394_v61, %v3395_v22  ;;  %v14474_v44 = vsel %vm436_vm2, %v3395_v22, %v3397_v59 }
 0x1ec   : > { %v14457_v4 = vsel %vm260_vm1, %v3223_v45, %v3224_v32  ;;  %16994 = vst [vmem:[#allocation25_spill] sm:$0xff] %v14464_v18  ;;  %v12332_v43 = vadd.f32 %v2945_v58, %v14394_v56  ;;  %v14468_v14 = vsel %vm260_vm1, %v3156_v33, %v3223_v45  ;;  %v3227_v13 = vrot.slane %v14459_v28, 7  ;;  %11427 = vmatprep.mubr.msk.f32.mxu1 %vm3466_vm11, %v14464_v18 }
 0x1ed   : > { %v3158_v6 = vsel %vm3094_vm15, %v12330_v8, %v3126_v21  ;;  %vm3097_vm0 = vcmp.ge.f32.partialorder %v12331_v27, 0.0  ;;  %v3129_v50 = vmul.f32 0.01, %v12331_v27  ;;  %16995 = vst [vmem:[#allocation27_spill] sm:$0xff] %v14474_v44  ;;  %v3399_v52 = vrot.slane %v14448_v12, 1 }
 0x1ee   : > { %v3226_v46 = vrot.slane %v3158_v6, 7  ;;  %vm3096_vm3 = vcmp.ge.f32.partialorder %v12332_v43, 0.0  ;;  %v3128_v36 = vmul.f32 0.01, %v12332_v43  ;;  %v3400_v56 = vrot.slane %v14432_v5, 1  ;;  %v11391_v3 = vpop.f32.mrb[12].mxu0  ;;  %11428 = vmatmul.mubr.msk.f32.gmra.mrb[36].mxu1 %vm3466_vm11, %v14474_v44 }
 0x1ef   : > { %v14479_v17 = vsel %vm260_vm1, %v3221_v23, %v3296_v38  ;;  %v14486_v20 = vsel %vm3097_vm0, %v12331_v27, %v3129_v50  ;;  %v2955_v25 = vpop.f32.mrb[13].mxu0  ;;  %v3404_v2 = vrot.slane %v14468_v14, 1  ;;  %v12333_v0 = vadd.f32 %v11391_v3, %v14396_v19 }
 0x1f0   : > { %v14484_v26 = vsel %vm260_vm1, %v3226_v46, %v3227_v13  ;;  %v3160_v31 = vsel %vm3096_vm3, %v12332_v43, %v3128_v36  ;;  %v3230_v35 = vrot.slane %v14486_v20, 7  ;;  %v14492_v55 = vsel %vm436_vm2, %v3399_v52, %v3400_v56 }
 0x1f1   : > { %v3229_v48 = vrot.slane %v3160_v31, 7  ;;  %16996 = vst [vmem:[#allocation28_spill] sm:$0xff] %v14492_v55  ;;  %11430 = vmatprep.mubr.msk.f32.mxu1 %vm3466_vm11, %v14492_v55  ;;  %v12334_v40 = vadd.f32 %v2955_v25, %v14398_v54  ;;  %v3402_v10 = vrot.slane %v14479_v17, 1  ;;  %v3405_v23 = vrot.slane %v14457_v4, 1 }
 0x1f2   : > { %v11394_v29 = vpop.f32.mrb[14].mxu0  ;;  %v14502_v30 = vsel %vm260_vm1, %v3158_v6, %v3226_v46  ;;  %v14511_v19 = vsel %vm260_vm1, %v3224_v32, %v3297_v7  ;;  %vm3099_vm5 = vcmp.ge.f32.partialorder %v12333_v0, 0.0  ;;  %v3131_v54 = vmul.f32 0.01, %v12333_v0 }
 0x1f3   : > { %v14507_v51 = vsel %vm260_vm1, %v3229_v48, %v3230_v35  ;;  %v12335_v1 = vadd.f32 %v11394_v29, %v14400_v53  ;;  %v2965_v42 = vpop.f32.mrb[15].mxu0  ;;  %16997 = vst [vmem:[#allocation30_spill] sm:$0xff] %v14511_v19  ;;  %vm3098_vm6 = vcmp.ge.f32.partialorder %v12334_v40, 0.0  ;;  %v3130_v24 = vmul.f32 0.01, %v12334_v40 }
 0x1f4   : > { %v14514_v61 = vsel %vm436_vm2, %v3400_v56, %v3402_v10  ;;  %v14517_v11 = vsel %vm436_vm2, %v3404_v2, %v3405_v23  ;;  %v14519_v8 = vsel %vm3099_vm5, %v12333_v0, %v3131_v54  ;;  %v12336_v53 = vadd.f32 %v2965_v42, %v14402_v15 }
 0x1f5   : > { %16998 = vst [vmem:[#allocation33_spill] sm:$0xff] %v14514_v61  ;;  %16999 = vst [vmem:[#allocation8_spill] sm:$0xff] %v14517_v11  ;;  %vm3101_vm7 = vcmp.ge.f32.partialorder %v12335_v1, 0.0  ;;  %v3133_v41 = vmul.f32 0.01, %v12335_v1  ;;  %v3162_v22 = vsel %vm3098_vm6, %v12334_v40, %v3130_v24  ;;  %11431 = vmatmul.mubr.msk.f32.gmra.mrb[38].mxu1 %vm3466_vm11, %v14514_v61  ;;  %v3407_v38 = vrot.slane %v14511_v19, 1 }
 0x1f6   : > { %v11197_v32 = vpop.f32.mrb[16].mxu1  ;;  %v11397_v33 = vpop.f32.mrb[16].mxu0  ;;  %v3298_v45 = vrot.slane %v14459_v28, 6  ;;  %v16724_v9 = vrot.slane %v14519_v8, 7  ;;  %v3232_v37 = vrot.slane %v3162_v22, 7  ;;  %11433 = vmatprep.mubr.msk.f32.mxu1 %vm3466_vm11, %v14517_v11  ;;  %v3299_v58 = vrot.slane %v14486_v20, 6 }
 0x1f7   : > { %v14529_v7 = vsel %vm3101_vm7, %v12335_v1, %v3133_v41  ;;  %v1918_v21 = vpop.f32.mrb[17].mxu1  ;;  %v2975_v27 = vpop.f32.mrb[17].mxu0  ;;  %v14533_v15 = vsel %vm260_vm1, %v3160_v31, %v3229_v48  ;;  %vm3100_vm8 = vcmp.ge.f32.partialorder %v12336_v53, 0.0  ;;  %v3132_v59 = vmul.f32 0.01, %v12336_v53 }
 0x1f8   : > { %v14538_v43 = vsel %vm260_vm1, %v3232_v37, %v16724_v9  ;;  %v16723_v6 = vrot.slane %v14529_v7, 7  ;;  %v14542_v46 = vsel %vm436_vm2, %v3405_v23, %v3407_v38  ;;  %v3409_v50 = vrot.slane %v14502_v30, 1 }
 0x1f9   : > { %17000 = vst [vmem:[#allocation9_spill] sm:$0xff] %v14542_v46  ;;  %v3164_v36 = vsel %vm3100_vm8, %v12336_v53, %v3132_v59  ;;  %11434 = vmatmul.mubr.msk.f32.gmra.mrb[40].mxu1 %vm3466_vm11, %v14542_v46  ;;  %v3410_v52 = vrot.slane %v14484_v26, 1  ;;  %v12337_v56 = vadd.f32 %v11397_v33, %v11197_v32  ;;  %v12338_v3 = vadd.f32 %v2975_v27, %v1918_v21 }
 0x1fa   : > { %v11200_v31 = vpop.f32.mrb[18].mxu1  ;;  %v11400_v25 = vpop.f32.mrb[18].mxu0  ;;  %v3235_v48 = vrot.slane %v3164_v36, 7  ;;  %v14551_v2 = vsel %vm260_vm1, %v3227_v13, %v3298_v45  ;;  %v3414_v0 = vrot.slane %v14533_v15, 1  ;;  %v3415_v40 = vrot.slane %v14507_v51, 1 }
 0x1fb   : > { %17001 = vst [vmem:[#allocation10_spill] sm:$0xff] %v14551_v2  ;;  %v1928_v10 = vpop.f32.mrb[19].mxu1  ;;  %v2985_v23 = vpop.f32.mrb[19].mxu0  ;;  %v14556_v29 = vsel %vm436_vm2, %v3409_v50, %v3410_v52  ;;  %vm3103_vm9 = vcmp.ge.f32.partialorder %v12337_v56, 0.0  ;;  %v3135_v1 = vmul.f32 0.01, %v12337_v56  ;;  %v14568_v24 = vsel %vm260_vm1, %v3162_v22, %v3232_v37 }
 0x1fc   : > { %17002 = vst [vmem:[#allocation11_spill] sm:$0xff] %v14556_v29  ;;  %vm3102_vm10 = vcmp.ge.f32.partialorder %v12338_v3, 0.0  ;;  %v3300_v42 = vrot.slane %v14519_v8, 6  ;;  %v14562_v28 = vsel %vm260_vm1, %v3235_v48, %v16723_v6  ;;  %11436 = vmatprep.mubr.msk.f32.mxu1 %vm3466_vm11, %v14556_v29  ;;  %v3134_v13 = vmul.f32 0.01, %v12338_v3 }
 0x1fd   : > { %v3412_v54 = vrot.slane %v14551_v2, 1  ;;  %v14570_v41 = vsel %vm3103_vm9, %v12337_v56, %v3135_v1  ;;  %v12339_v53 = vadd.f32 %v11400_v25, %v11200_v31  ;;  %v12340_v38 = vadd.f32 %v2985_v23, %v1928_v10 }
 0x1fe   : > { %v11203_v32 = vpop.f32.mrb[20].mxu1  ;;  %v11403_v33 = vpop.f32.mrb[20].mxu0  ;;  %v16725_v45 = vrot.slane %v14570_v41, 7  ;;  %v3166_v21 = vsel %vm3102_vm10, %v12338_v3, %v3134_v13  ;;  %v14577_v59 = vsel %vm436_vm2, %v3414_v0, %v3415_v40  ;;  %v3419_v56 = vrot.slane %v14568_v24, 1 }
 0x1ff   : > { %v14574_v27 = vsel %vm436_vm2, %v3410_v52, %v3412_v54  ;;  %17004 = vst [vmem:[#allocation13_spill] sm:$0xff] %v14577_v59  ;;  %v1938_v50 = vpop.f32.mrb[21].mxu1  ;;  %v2995_v6 = vpop.f32.mrb[21].mxu0  ;;  %v3238_v9 = vrot.slane %v3166_v21, 7  ;;  %vm3105_vm12 = vcmp.ge.f32.partialorder %v12339_v53, 0.0  ;;  %vm3104_vm13 = vcmp.ge.f32.partialorder %v12340_v38, 0.0 }
 0x200   : > { %17003 = vst [vmem:[#allocation12_spill] sm:$0xff] %v14574_v27  ;;  %11437 = vmatmul.mubr.msk.f32.gmra.mrb[42].mxu1 %vm3466_vm11, %v14574_v27  ;;  %v3137_v22 = vmul.f32 0.01, %v12339_v53  ;;  %v3136_v37 = vmul.f32 0.01, %v12340_v38  ;;  %v14586_v52 = vsel %vm260_vm1, %v3230_v35, %v3299_v58  ;;  %v3420_v3 = vrot.slane %v14538_v43, 1 }
 0x201   : > { %11439 = vmatprep.mubr.msk.f32.mxu1 %vm3466_vm11, %v14577_v59  ;;  %17005 = vst [vmem:[#allocation14_spill] sm:$0xff] %v14586_v52  ;;  %v14591_v31 = vsel %vm260_vm1, %v3164_v36, %v3235_v48  ;;  %v14596_v25 = vsel %vm260_vm1, %v3238_v9, %v16725_v45  ;;  %v3417_v10 = vrot.slane %v14586_v52, 1  ;;  %v3301_v35 = vrot.slane %v14529_v7, 6 }
 0x202   : > { %v14598_v0 = vsel %vm3105_vm12, %v12339_v53, %v3137_v22  ;;  %v11206_v20 = vpop.f32.mrb[22].mxu1  ;;  %v11406_v23 = vpop.f32.mrb[22].mxu0  ;;  %v3168_v1 = vsel %vm3104_vm13, %v12340_v38, %v3136_v37  ;;  %v14604_v13 = vsel %vm436_vm2, %v3419_v56, %v3420_v3  ;;  %v12341_v53 = vadd.f32 %v11403_v33, %v11203_v32 }
 0x203   : > { %17006 = vst [vmem:[#allocation42_spill] sm:$0xff] %v14604_v13  ;;  %v1948_v36 = vpop.f32.mrb[23].mxu1  ;;  %v3005_v48 = vpop.f32.mrb[23].mxu0  ;;  %v3241_v54 = vrot.slane %v3168_v1, 7  ;;  %v14607_v45 = vsel %vm436_vm2, %v3415_v40, %v3417_v10  ;;  %v12342_v22 = vadd.f32 %v2995_v6, %v1938_v50  ;;  %v17008_v59 = vrot.slane %v14519_v8, 7 }
 0x204   : > { %17007 = vst [vmem:[#allocation15_spill] sm:$0xff] %v14607_v45  ;;  %11440 = vmatmul.mubr.msk.f32.gmra.mrb[44].mxu1 %vm3466_vm11, %v14607_v45  ;;  %v3424_v38 = vrot.slane %v14591_v31, 1  ;;  %v3425_v37 = vrot.slane %v14562_v28, 1  ;;  %v12343_v56 = vadd.f32 %v11406_v23, %v11206_v20  ;;  %v3302_v58 = vrot.slane %v14570_v41, 6 }
 0x205   : > { %v14614_v27 = vsel %vm260_vm1, %v17008_v59, %v3300_v42  ;;  %v17010_v40 = vrot.slane %v14598_v0, 7  ;;  %11442 = vmatprep.mubr.msk.f32.mxu1 %vm3466_vm11, %v14604_v13  ;;  %vm3107_vm14 = vcmp.ge.f32.partialorder %v12341_v53, 0.0  ;;  %v3139_v8 = vmul.f32 0.01, %v12341_v53 }
 0x206   : > { %17009 = vst [vmem:[#allocation43_spill] sm:$0xff] %v14614_v27  ;;  %v11209_v6 = vpop.f32.mrb[24].mxu1  ;;  %v11409_v42 = vpop.f32.mrb[24].mxu0  ;;  %v14627_v33 = vsel %vm260_vm1, %v3166_v21, %v3238_v9  ;;  %vm3106_vm15 = vcmp.ge.f32.partialorder %v12342_v22, 0.0  ;;  %v3138_v59 = vmul.f32 0.01, %v12342_v22  ;;  %v12344_v45 = vadd.f32 %v3005_v48, %v1948_v36 }
 0x207   : > { %v14622_v32 = vsel %vm260_vm1, %v3241_v54, %v17010_v40  ;;  %v3422_v50 = vrot.slane %v14614_v27, 1  ;;  %v1958_v10 = vpop.f32.mrb[25].mxu1  ;;  %v3015_v20 = vpop.f32.mrb[25].mxu0  ;;  %v14630_v23 = vsel %vm3107_vm14, %v12341_v53, %v3139_v8  ;;  %vm3109_vm0 = vcmp.ge.f32.partialorder %v12343_v56, 0.0 }
 0x208   : > { %v3141_v40 = vmul.f32 0.01, %v12343_v56  ;;  %v16750_v13 = vrot.slane %v14630_v23, 7  ;;  %v3170_v29 = vsel %vm3106_vm15, %v12342_v22, %v3138_v59  ;;  %v14637_v9 = vsel %vm436_vm2, %v3424_v38, %v3425_v37 }
 0x209   : > { %v14634_v46 = vsel %vm436_vm2, %v3420_v3, %v3422_v50  ;;  %17012 = vst [vmem:[#allocation44_spill] sm:$0xff] %v14637_v9  ;;  %v3244_v21 = vrot.slane %v3170_v29, 7  ;;  %vm3108_vm3 = vcmp.ge.f32.partialorder %v12344_v45, 0.0  ;;  %v3140_v53 = vmul.f32 0.01, %v12344_v45 }
 0x20a   : > { %17011 = vst [vmem:[#allocation16_spill] sm:$0xff] %v14634_v46  ;;  %11443 = vmatmul.mubr.msk.f32.gmra.mrb[46].mxu1 %vm3466_vm11, %v14634_v46  ;;  %v14641_v11 = vsel %vm3109_vm0, %v12343_v56, %v3141_v40  ;;  %v11212_v8 = vpop.f32.mrb[26].mxu1  ;;  %v11412_v61 = vpop.f32.mrb[26].mxu0  ;;  %v14644_v36 = vsel %vm260_vm1, %v3168_v1, %v3241_v54  ;;  %v17013_v48 = vrot.slane %v14529_v7, 7  ;;  %v3429_v38 = vrot.slane %v14627_v33, 1 }
 0x20b   : > { %11445 = vmatprep.mubr.msk.f32.mxu1 %vm3466_vm11, %v14637_v9  ;;  %v1968_v56 = vpop.f32.mrb[27].mxu1  ;;  %v3025_v59 = vpop.f32.mrb[27].mxu0  ;;  %v3303_v50 = vrot.slane %v14598_v0, 6  ;;  %v14659_v1 = vsel %vm260_vm1, %v3244_v21, %v16750_v13  ;;  %v3172_v54 = vsel %vm3108_vm3, %v12344_v45, %v3140_v53  ;;  %v3430_v7 = vrot.slane %v14596_v25, 1 }
 0x20c   : > { %v14652_v22 = vsel %vm260_vm1, %v17013_v48, %v3301_v35  ;;  %v3247_v3 = vrot.slane %v3172_v54, 7  ;;  %v12345_v9 = vadd.f32 %v11409_v42, %v11209_v6  ;;  %v12346_v35 = vadd.f32 %v3015_v20, %v1958_v10 }
 0x20d   : > { %17014 = vst [vmem:[#allocation17_spill] sm:$0xff] %v14652_v22  ;;  %v3427_v40 = vrot.slane %v14652_v22, 1  ;;  %v3304_v48 = vrot.slane %v14630_v23, 6  ;;  %v17016_v55 = vrot.slane %v14570_v41, 7  ;;  %v3434_v13 = vrot.slane %v14644_v36, 1 }
 0x20e   : > { %v11215_v45 = vpop.f32.mrb[28].mxu1  ;;  %v11415_v53 = vpop.f32.mrb[28].mxu0  ;;  %v17018_v18 = vrot.slane %v14641_v11, 7  ;;  %vm3111_vm5 = vcmp.ge.f32.partialorder %v12345_v9, 0.0  ;;  %v3435_v41 = vrot.slane %v14622_v32, 1  ;;  %vm3110_vm6 = vcmp.ge.f32.partialorder %v12346_v35, 0.0 }
 0x20f   : > { %v14665_v46 = vsel %vm436_vm2, %v3425_v37, %v3427_v40  ;;  %v14670_v44 = vsel %vm260_vm1, %v17016_v55, %v3302_v58  ;;  %v14681_v37 = vsel %vm436_vm2, %v3429_v38, %v3430_v7  ;;  %v1978_v55 = vpop.f32.mrb[29].mxu1  ;;  %v3035_v58 = vpop.f32.mrb[29].mxu0  ;;  %v3143_v6 = vmul.f32 0.01, %v12345_v9 }
 0x210   : > { %17015 = vst [vmem:[#allocation18_spill] sm:$0xff] %v14665_v46  ;;  %17017 = vst [vmem:[#allocation19_spill] sm:$0xff] %v14670_v44  ;;  %v14676_v60 = vsel %vm260_vm1, %v3247_v3, %v17018_v18  ;;  %11446 = vmatmul.mubr.msk.f32.gmra.mrb[48].mxu1 %vm3466_vm11, %v14665_v46  ;;  %v3142_v42 = vmul.f32 0.01, %v12346_v35  ;;  %v3432_v18 = vrot.slane %v14670_v44, 1  ;;  %v14688_v10 = vsel %vm260_vm1, %v3170_v29, %v3244_v21 }
 0x211   : > { %17019 = vst [vmem:[#allocation20_spill] sm:$0xff] %v14681_v37  ;;  %11448 = vmatprep.mubr.msk.f32.mxu1 %vm3466_vm11, %v14681_v37  ;;  %v12347_v20 = vadd.f32 %v11412_v61, %v11212_v8  ;;  %v12348_v40 = vadd.f32 %v3025_v59, %v1968_v56  ;;  %v17020_v38 = vrot.slane %v14598_v0, 7  ;;  %v3175_v16 = vsel %vm3111_vm5, %v12345_v9, %v3143_v6 }
 0x212   : > { %v3174_v22 = vsel %vm3110_vm6, %v12346_v35, %v3142_v42  ;;  %v14696_v27 = vsel %vm436_vm2, %v3430_v7, %v3432_v18  ;;  %v11218_v52 = vpop.f32.mrb[30].mxu1  ;;  %v11418_v2 = vpop.f32.mrb[30].mxu0  ;;  %v3251_v44 = vrot.slane %v3175_v16, 7  ;;  %v14702_v61 = vsel %vm436_vm2, %v3434_v13, %v3435_v41 }
 0x213   : > { %v14693_v46 = vsel %vm260_vm1, %v17020_v38, %v3303_v50  ;;  %17021 = vst [vmem:[#allocation21_spill] sm:$0xff] %v14696_v27  ;;  %v3250_v19 = vrot.slane %v3174_v22, 7  ;;  %17022 = vst [vmem:[#allocation23_spill] sm:$0xff] %v14702_v61  ;;  %vm3113_vm7 = vcmp.ge.f32.partialorder %v12347_v20, 0.0  ;;  %v1988_v29 = vpop.f32.mrb[31].mxu1  ;;  %v3045_v0 = vpop.f32.mrb[31].mxu0  ;;  %v14705_v9 = vsel %vm260_vm1, %v3172_v54, %v3247_v3 }
 0x214   : > { %v3437_v37 = vrot.slane %v14693_v46, 1  ;;  %11449 = vmatmul.mubr.msk.f32.gmra.mrb[50].mxu1 %vm3466_vm11, %v14696_v27  ;;  %v3145_v21 = vmul.f32 0.01, %v12347_v20  ;;  %vm3112_vm8 = vcmp.ge.f32.partialorder %v12348_v40, 0.0  ;;  %v3144_v8 = vmul.f32 0.01, %v12348_v40 }
 0x215   : > { %11451 = vmatprep.mubr.msk.f32.mxu1 %vm3466_vm11, %v14702_v61  ;;  %v14710_v56 = vsel %vm260_vm1, %v3250_v19, %v3251_v44  ;;  %v3439_v13 = vrot.slane %v14688_v10, 1  ;;  %v3440_v50 = vrot.slane %v14659_v1, 1  ;;  %v12349_v3 = vadd.f32 %v11415_v53, %v11215_v45 }
 0x216   : > { %v14713_v59 = vsel %vm436_vm2, %v3435_v41, %v3437_v37  ;;  %v3177_v7 = vsel %vm3113_vm7, %v12347_v20, %v3145_v21  ;;  %v3176_v35 = vsel %vm3112_vm8, %v12348_v40, %v3144_v8  ;;  %v12350_v54 = vadd.f32 %v3035_v58, %v1978_v55 }
 0x217   : > { %17023 = vst [vmem:[#allocation24_spill] sm:$0xff] %v14713_v59  ;;  %v3305_v6 = vrot.slane %v14641_v11, 6  ;;  %v3254_v42 = vrot.slane %v3177_v7, 7  ;;  %v3253_v18 = vrot.slane %v3176_v35, 7  ;;  %v14721_v38 = vsel %vm436_vm2, %v3439_v13, %v3440_v50 }
 0x218   : > { %11452 = vmatmul.mubr.msk.f32.gmra.mrb[52].mxu1 %vm3466_vm11, %v14713_v59  ;;  %17024 = vst [vmem:[#allocation7_spill] sm:$0xff] %v14721_v38  ;;  %vm3115_vm9 = vcmp.ge.f32.partialorder %v12349_v3, 0.0  ;;  %v3147_v37 = vmul.f32 0.01, %v12349_v3  ;;  %vm3114_vm10 = vcmp.ge.f32.partialorder %v12350_v54, 0.0  ;;  %v3306_v20 = vrot.slane %v3175_v16, 6 }
 0x219   : > { %11454 = vmatprep.mubr.msk.f32.mxu1 %vm3466_vm11, %v14721_v38  ;;  %v3146_v41 = vmul.f32 0.01, %v12350_v54  ;;  %v14726_v45 = vsel %vm260_vm1, %v3253_v18, %v3254_v42  ;;  %v17025_v53 = vrot.slane %v14630_v23, 7  ;;  %v3444_v58 = vrot.slane %v14705_v9, 1 }
 0x21a   : > { %v3179_v40 = vsel %vm3115_vm9, %v12349_v3, %v3147_v37  ;;  %v3445_v13 = vrot.slane %v14676_v60, 1  ;;  %v14737_v38 = vsel %vm260_vm1, %v3174_v22, %v3250_v19  ;;  %v12351_v61 = vadd.f32 %v11418_v2, %v11218_v52 }
 0x21b   : > { %v14731_v55 = vsel %vm260_vm1, %v17025_v53, %v3304_v48  ;;  %v3178_v21 = vsel %vm3114_vm10, %v12350_v54, %v3146_v41  ;;  %v3257_v16 = vrot.slane %v3179_v40, 7  ;;  %v12352_v23 = vadd.f32 %v3045_v0, %v1988_v29 }
 0x21c   : > { %v3442_v8 = vrot.slane %v14731_v55, 1  ;;  %v3256_v59 = vrot.slane %v3178_v21, 7  ;;  %v17027_v48 = vrot.slane %v14641_v11, 7  ;;  %v14753_v19 = vsel %vm436_vm2, %v3444_v58, %v3445_v13 }
 0x21d   : > { %17028 = vst [vmem:[#allocation6_spill] sm:$0xff] %v14753_v19  ;;  %v3307_v22 = vrot.slane %v3177_v7, 6  ;;  %v14756_v2 = vsel %vm260_vm1, %v3176_v35, %v3253_v18  ;;  %v3449_v52 = vrot.slane %v14737_v38, 1  ;;  %v3450_v29 = vrot.slane %v14710_v56, 1 }
 0x21e   : > { %v14740_v27 = vsel %vm436_vm2, %v3440_v50, %v3442_v8  ;;  %v14745_v53 = vsel %vm260_vm1, %v17027_v48, %v3305_v6  ;;  %v14748_v3 = vsel %vm260_vm1, %v3256_v59, %v3257_v16  ;;  %v14764_v0 = vsel %vm260_vm1, %v3251_v44, %v3306_v20 }
 0x21f   : > { %17026 = vst [vmem:[#allocation26_spill] sm:$0xff] %v14740_v27  ;;  %11455 = vmatmul.mubr.msk.f32.gmra.mrb[54].mxu1 %vm3466_vm11, %v14740_v27  ;;  %v3447_v11 = vrot.slane %v14745_v53, 1  ;;  %v3308_v50 = vrot.slane %v3179_v40, 6  ;;  %v14772_v7 = vsel %vm436_vm2, %v3449_v52, %v3450_v29  ;;  %v3452_v35 = vrot.slane %v14764_v0, 1 }
 0x220   : > { %11457 = vmatprep.mubr.msk.f32.mxu1 %vm3466_vm11, %v14753_v19  ;;  %17030 = vst [vmem:[#allocation31_spill] sm:$0xff] %v14772_v7  ;;  %v3454_v6 = vrot.slane %v14756_v2, 1  ;;  %v3455_v18 = vrot.slane %v14726_v45, 1  ;;  %v14778_v37 = vsel %vm260_vm1, %v3178_v21, %v3256_v59  ;;  %v14783_v44 = vsel %vm260_vm1, %v3254_v42, %v3307_v22 }
 0x221   : > { %v14767_v54 = vsel %vm436_vm2, %v3445_v13, %v3447_v11  ;;  %v14786_v41 = vsel %vm436_vm2, %v3450_v29, %v3452_v35  ;;  %v3457_v20 = vrot.slane %v14783_v44, 1  ;;  %v3459_v59 = vrot.slane %v14778_v37, 1  ;;  %v9577_v29 = vld [vmem:[%s16649_s2 + $0x18] sm:$0xff] }
 0x222   : > { %17029 = vst [vmem:[#allocation29_spill] sm:$0xff] %v14767_v54  ;;  %v14792_v58 = vsel %vm436_vm2, %v3454_v6, %v3455_v18  ;;  %v3460_v40 = vrot.slane %v14748_v3, 1  ;;  %v14797_v21 = vsel %vm260_vm1, %v3257_v16, %v3308_v50  ;;  %v3149_v48 = vmul.f32 0.01, %v12351_v61 }
 0x223   : > { %11458 = vmatmul.mubr.msk.f32.gmra.mrb[56].mxu1 %vm3466_vm11, %v14767_v54  ;;  %17031 = vst [vmem:[#allocation32_spill] sm:$0xff] %v14792_v58  ;;  %v14802_v42 = vsel %vm436_vm2, %v3455_v18, %v3457_v20  ;;  %v3462_v8 = vrot.slane %v14797_v21, 1  ;;  %v3148_v16 = vmul.f32 0.01, %v12352_v23  ;;  %vm3117_vm12 = vcmp.ge.f32.partialorder %v12351_v61, 0.0 }
 0x224   : > { %11460 = vmatprep.mubr.msk.f32.mxu1 %vm3466_vm11, %v14772_v7  ;;  %17032 = vst [vmem:[#allocation34_spill] sm:$0xff] %v14802_v42  ;;  %v14808_v13 = vsel %vm436_vm2, %v3459_v59, %v3460_v40  ;;  %vm3116_vm13 = vcmp.ge.f32.partialorder %v12352_v23, 0.0  ;;  %v14819_v11 = vsel %vm3117_vm12, %v12351_v61, %v3149_v48  ;;  %v4037_v61 = vrot.slane %v14412_v63, 2  ;;  %v14912_v59 = vld [vmem:[%s16649_s2 + $0x20] sm:$0xff] }
 0x225   : > { %v14813_v22 = vsel %vm436_vm2, %v3460_v40, %v3462_v8  ;;  %v14821_v52 = vsel %vm3116_vm13, %v12352_v23, %v3148_v16  ;;  %v16773_v50 = vrot.slane %v14819_v11, 7  ;;  %v4038_v23 = vrot.slane %v14409_v57, 2 }
 0x226   : > { %v16774_v35 = vrot.slane %v14821_v52, 7  ;;  %v4040_v6 = vrot.slane %v14405_v47, 2  ;;  %v4042_v47 = vrot.slane %v14420_v62, 2  ;;  %v4043_v40 = vrot.slane %v14416_v34, 2 }
 0x227   : > { %11461 = vmatmul.mubr.msk.f32.gmra.mrb[58].mxu1 %vm3466_vm11, %v14786_v41  ;;  %v14902_v18 = vsel %vm1092_vm4, %v4037_v61, %v4038_v23  ;;  %v4045_v8 = vrot.slane %v14423_v49, 2  ;;  %v4047_v16 = vrot.slane %v14448_v12, 2  ;;  %v4048_v61 = vrot.slane %v14432_v5, 2 }
 0x228   : > { %11463 = vmatprep.mubr.msk.f32.mxu1 %vm3466_vm11, %v14792_v58  ;;  %v14907_v20 = vsel %vm1092_vm4, %v4038_v23, %v4040_v6  ;;  %v14925_v48 = vsel %vm1092_vm4, %v4042_v47, %v4043_v40  ;;  %v4050_v23 = vrot.slane %v14479_v17, 2  ;;  %v4052_v6 = vrot.slane %v14468_v14, 2 }
 0x229   : > { %v14938_v49 = vsel %vm1092_vm4, %v4047_v16, %v4048_v61  ;;  %v4053_v47 = vrot.slane %v14457_v4, 2  ;;  %v4057_v16 = vrot.slane %v14502_v30, 2 }
 0x22a   : > { %17033 = vst [vmem:[#allocation35_spill] sm:$0xff] %v14938_v49 }
 0x22b   : > { %11464 = vmatmul.mubr.msk.f32.gmra.mrb[60].mxu1 %vm3466_vm11, %v14802_v42  ;;  %v14951_v17 = vsel %vm1092_vm4, %v4052_v6, %v4053_v47  ;;  %v4062_v6 = vrot.slane %v14533_v15, 2 }
 0x22c   : > { %11466 = vmatprep.mubr.msk.f32.mxu1 %vm3466_vm11, %v14808_v13  ;;  %17036 = vst [vmem:[#allocation39_spill] sm:$0xff] %v14951_v17 }
 0x22f   : > { %11467 = vmatmul.mubr.msk.f32.gmra.mrb[62].mxu1 %vm3466_vm11, %v14813_v22 }
 0x230   : > { %11471 = vmatprep.mubr.msk.f32.mxu1 %vm3466_vm11, %v14412_v63 }
 0x233   : > { %11472 = vmatmul.mubr.msk.f32.vlgmr.msra.gmra.mrb[32].mxu1 %vm3466_vm11, %v14409_v57 }
 0x234   : > { %11520 = vmatpush3.msra.mxu1 %v14440_v39  ;;  %11474 = vmatprep.mubr.msk.f32.mxu1 %vm3466_vm11, %v14412_v63  ;;  %v14842_v39 = vsel %vm260_vm1, %v16774_v35, %v16773_v50  ;;  %v14945_v50 = vsel %vm1092_vm4, %v4048_v61, %v4050_v23  ;;  %v4058_v35 = vrot.slane %v14484_v26, 2  ;;  %v17038_v61 = vld [vmem:[#allocation10_spill] sm:$0xff] }
 0x235   : > { %11569 = vmatprep.subr.mxu1 %v9577_v29  ;;  %17034 = vst [vmem:[#allocation36_spill] sm:$0xff] %v14945_v50  ;;  %v4060_v23 = vrot.slane %v17038_v61, 2 }
 0x237   : > { %11475 = vmatmul.mubr.msk.f32.gmra.mrb[34].mxu1 %vm3466_vm11, %v14409_v57 }
 0x238   : > { %11477 = vmatprep.mubr.msk.f32.mxu1 %vm3466_vm11, %v14420_v62 }
 0x23b   : > { %11478 = vmatmul.mubr.msk.f32.gmra.mrb[36].mxu1 %vm3466_vm11, %v14416_v34 }
 0x23c   : > { %11480 = vmatprep.mubr.msk.f32.mxu1 %vm3466_vm11, %v14448_v12 }
 0x23f   : > { %11481 = vmatmul.mubr.msk.f32.gmra.mrb[38].mxu1 %vm3466_vm11, %v14432_v5 }
 0x240   : > { %11483 = vmatprep.mubr.msk.f32.mxu1 %vm3466_vm11, %v14468_v14 }
 0x243   : > { %11484 = vmatmul.mubr.msk.f32.gmra.mrb[40].mxu1 %vm3466_vm11, %v14457_v4 }
 0x244   : > { %11486 = vmatprep.mubr.msk.f32.mxu1 %vm3466_vm11, %v14502_v30 }
 0x247   : > { %11487 = vmatmul.mubr.msk.f32.gmra.mrb[42].mxu1 %vm3466_vm11, %v14484_v26 }
 0x248   : > { %11489 = vmatprep.mubr.msk.f32.mxu1 %vm3466_vm11, %v14533_v15 }
 0x24b   : > { %11490 = vmatmul.mubr.msk.f32.gmra.mrb[44].mxu1 %vm3466_vm11, %v14507_v51 }
 0x24c   : > { %11492 = vmatprep.mubr.msk.f32.mxu1 %vm3466_vm11, %v14568_v24 }
 0x24f   : > { %11493 = vmatmul.mubr.msk.f32.gmra.mrb[46].mxu1 %vm3466_vm11, %v14538_v43 }
 0x250   : > { %11495 = vmatprep.mubr.msk.f32.mxu1 %vm3466_vm11, %v14591_v31 }
 0x253   : > { %11496 = vmatmul.mubr.msk.f32.gmra.mrb[48].mxu1 %vm3466_vm11, %v14562_v28 }
 0x254   : > { %11498 = vmatprep.mubr.msk.f32.mxu1 %vm3466_vm11, %v14627_v33 }
 0x257   : > { %11499 = vmatmul.mubr.msk.f32.gmra.mrb[50].mxu1 %vm3466_vm11, %v14596_v25 }
 0x258   : > { %11501 = vmatprep.mubr.msk.f32.mxu1 %vm3466_vm11, %v14644_v36 }
 0x25b   : > { %11502 = vmatmul.mubr.msk.f32.gmra.mrb[52].mxu1 %vm3466_vm11, %v14622_v32 }
 0x25c   : > { %11504 = vmatprep.mubr.msk.f32.mxu1 %vm3466_vm11, %v14688_v10 }
 0x25f   : > { %11505 = vmatmul.mubr.msk.f32.gmra.mrb[54].mxu1 %vm3466_vm11, %v14659_v1 }
 0x260   : > { %11507 = vmatprep.mubr.msk.f32.mxu1 %vm3466_vm11, %v14705_v9 }
 0x263   : > { %11508 = vmatmul.mubr.msk.f32.gmra.mrb[56].mxu1 %vm3466_vm11, %v14676_v60 }
 0x264   : > { %11510 = vmatprep.mubr.msk.f32.mxu1 %vm3466_vm11, %v14737_v38 }
 0x267   : > { %11511 = vmatmul.mubr.msk.f32.gmra.mrb[58].mxu1 %vm3466_vm11, %v14710_v56 }
 0x268   : > { %11513 = vmatprep.mubr.msk.f32.mxu1 %vm3466_vm11, %v14756_v2 }
 0x26b   : > { %11514 = vmatmul.mubr.msk.f32.gmra.mrb[60].mxu1 %vm3466_vm11, %v14726_v45 }
 0x26c   : > { %11516 = vmatprep.mubr.msk.f32.mxu1 %vm3466_vm11, %v14778_v37 }
 0x26f   : > { %11517 = vmatmul.mubr.msk.f32.gmra.mrb[62].mxu1 %vm3466_vm11, %v14748_v3 }
 0x270   : > { %11521 = vmatprep.mubr.msk.f32.mxu1 %vm3466_vm11, %v14902_v18 }
 0x273   : > { %11522 = vmatmul.mubr.msk.f32.vlgmr.msra.gmra.mrb[32].mxu1 %vm3466_vm11, %v14907_v20 }
 0x274   : > { %11570 = vmatpush3.msra.mxu1 %v9577_v29  ;;  %11524 = vmatprep.mubr.msk.f32.mxu1 %vm3466_vm11, %v14902_v18  ;;  %v14932_v29 = vsel %vm1092_vm4, %v4043_v40, %v4045_v8  ;;  %v17035_v40 = vld [vmem:[#allocation30_spill] sm:$0xff] }
 0x275   : > { %11619 = vmatprep.subr.mxu1 %v14912_v59  ;;  %v4055_v8 = vrot.slane %v17035_v40, 2  ;;  %v14964_v40 = vsel %vm1092_vm4, %v4057_v16, %v4058_v35  ;;  %v4067_v16 = vrot.slane %v14568_v24, 2 }
 0x276   : > { %17039 = vst [vmem:[#allocation41_spill] sm:$0xff] %v14964_v40 }
 0x277   : > { %11525 = vmatmul.mubr.msk.f32.gmra.mrb[34].mxu1 %vm3466_vm11, %v14907_v20 }
 0x278   : > { %11527 = vmatprep.mubr.msk.f32.mxu1 %vm3466_vm11, %v14925_v48 }
 0x27b   : > { %11528 = vmatmul.mubr.msk.f32.gmra.mrb[36].mxu1 %vm3466_vm11, %v14932_v29 }
 0x27c   : > { %11530 = vmatprep.mubr.msk.f32.mxu1 %vm3466_vm11, %v14938_v49  ;;  %v14958_v49 = vsel %vm1092_vm4, %v4053_v47, %v4055_v8  ;;  %v17041_v47 = vld [vmem:[#allocation14_spill] sm:$0xff] }
 0x27d   : > { %17037 = vst [vmem:[#allocation40_spill] sm:$0xff] %v14958_v49  ;;  %v4065_v8 = vrot.slane %v17041_v47, 2 }
 0x27f   : > { %11531 = vmatmul.mubr.msk.f32.gmra.mrb[38].mxu1 %vm3466_vm11, %v14945_v50  ;;  %v4063_v50 = vrot.slane %v14507_v51, 2 }
 0x280   : > { %11533 = vmatprep.mubr.msk.f32.mxu1 %vm3466_vm11, %v14951_v17  ;;  %v14971_v17 = vsel %vm1092_vm4, %v4058_v35, %v4060_v23  ;;  %v17044_v35 = vld [vmem:[#allocation43_spill] sm:$0xff] }
 0x281   : > { %17040 = vst [vmem:[#allocation45_spill] sm:$0xff] %v14971_v17  ;;  %v14977_v61 = vsel %vm1092_vm4, %v4062_v6, %v4063_v50  ;;  %v4070_v23 = vrot.slane %v17044_v35, 2  ;;  %v4072_v6 = vrot.slane %v14591_v31, 2 }
 0x282   : > { %17042 = vst [vmem:[#allocation37_spill] sm:$0xff] %v14977_v61 }
 0x283   : > { %11534 = vmatmul.mubr.msk.f32.gmra.mrb[40].mxu1 %vm3466_vm11, %v14958_v49  ;;  %v4068_v49 = vrot.slane %v14538_v43, 2 }
 0x284   : > { %11536 = vmatprep.mubr.msk.f32.mxu1 %vm3466_vm11, %v14964_v40  ;;  %v14984_v40 = vsel %vm1092_vm4, %v4063_v50, %v4065_v8  ;;  %v17047_v50 = vld [vmem:[#allocation17_spill] sm:$0xff] }
 0x285   : > { %17043 = vst [vmem:[#allocation46_spill] sm:$0xff] %v14984_v40  ;;  %v14990_v47 = vsel %vm1092_vm4, %v4067_v16, %v4068_v49  ;;  %v4075_v8 = vrot.slane %v17047_v50, 2  ;;  %v4077_v16 = vrot.slane %v14627_v33, 2 }
 0x286   : > { %17045 = vst [vmem:[#allocation38_spill] sm:$0xff] %v14990_v47 }
 0x287   : > { %11537 = vmatmul.mubr.msk.f32.gmra.mrb[42].mxu1 %vm3466_vm11, %v14971_v17  ;;  %v4073_v17 = vrot.slane %v14562_v28, 2 }
 0x288   : > { %11539 = vmatprep.mubr.msk.f32.mxu1 %vm3466_vm11, %v14977_v61  ;;  %v14997_v61 = vsel %vm1092_vm4, %v4068_v49, %v4070_v23  ;;  %v17049_v49 = vld [vmem:[#allocation19_spill] sm:$0xff] }
 0x289   : > { %17046 = vst [vmem:[#allocation47_spill] sm:$0xff] %v14997_v61  ;;  %v15003_v35 = vsel %vm1092_vm4, %v4072_v6, %v4073_v17  ;;  %v4080_v23 = vrot.slane %v17049_v49, 2  ;;  %v4082_v6 = vrot.slane %v14644_v36, 2  ;;  %v4088_v49 = vrot.slane %v14659_v1, 2 }
 0x28a   : > { %17048 = vst [vmem:[#allocation48_spill] sm:$0xff] %v15003_v35 }
 0x28b   : > { %11540 = vmatmul.mubr.msk.f32.gmra.mrb[44].mxu1 %vm3466_vm11, %v14984_v40  ;;  %v4078_v40 = vrot.slane %v14596_v25, 2 }
 0x28c   : > { %11542 = vmatprep.mubr.msk.f32.mxu1 %vm3466_vm11, %v14990_v47  ;;  %v15010_v47 = vsel %vm1092_vm4, %v4073_v17, %v4075_v8  ;;  %v4085_v17 = vrot.slane %v14693_v46, 2 }
 0x28d   : > { %v15016_v50 = vsel %vm1092_vm4, %v4077_v16, %v4078_v40  ;;  %v4087_v16 = vrot.slane %v14688_v10, 2 }
 0x28e   : > { %17050 = vst [vmem:[#allocation49_spill] sm:$0xff] %v15016_v50 }
 0x28f   : > { %11543 = vmatmul.mubr.msk.f32.gmra.mrb[46].mxu1 %vm3466_vm11, %v14997_v61  ;;  %v4083_v61 = vrot.slane %v14622_v32, 2  ;;  %v15042_v46 = vsel %vm1092_vm4, %v4087_v16, %v4088_v49  ;;  %v4098_v16 = vrot.slane %v14710_v56, 2 }
 0x290   : > { %11545 = vmatprep.mubr.msk.f32.mxu1 %vm3466_vm11, %v15003_v35  ;;  %v15023_v35 = vsel %vm1092_vm4, %v4078_v40, %v4080_v23  ;;  %v4090_v40 = vrot.slane %v14731_v55, 2  ;;  %17052 = vst [vmem:[#allocation30_spill] sm:$0xff] %v15042_v46  ;;  %v4092_v23 = vrot.slane %v14705_v9, 2 }
 0x291   : > { %v15029_v8 = vsel %vm1092_vm4, %v4082_v6, %v4083_v61  ;;  %v4093_v6 = vrot.slane %v14676_v60, 2 }
 0x292   : > { %17051 = vst [vmem:[#allocation50_spill] sm:$0xff] %v15029_v8 }
 0x293   : > { %11546 = vmatmul.mubr.msk.f32.gmra.mrb[48].mxu1 %vm3466_vm11, %v15010_v47  ;;  %v15055_v55 = vsel %vm1092_vm4, %v4092_v23, %v4093_v6  ;;  %v4103_v23 = vrot.slane %v14726_v45, 2 }
 0x294   : > { %11548 = vmatprep.mubr.msk.f32.mxu1 %vm3466_vm11, %v15016_v50  ;;  %v15036_v50 = vsel %vm1092_vm4, %v4083_v61, %v4085_v17  ;;  %v4095_v61 = vrot.slane %v14745_v53, 2  ;;  %17054 = vst [vmem:[#allocation14_spill] sm:$0xff] %v15055_v55  ;;  %v4097_v17 = vrot.slane %v14737_v38, 2 }
 0x296   : > { %v15068_v53 = vsel %vm1092_vm4, %v4097_v17, %v4098_v16  ;;  %v4108_v17 = vrot.slane %v14748_v3, 2 }
 0x297   : > { %11549 = vmatmul.mubr.msk.f32.gmra.mrb[50].mxu1 %vm3466_vm11, %v15023_v35  ;;  %17056 = vst [vmem:[#allocation17_spill] sm:$0xff] %v15068_v53 }
 0x298   : > { %11551 = vmatprep.mubr.msk.f32.mxu1 %vm3466_vm11, %v15029_v8  ;;  %v15049_v8 = vsel %vm1092_vm4, %v4088_v49, %v4090_v40  ;;  %v4100_v49 = vrot.slane %v14764_v0, 2  ;;  %v4102_v40 = vrot.slane %v14756_v2, 2 }
 0x299   : > { %17053 = vst [vmem:[#allocation10_spill] sm:$0xff] %v15049_v8 }
 0x29a   : > { %v15081_v0 = vsel %vm1092_vm4, %v4102_v40, %v4103_v23  ;;  %v9676_v40 = vld [vmem:[%s16649_s2 + $0x30] sm:$0xff] }
 0x29b   : > { %11552 = vmatmul.mubr.msk.f32.gmra.mrb[52].mxu1 %vm3466_vm11, %v15036_v50  ;;  %17057 = vst [vmem:[#allocation19_spill] sm:$0xff] %v15081_v0 }
 0x29c   : > { %11554 = vmatprep.mubr.msk.f32.mxu1 %vm3466_vm11, %v15042_v46  ;;  %v15062_v46 = vsel %vm1092_vm4, %v4093_v6, %v4095_v61  ;;  %v4105_v6 = vrot.slane %v14783_v44, 2  ;;  %v4107_v61 = vrot.slane %v14778_v37, 2 }
 0x29d   : > { %17055 = vst [vmem:[#allocation43_spill] sm:$0xff] %v15062_v46 }
 0x29e   : > { %v15094_v44 = vsel %vm1092_vm4, %v4107_v61, %v4108_v17  ;;  %v17063_v61 = vld [vmem:[#allocation28_spill] sm:$0xff] }
 0x29f   : > { %11555 = vmatmul.mubr.msk.f32.gmra.mrb[54].mxu1 %vm3466_vm11, %v15049_v8 }
 0x2a0   : > { %11557 = vmatprep.mubr.msk.f32.mxu1 %vm3466_vm11, %v15055_v55  ;;  %v15075_v55 = vsel %vm1092_vm4, %v4098_v16, %v4100_v49  ;;  %v4110_v16 = vrot.slane %v14797_v21, 2  ;;  %v9643_v21 = vld [vmem:[%s16649_s2 + $0x28] sm:$0xff] }
 0x2a2   : > { %v15099_v49 = vsel %vm1092_vm4, %v4108_v17, %v4110_v16  ;;  %v17064_v17 = vld [vmem:[#allocation33_spill] sm:$0xff]  ;;  %v17065_v16 = vld [vmem:[#allocation8_spill] sm:$0xff] }
 0x2a3   : > { %11558 = vmatmul.mubr.msk.f32.gmra.mrb[56].mxu1 %vm3466_vm11, %v15062_v46 }
 0x2a4   : > { %11560 = vmatprep.mubr.msk.f32.mxu1 %vm3466_vm11, %v15068_v53  ;;  %v15088_v53 = vsel %vm1092_vm4, %v4103_v23, %v4105_v6  ;;  %v17060_v23 = vld [vmem:[#allocation22_spill] sm:$0xff]  ;;  %v17061_v6 = vld [vmem:[#allocation25_spill] sm:$0xff] }
 0x2a7   : > { %11561 = vmatmul.mubr.msk.f32.gmra.mrb[58].mxu1 %vm3466_vm11, %v15075_v55 }
 0x2a8   : > { %11563 = vmatprep.mubr.msk.f32.mxu1 %vm3466_vm11, %v15081_v0 }
 0x2ab   : > { %11564 = vmatmul.mubr.msk.f32.gmra.mrb[60].mxu1 %vm3466_vm11, %v15088_v53 }
 0x2ac   : > { %11566 = vmatprep.mubr.msk.f32.mxu1 %vm3466_vm11, %v15094_v44 }
 0x2af   : > { %11567 = vmatmul.mubr.msk.f32.gmra.mrb[62].mxu1 %vm3466_vm11, %v15099_v49 }
 0x2b0   : > { %11571 = vmatprep.mubr.msk.f32.mxu1 %vm3466_vm11, %v14412_v63 }
 0x2b3   : > { %11572 = vmatmul.mubr.msk.f32.vlgmr.msra.gmra.mrb[32].mxu1 %vm3466_vm11, %v14409_v57  ;;  %v17058_v57 = vrot.slane %v14821_v52, 7 }
 0x2b4   : > { %11620 = vmatpush3.msra.mxu1 %v14912_v59  ;;  %11574 = vmatprep.mubr.msk.f32.mxu1 %vm3466_vm11, %v14420_v62  ;;  %v17059_v59 = vld [vmem:[#allocation5_spill] sm:$0xff] }
 0x2b5   : > { %11669 = vmatprep.subr.mxu1 %v9643_v21  ;;  %v15171_v63 = vsel %vm260_vm1, %v14821_v52, %v17058_v57  ;;  %v17062_v52 = vld [vmem:[#allocation27_spill] sm:$0xff]  ;;  %v17066_v57 = vld [vmem:[#allocation9_spill] sm:$0xff] }
 0x2b7   : > { %11575 = vmatmul.mubr.msk.f32.gmra.mrb[34].mxu1 %vm3466_vm11, %v14416_v34 }
 0x2b8   : > { %11577 = vmatprep.mubr.msk.f32.mxu1 %vm3466_vm11, %v14448_v12 }
 0x2bb   : > { %11578 = vmatmul.mubr.msk.f32.gmra.mrb[36].mxu1 %vm3466_vm11, %v14432_v5 }
 0x2bc   : > { %11580 = vmatprep.mubr.msk.f32.mxu1 %vm3466_vm11, %v14468_v14 }
 0x2bf   : > { %11581 = vmatmul.mubr.msk.f32.gmra.mrb[38].mxu1 %vm3466_vm11, %v14457_v4 }
 0x2c0   : > { %11583 = vmatprep.mubr.msk.f32.mxu1 %vm3466_vm11, %v14502_v30 }
 0x2c3   : > { %11584 = vmatmul.mubr.msk.f32.gmra.mrb[40].mxu1 %vm3466_vm11, %v14484_v26 }
 0x2c4   : > { %11586 = vmatprep.mubr.msk.f32.mxu1 %vm3466_vm11, %v14533_v15 }
 0x2c7   : > { %11587 = vmatmul.mubr.msk.f32.gmra.mrb[42].mxu1 %vm3466_vm11, %v14507_v51 }
 0x2c8   : > { %11589 = vmatprep.mubr.msk.f32.mxu1 %vm3466_vm11, %v14568_v24 }
 0x2cb   : > { %11590 = vmatmul.mubr.msk.f32.gmra.mrb[44].mxu1 %vm3466_vm11, %v14538_v43 }
 0x2cc   : > { %11592 = vmatprep.mubr.msk.f32.mxu1 %vm3466_vm11, %v14591_v31 }
 0x2cf   : > { %11593 = vmatmul.mubr.msk.f32.gmra.mrb[46].mxu1 %vm3466_vm11, %v14562_v28 }
 0x2d0   : > { %11595 = vmatprep.mubr.msk.f32.mxu1 %vm3466_vm11, %v14627_v33 }
 0x2d3   : > { %11596 = vmatmul.mubr.msk.f32.gmra.mrb[48].mxu1 %vm3466_vm11, %v14596_v25 }
 0x2d4   : > { %11598 = vmatprep.mubr.msk.f32.mxu1 %vm3466_vm11, %v14644_v36 }
 0x2d7   : > { %11599 = vmatmul.mubr.msk.f32.gmra.mrb[50].mxu1 %vm3466_vm11, %v14622_v32 }
 0x2d8   : > { %11601 = vmatprep.mubr.msk.f32.mxu1 %vm3466_vm11, %v14688_v10 }
 0x2db   : > { %11602 = vmatmul.mubr.msk.f32.gmra.mrb[52].mxu1 %vm3466_vm11, %v14659_v1 }
 0x2dc   : > { %11604 = vmatprep.mubr.msk.f32.mxu1 %vm3466_vm11, %v14705_v9 }
 0x2df   : > { %11605 = vmatmul.mubr.msk.f32.gmra.mrb[54].mxu1 %vm3466_vm11, %v14676_v60 }
 0x2e0   : > { %11607 = vmatprep.mubr.msk.f32.mxu1 %vm3466_vm11, %v14737_v38 }
 0x2e3   : > { %11608 = vmatmul.mubr.msk.f32.gmra.mrb[56].mxu1 %vm3466_vm11, %v14710_v56 }
 0x2e4   : > { %11610 = vmatprep.mubr.msk.f32.mxu1 %vm3466_vm11, %v14756_v2 }
 0x2e7   : > { %11611 = vmatmul.mubr.msk.f32.gmra.mrb[58].mxu1 %vm3466_vm11, %v14726_v45 }
 0x2e8   : > { %11613 = vmatprep.mubr.msk.f32.mxu1 %vm3466_vm11, %v14778_v37 }
 0x2eb   : > { %11614 = vmatmul.mubr.msk.f32.gmra.mrb[60].mxu1 %vm3466_vm11, %v14748_v3 }
 0x2ec   : > { %11616 = vmatprep.mubr.msk.f32.mxu1 %vm3466_vm11, %v15171_v63 }
 0x2ef   : > { %11617 = vmatmul.mubr.msk.f32.gmra.mrb[62].mxu1 %vm3466_vm11, %v14842_v39 }
 0x2f0   : > { %11621 = vmatprep.mubr.msk.f32.mxu1 %vm3466_vm11, %v17059_v59  ;;  %v17068_v59 = vld [vmem:[#allocation12_spill] sm:$0xff] }
 0x2f3   : > { %11622 = vmatmul.mubr.msk.f32.vlgmr.msra.gmra.mrb[32].mxu1 %vm3466_vm11, %v17060_v23  ;;  %v17069_v23 = vld [vmem:[#allocation13_spill] sm:$0xff] }
 0x2f4   : > { %11670 = vmatpush3.msra.mxu1 %v9643_v21  ;;  %11624 = vmatprep.mubr.msk.f32.mxu1 %vm3466_vm11, %v17061_v6  ;;  %v17067_v21 = vld [vmem:[#allocation11_spill] sm:$0xff] }
 0x2f5   : > { %11719 = vmatprep.subr.mxu1 %v9676_v40 }
 0x2f7   : > { %11625 = vmatmul.mubr.msk.f32.gmra.mrb[34].mxu1 %vm3466_vm11, %v17062_v52  ;;  %v17070_v52 = vld [vmem:[#allocation15_spill] sm:$0xff] }
 0x2f8   : > { %11627 = vmatprep.mubr.msk.f32.mxu1 %vm3466_vm11, %v17063_v61  ;;  %v17071_v61 = vld [vmem:[#allocation42_spill] sm:$0xff] }
 0x2fb   : > { %11628 = vmatmul.mubr.msk.f32.gmra.mrb[36].mxu1 %vm3466_vm11, %v17064_v17  ;;  %v17072_v17 = vld [vmem:[#allocation16_spill] sm:$0xff] }
 0x2fc   : > { %11630 = vmatprep.mubr.msk.f32.mxu1 %vm3466_vm11, %v17065_v16  ;;  %v17073_v16 = vld [vmem:[#allocation44_spill] sm:$0xff] }
 0x2ff   : > { %11631 = vmatmul.mubr.msk.f32.gmra.mrb[38].mxu1 %vm3466_vm11, %v17066_v57  ;;  %v17074_v57 = vld [vmem:[#allocation18_spill] sm:$0xff] }
 0x300   : > { %11633 = vmatprep.mubr.msk.f32.mxu1 %vm3466_vm11, %v17067_v21  ;;  %v17075_v21 = vld [vmem:[#allocation20_spill] sm:$0xff] }
 0x303   : > { %11634 = vmatmul.mubr.msk.f32.gmra.mrb[40].mxu1 %vm3466_vm11, %v17068_v59  ;;  %v17076_v59 = vld [vmem:[#allocation21_spill] sm:$0xff] }
 0x304   : > { %11636 = vmatprep.mubr.msk.f32.mxu1 %vm3466_vm11, %v17069_v23  ;;  %v17077_v23 = vld [vmem:[#allocation23_spill] sm:$0xff] }
 0x307   : > { %11637 = vmatmul.mubr.msk.f32.gmra.mrb[42].mxu1 %vm3466_vm11, %v17070_v52  ;;  %v17078_v52 = vld [vmem:[#allocation24_spill] sm:$0xff] }
 0x308   : > { %11639 = vmatprep.mubr.msk.f32.mxu1 %vm3466_vm11, %v17071_v61  ;;  %v17079_v61 = vld [vmem:[#allocation7_spill] sm:$0xff] }
 0x30b   : > { %11640 = vmatmul.mubr.msk.f32.gmra.mrb[44].mxu1 %vm3466_vm11, %v17072_v17 }
 0x30c   : > { %11642 = vmatprep.mubr.msk.f32.mxu1 %vm3466_vm11, %v17073_v16 }
 0x30f   : > { %11643 = vmatmul.mubr.msk.f32.gmra.mrb[46].mxu1 %vm3466_vm11, %v17074_v57 }
 0x310   : > { %11645 = vmatprep.mubr.msk.f32.mxu1 %vm3466_vm11, %v17075_v21 }
 0x313   : > { %11646 = vmatmul.mubr.msk.f32.gmra.mrb[48].mxu1 %vm3466_vm11, %v17076_v59 }
 0x314   : > { %11648 = vmatprep.mubr.msk.f32.mxu1 %vm3466_vm11, %v17077_v23  ;;  %v3309_v23 = vrot.slane %v14819_v11, 6 }
 0x317   : > { %11649 = vmatmul.mubr.msk.f32.gmra.mrb[50].mxu1 %vm3466_vm11, %v17078_v52 }
 0x318   : > { %11651 = vmatprep.mubr.msk.f32.mxu1 %vm3466_vm11, %v17079_v61 }
 0x31b   : > { %11652 = vmatmul.mubr.msk.f32.gmra.mrb[52].mxu1 %vm3466_vm11, %v14740_v27  ;;  %v4696_v27 = vrot.slane %v15171_v63, 1 }
 0x31c   : > { %11654 = vmatprep.mubr.msk.f32.mxu1 %vm3466_vm11, %v14753_v19  ;;  %v4697_v19 = vrot.slane %v14842_v39, 1 }
 0x31f   : > { %11655 = vmatmul.mubr.msk.f32.gmra.mrb[54].mxu1 %vm3466_vm11, %v14767_v54  ;;  %v17080_v54 = vrot.slane %v14819_v11, 7  ;;  %v17084_v11 = vld [vmem:[#allocation40_spill] sm:$0xff] }
 0x320   : > { %11657 = vmatprep.mubr.msk.f32.mxu1 %vm3466_vm11, %v14772_v7 }
 0x321   : > { %v3357_v61 = vsel %vm260_vm1, %v17080_v54, %v3309_v23  ;;  %v9709_v54 = vld [vmem:[%s16649_s2 + $0x38] sm:$0xff]  ;;  %v17088_v23 = vld [vmem:[#allocation46_spill] sm:$0xff] }
 0x322   : > { %v4699_v7 = vrot.slane %v3357_v61, 1 }
 0x323   : > { %11658 = vmatmul.mubr.msk.f32.gmra.mrb[56].mxu1 %vm3466_vm11, %v14786_v41 }
 0x324   : > { %11660 = vmatprep.mubr.msk.f32.mxu1 %vm3466_vm11, %v14792_v58  ;;  %v15247_v58 = vsel %vm436_vm2, %v4696_v27, %v4697_v19  ;;  %v17081_v27 = vld [vmem:[#allocation35_spill] sm:$0xff] }
 0x327   : > { %11661 = vmatmul.mubr.msk.f32.gmra.mrb[58].mxu1 %vm3466_vm11, %v14802_v42  ;;  %v15252_v42 = vsel %vm436_vm2, %v4697_v19, %v4699_v7  ;;  %v17082_v19 = vld [vmem:[#allocation36_spill] sm:$0xff]  ;;  %v17083_v7 = vld [vmem:[#allocation39_spill] sm:$0xff] }
 0x328   : > { %11663 = vmatprep.mubr.msk.f32.mxu1 %vm3466_vm11, %v14808_v13 }
 0x32b   : > { %11664 = vmatmul.mubr.msk.f32.gmra.mrb[60].mxu1 %vm3466_vm11, %v14813_v22 }
 0x32c   : > { %11666 = vmatprep.mubr.msk.f32.mxu1 %vm3466_vm11, %v15247_v58 }
 0x32f   : > { %11667 = vmatmul.mubr.msk.f32.gmra.mrb[62].mxu1 %vm3466_vm11, %v15252_v42 }
 0x330   : > { %11671 = vmatprep.mubr.msk.f32.mxu1 %vm3466_vm11, %v14902_v18  ;;  %v17085_v18 = vld [vmem:[#allocation41_spill] sm:$0xff] }
 0x333   : > { %11672 = vmatmul.mubr.msk.f32.vlgmr.msra.gmra.mrb[32].mxu1 %vm3466_vm11, %v14907_v20  ;;  %v17086_v20 = vld [vmem:[#allocation45_spill] sm:$0xff] }
 0x334   : > { %11720 = vmatpush3.msra.mxu1 %v9676_v40  ;;  %11674 = vmatprep.mubr.msk.f32.mxu1 %vm3466_vm11, %v14925_v48  ;;  %v17087_v40 = vld [vmem:[#allocation37_spill] sm:$0xff] }
 0x335   : > { %11769 = vmatprep.subr.mxu1 %v9709_v54 }
 0x337   : > { %11675 = vmatmul.mubr.msk.f32.gmra.mrb[34].mxu1 %vm3466_vm11, %v14932_v29 }
 0x338   : > { %11677 = vmatprep.mubr.msk.f32.mxu1 %vm3466_vm11, %v17081_v27  ;;  %v17089_v27 = vld [vmem:[#allocation38_spill] sm:$0xff] }
 0x33b   : > { %11678 = vmatmul.mubr.msk.f32.gmra.mrb[36].mxu1 %vm3466_vm11, %v17082_v19  ;;  %v17090_v19 = vld [vmem:[#allocation47_spill] sm:$0xff] }
 0x33c   : > { %11680 = vmatprep.mubr.msk.f32.mxu1 %vm3466_vm11, %v17083_v7  ;;  %v17091_v7 = vld [vmem:[#allocation48_spill] sm:$0xff] }
 0x33f   : > { %11681 = vmatmul.mubr.msk.f32.gmra.mrb[38].mxu1 %vm3466_vm11, %v17084_v11 }
 0x340   : > { %11683 = vmatprep.mubr.msk.f32.mxu1 %vm3466_vm11, %v17085_v18  ;;  %v17092_v18 = vld [vmem:[#allocation49_spill] sm:$0xff] }
 0x343   : > { %11684 = vmatmul.mubr.msk.f32.gmra.mrb[40].mxu1 %vm3466_vm11, %v17086_v20 }
 0x344   : > { %11686 = vmatprep.mubr.msk.f32.mxu1 %vm3466_vm11, %v17087_v40  ;;  %v17093_v40 = vld [vmem:[#allocation50_spill] sm:$0xff] }
 0x347   : > { %11687 = vmatmul.mubr.msk.f32.gmra.mrb[42].mxu1 %vm3466_vm11, %v17088_v23 }
 0x348   : > { %11689 = vmatprep.mubr.msk.f32.mxu1 %vm3466_vm11, %v17089_v27  ;;  %v17094_v27 = vld [vmem:[#allocation30_spill] sm:$0xff] }
 0x34b   : > { %11690 = vmatmul.mubr.msk.f32.gmra.mrb[44].mxu1 %vm3466_vm11, %v17090_v19 }
 0x34c   : > { %11692 = vmatprep.mubr.msk.f32.mxu1 %vm3466_vm11, %v17091_v7  ;;  %v17095_v7 = vld [vmem:[#allocation14_spill] sm:$0xff] }
 0x34f   : > { %11693 = vmatmul.mubr.msk.f32.gmra.mrb[46].mxu1 %vm3466_vm11, %v15010_v47 }
 0x350   : > { %11695 = vmatprep.mubr.msk.f32.mxu1 %vm3466_vm11, %v17092_v18  ;;  %v17096_v18 = vld [vmem:[#allocation17_spill] sm:$0xff] }
 0x353   : > { %11696 = vmatmul.mubr.msk.f32.gmra.mrb[48].mxu1 %vm3466_vm11, %v15023_v35 }
 0x354   : > { %11698 = vmatprep.mubr.msk.f32.mxu1 %vm3466_vm11, %v17093_v40 }
 0x357   : > { %11699 = vmatmul.mubr.msk.f32.gmra.mrb[50].mxu1 %vm3466_vm11, %v15036_v50 }
 0x358   : > { %11701 = vmatprep.mubr.msk.f32.mxu1 %vm3466_vm11, %v17094_v27  ;;  %v4965_v27 = vrot.slane %v14842_v39, 2 }
 0x35b   : > { %11702 = vmatmul.mubr.msk.f32.gmra.mrb[52].mxu1 %vm3466_vm11, %v15049_v8  ;;  %v4964_v8 = vrot.slane %v15171_v63, 2 }
 0x35c   : > { %11704 = vmatprep.mubr.msk.f32.mxu1 %vm3466_vm11, %v17095_v7 }
 0x35f   : > { %11705 = vmatmul.mubr.msk.f32.gmra.mrb[54].mxu1 %vm3466_vm11, %v15062_v46  ;;  %v4967_v46 = vrot.slane %v3357_v61, 2  ;;  %v9742_v61 = vld [vmem:[%s16649_s2 + $0x40] sm:$0xff] }
 0x360   : > { %11707 = vmatprep.mubr.msk.f32.mxu1 %vm3466_vm11, %v17096_v18  ;;  %v15322_v18 = vsel %vm1092_vm4, %v4964_v8, %v4965_v27 }
 0x363   : > { %11708 = vmatmul.mubr.msk.f32.gmra.mrb[56].mxu1 %vm3466_vm11, %v15075_v55 }
 0x364   : > { %11710 = vmatprep.mubr.msk.f32.mxu1 %vm3466_vm11, %v15081_v0  ;;  %v15327_v0 = vsel %vm1092_vm4, %v4965_v27, %v4967_v46 }
 0x367   : > { %11711 = vmatmul.mubr.msk.f32.gmra.mrb[58].mxu1 %vm3466_vm11, %v15088_v53 }
 0x368   : > { %11713 = vmatprep.mubr.msk.f32.mxu1 %vm3466_vm11, %v15094_v44 }
 0x36b   : > { %11714 = vmatmul.mubr.msk.f32.gmra.mrb[60].mxu1 %vm3466_vm11, %v15099_v49 }
 0x36c   : > { %11716 = vmatprep.mubr.msk.f32.mxu1 %vm3466_vm11, %v15322_v18 }
 0x36f   : > { %11717 = vmatmul.mubr.msk.f32.gmra.mrb[62].mxu1 %vm3466_vm11, %v15327_v0 }
 0x370   : > { %11721 = vmatprep.mubr.msk.f32.mxu1 %vm3466_vm11, %v14420_v62  ;;  %v17097_v62 = vld [vmem:[#allocation27_spill] sm:$0xff] }
 0x373   : > { %11722 = vmatmul.mubr.msk.f32.vlgmr.msra.gmra.mrb[32].mxu1 %vm3466_vm11, %v14416_v34  ;;  %v9775_v34 = vld [vmem:[%s16650_s3 + $0x8] sm:$0xff] }
 0x374   : > { %11770 = vmatpush3.msra.mxu1 %v9709_v54  ;;  %11724 = vmatprep.mubr.msk.f32.mxu1 %vm3466_vm11, %v14448_v12  ;;  %v17100_v12 = vld [vmem:[#allocation8_spill] sm:$0xff] }
 0x375   : > { %11819 = vmatprep.subr.mxu1 %v9742_v61  ;;  %11869 = vmatprep.subr.mxu0 %v9775_v34 }
 0x376   : > { %11870 = vmatpush3.msra.mxu0 %v9775_v34 }
 0x377   : > { %11725 = vmatmul.mubr.msk.f32.gmra.mrb[34].mxu1 %vm3466_vm11, %v14432_v5  ;;  %v17099_v5 = vld [vmem:[#allocation33_spill] sm:$0xff] }
 0x378   : > { %11727 = vmatprep.mubr.msk.f32.mxu1 %vm3466_vm11, %v14468_v14  ;;  %v17102_v14 = vld [vmem:[#allocation11_spill] sm:$0xff] }
 0x37b   : > { %11728 = vmatmul.mubr.msk.f32.gmra.mrb[36].mxu1 %vm3466_vm11, %v14457_v4  ;;  %v17101_v4 = vld [vmem:[#allocation9_spill] sm:$0xff] }
 0x37c   : > { %11730 = vmatprep.mubr.msk.f32.mxu1 %vm3466_vm11, %v14502_v30  ;;  %v17104_v30 = vld [vmem:[#allocation13_spill] sm:$0xff] }
 0x37f   : > { %11731 = vmatmul.mubr.msk.f32.gmra.mrb[38].mxu1 %vm3466_vm11, %v14484_v26  ;;  %v17103_v26 = vld [vmem:[#allocation12_spill] sm:$0xff] }
 0x380   : > { %11733 = vmatprep.mubr.msk.f32.mxu1 %vm3466_vm11, %v14533_v15  ;;  %v17106_v15 = vld [vmem:[#allocation42_spill] sm:$0xff] }
 0x383   : > { %11734 = vmatmul.mubr.msk.f32.gmra.mrb[40].mxu1 %vm3466_vm11, %v14507_v51  ;;  %v17105_v51 = vld [vmem:[#allocation15_spill] sm:$0xff] }
 0x384   : > { %11736 = vmatprep.mubr.msk.f32.mxu1 %vm3466_vm11, %v14568_v24  ;;  %v17109_v24 = vld [vmem:[#allocation26_spill] sm:$0xff] }
 0x387   : > { %11737 = vmatmul.mubr.msk.f32.gmra.mrb[42].mxu1 %vm3466_vm11, %v14538_v43  ;;  %v17107_v43 = vld [vmem:[#allocation23_spill] sm:$0xff] }
 0x388   : > { %11739 = vmatprep.mubr.msk.f32.mxu1 %vm3466_vm11, %v14591_v31  ;;  %v17110_v31 = vld [vmem:[#allocation6_spill] sm:$0xff] }
 0x38b   : > { %11740 = vmatmul.mubr.msk.f32.gmra.mrb[44].mxu1 %vm3466_vm11, %v14562_v28  ;;  %v17108_v28 = vld [vmem:[#allocation7_spill] sm:$0xff] }
 0x38c   : > { %11742 = vmatprep.mubr.msk.f32.mxu1 %vm3466_vm11, %v14627_v33  ;;  %v17113_v33 = vld [vmem:[#allocation32_spill] sm:$0xff] }
 0x38f   : > { %11743 = vmatmul.mubr.msk.f32.gmra.mrb[46].mxu1 %vm3466_vm11, %v14596_v25  ;;  %v17111_v25 = vld [vmem:[#allocation29_spill] sm:$0xff] }
 0x390   : > { %11745 = vmatprep.mubr.msk.f32.mxu1 %vm3466_vm11, %v14644_v36  ;;  %v17114_v36 = vld [vmem:[#allocation34_spill] sm:$0xff] }
 0x393   : > { %11746 = vmatmul.mubr.msk.f32.gmra.mrb[48].mxu1 %vm3466_vm11, %v14622_v32  ;;  %v17112_v32 = vld [vmem:[#allocation31_spill] sm:$0xff] }
 0x394   : > { %11748 = vmatprep.mubr.msk.f32.mxu1 %vm3466_vm11, %v14688_v10  ;;  %v17116_v10 = vld [vmem:[#allocation36_spill] sm:$0xff] }
 0x397   : > { %11749 = vmatmul.mubr.msk.f32.gmra.mrb[50].mxu1 %vm3466_vm11, %v14659_v1  ;;  %v17115_v1 = vld [vmem:[#allocation35_spill] sm:$0xff] }
 0x398   : > { %11751 = vmatprep.mubr.msk.f32.mxu1 %vm3466_vm11, %v14705_v9  ;;  %v17117_v9 = vld [vmem:[#allocation39_spill] sm:$0xff] }
 0x39b   : > { %11752 = vmatmul.mubr.msk.f32.gmra.mrb[52].mxu1 %vm3466_vm11, %v14676_v60  ;;  %v17098_v60 = vld [vmem:[#allocation28_spill] sm:$0xff] }
 0x39c   : > { %11754 = vmatprep.mubr.msk.f32.mxu1 %vm3466_vm11, %v14737_v38  ;;  %v17119_v38 = vld [vmem:[#allocation37_spill] sm:$0xff] }
 0x39f   : > { %11755 = vmatmul.mubr.msk.f32.gmra.mrb[54].mxu1 %vm3466_vm11, %v14710_v56  ;;  %v17118_v56 = vld [vmem:[#allocation41_spill] sm:$0xff] }
 0x3a0   : > { %11757 = vmatprep.mubr.msk.f32.mxu1 %vm3466_vm11, %v14756_v2  ;;  %v17122_v2 = vld [vmem:[#allocation49_spill] sm:$0xff] }
 0x3a3   : > { %11758 = vmatmul.mubr.msk.f32.gmra.mrb[56].mxu1 %vm3466_vm11, %v14726_v45  ;;  %v17120_v45 = vld [vmem:[#allocation38_spill] sm:$0xff] }
 0x3a4   : > { %11760 = vmatprep.mubr.msk.f32.mxu1 %vm3466_vm11, %v14778_v37  ;;  %v17123_v37 = vld [vmem:[#allocation30_spill] sm:$0xff] }
 0x3a7   : > { %11761 = vmatmul.mubr.msk.f32.gmra.mrb[58].mxu1 %vm3466_vm11, %v14748_v3  ;;  %v17121_v3 = vld [vmem:[#allocation48_spill] sm:$0xff] }
 0x3a8   : > { %11763 = vmatprep.mubr.msk.f32.mxu1 %vm3466_vm11, %v15171_v63 }
 0x3ab   : > { %11764 = vmatmul.mubr.msk.f32.gmra.mrb[60].mxu1 %vm3466_vm11, %v14842_v39 }
 0x3ac   : > { %11766 = vmatprep.mubr.msk.f32.mxu1 %vm3466_vm11, %v15171_v63 }
 0x3af   : > { %11767 = vmatmul.mubr.msk.f32.gmra.mrb[62].mxu1 %vm3466_vm11, %v14842_v39 }
 0x3b0   : > { %11771 = vmatprep.mubr.msk.f32.mxu1 %vm3466_vm11, %v17061_v6 }
 0x3b3   : > { %11772 = vmatmul.mubr.msk.f32.vlgmr.msra.gmra.mrb[32].mxu1 %vm3466_vm11, %v17097_v62 }
 0x3b4   : > { %11820 = vmatpush3.msra.mxu1 %v9742_v61  ;;  %11774 = vmatprep.mubr.msk.f32.mxu1 %vm3466_vm11, %v17098_v60  ;;  %v15564_v60 = vld [vmem:[%s16650_s3 + $0x10] sm:$0xff] }
 0x3b7   : > { %11775 = vmatmul.mubr.msk.f32.gmra.mrb[34].mxu1 %vm3466_vm11, %v17099_v5 }
 0x3b8   : > { %11777 = vmatprep.mubr.msk.f32.mxu1 %vm3466_vm11, %v17100_v12 }
 0x3bb   : > { %11778 = vmatmul.mubr.msk.f32.gmra.mrb[36].mxu1 %vm3466_vm11, %v17101_v4 }
 0x3bc   : > { %11780 = vmatprep.mubr.msk.f32.mxu1 %vm3466_vm11, %v17102_v14 }
 0x3bf   : > { %11781 = vmatmul.mubr.msk.f32.gmra.mrb[38].mxu1 %vm3466_vm11, %v17103_v26 }
 0x3c0   : > { %11783 = vmatprep.mubr.msk.f32.mxu1 %vm3466_vm11, %v17104_v30 }
 0x3c3   : > { %11784 = vmatmul.mubr.msk.f32.gmra.mrb[40].mxu1 %vm3466_vm11, %v17105_v51 }
 0x3c4   : > { %11786 = vmatprep.mubr.msk.f32.mxu1 %vm3466_vm11, %v17106_v15 }
 0x3c7   : > { %11787 = vmatmul.mubr.msk.f32.gmra.mrb[42].mxu1 %vm3466_vm11, %v17072_v17 }
 0x3c8   : > { %11789 = vmatprep.mubr.msk.f32.mxu1 %vm3466_vm11, %v17073_v16 }
 0x3cb   : > { %11790 = vmatmul.mubr.msk.f32.gmra.mrb[44].mxu1 %vm3466_vm11, %v17074_v57 }
 0x3cc   : > { %11792 = vmatprep.mubr.msk.f32.mxu1 %vm3466_vm11, %v17075_v21 }
 0x3cf   : > { %11793 = vmatmul.mubr.msk.f32.gmra.mrb[46].mxu1 %vm3466_vm11, %v17076_v59 }
 0x3d0   : > { %11795 = vmatprep.mubr.msk.f32.mxu1 %vm3466_vm11, %v17107_v43 }
 0x3d3   : > { %11796 = vmatmul.mubr.msk.f32.gmra.mrb[48].mxu1 %vm3466_vm11, %v17078_v52 }
 0x3d4   : > { %11798 = vmatprep.mubr.msk.f32.mxu1 %vm3466_vm11, %v17108_v28 }
 0x3d7   : > { %11799 = vmatmul.mubr.msk.f32.gmra.mrb[50].mxu1 %vm3466_vm11, %v17109_v24 }
 0x3d8   : > { %11801 = vmatprep.mubr.msk.f32.mxu1 %vm3466_vm11, %v17110_v31 }
 0x3db   : > { %11802 = vmatmul.mubr.msk.f32.gmra.mrb[52].mxu1 %vm3466_vm11, %v17111_v25 }
 0x3dc   : > { %11804 = vmatprep.mubr.msk.f32.mxu1 %vm3466_vm11, %v17112_v32 }
 0x3df   : > { %11805 = vmatmul.mubr.msk.f32.gmra.mrb[54].mxu1 %vm3466_vm11, %v14786_v41  ;;  %v17124_v41 = vld [vmem:[#allocation10_spill] sm:$0xff] }
 0x3e0   : > { %11807 = vmatprep.mubr.msk.f32.mxu1 %vm3466_vm11, %v17113_v33 }
 0x3e3   : > { %11808 = vmatmul.mubr.msk.f32.gmra.mrb[56].mxu1 %vm3466_vm11, %v17114_v36 }
 0x3e4   : > { %11810 = vmatprep.mubr.msk.f32.mxu1 %vm3466_vm11, %v14808_v13  ;;  %v17127_v13 = vld [vmem:[#allocation19_spill] sm:$0xff] }
 0x3e7   : > { %11811 = vmatmul.mubr.msk.f32.gmra.mrb[58].mxu1 %vm3466_vm11, %v14813_v22  ;;  %v6281_v22 = vld [vmem:[%s16650_s3] sm:$0xff] }
 0x3e8   : > { %11813 = vmatprep.mubr.msk.f32.mxu1 %vm3466_vm11, %v15247_v58  ;;  %11919 = vmatprep.subr.mxu0 %v6281_v22 }
 0x3eb   : > { %11814 = vmatmul.mubr.msk.f32.gmra.mrb[60].mxu1 %vm3466_vm11, %v15252_v42 }
 0x3ec   : > { %11816 = vmatprep.mubr.msk.f32.mxu1 %vm3466_vm11, %v15247_v58  ;;  %v17125_v58 = vld [vmem:[#allocation43_spill] sm:$0xff] }
 0x3ef   : > { %11817 = vmatmul.mubr.msk.f32.gmra.mrb[62].mxu1 %vm3466_vm11, %v15252_v42  ;;  %v17126_v42 = vld [vmem:[#allocation17_spill] sm:$0xff] }
 0x3f0   : > { %11821 = vmatprep.mubr.msk.f32.mxu1 %vm3466_vm11, %v14925_v48 }
 0x3f3   : > { %11822 = vmatmul.mubr.msk.f32.vlgmr.msra.gmra.mrb[32].mxu1 %vm3466_vm11, %v14932_v29 }
 0x3f4   : > { %11824 = vmatprep.mubr.msk.f32.mxu1 %vm3466_vm11, %v17115_v1 }
 0x3f7   : > { %11825 = vmatmul.mubr.msk.f32.gmra.mrb[34].mxu1 %vm3466_vm11, %v17116_v10 }
 0x3f8   : > { %11827 = vmatprep.mubr.msk.f32.mxu1 %vm3466_vm11, %v17117_v9 }
 0x3fb   : > { %11828 = vmatmul.mubr.msk.f32.gmra.mrb[36].mxu1 %vm3466_vm11, %v17084_v11 }
 0x3fc   : > { %11830 = vmatprep.mubr.msk.f32.mxu1 %vm3466_vm11, %v17118_v56 }
 0x3ff   : > { %11831 = vmatmul.mubr.msk.f32.gmra.mrb[38].mxu1 %vm3466_vm11, %v17086_v20 }
 0x400   : > { %11833 = vmatprep.mubr.msk.f32.mxu1 %vm3466_vm11, %v17119_v38 }
 0x403   : > { %11834 = vmatmul.mubr.msk.f32.gmra.mrb[40].mxu1 %vm3466_vm11, %v17088_v23 }
 0x404   : > { %11836 = vmatprep.mubr.msk.f32.mxu1 %vm3466_vm11, %v17120_v45 }
 0x407   : > { %11837 = vmatmul.mubr.msk.f32.gmra.mrb[42].mxu1 %vm3466_vm11, %v17090_v19 }
 0x408   : > { %11839 = vmatprep.mubr.msk.f32.mxu1 %vm3466_vm11, %v17121_v3 }
 0x40b   : > { %11840 = vmatmul.mubr.msk.f32.gmra.mrb[44].mxu1 %vm3466_vm11, %v15010_v47 }
 0x40c   : > { %11842 = vmatprep.mubr.msk.f32.mxu1 %vm3466_vm11, %v17122_v2 }
 0x40f   : > { %11843 = vmatmul.mubr.msk.f32.gmra.mrb[46].mxu1 %vm3466_vm11, %v15023_v35 }
 0x410   : > { %11845 = vmatprep.mubr.msk.f32.mxu1 %vm3466_vm11, %v17093_v40 }
 0x413   : > { %11846 = vmatmul.mubr.msk.f32.gmra.mrb[48].mxu1 %vm3466_vm11, %v15036_v50 }
 0x414   : > { %11848 = vmatprep.mubr.msk.f32.mxu1 %vm3466_vm11, %v17123_v37 }
 0x417   : > { %11849 = vmatmul.mubr.msk.f32.gmra.mrb[50].mxu1 %vm3466_vm11, %v17124_v41 }
 0x418   : > { %11851 = vmatprep.mubr.msk.f32.mxu1 %vm3466_vm11, %v17095_v7 }
 0x41b   : > { %11852 = vmatmul.mubr.msk.f32.gmra.mrb[52].mxu1 %vm3466_vm11, %v17125_v58 }
 0x41c   : > { %11854 = vmatprep.mubr.msk.f32.mxu1 %vm3466_vm11, %v17126_v42 }
 0x41f   : > { %11855 = vmatmul.mubr.msk.f32.gmra.mrb[54].mxu1 %vm3466_vm11, %v15075_v55 }
 0x420   : > { %11857 = vmatprep.mubr.msk.f32.mxu1 %vm3466_vm11, %v17127_v13 }
 0x423   : > { %11858 = vmatmul.mubr.msk.f32.gmra.mrb[56].mxu1 %vm3466_vm11, %v15088_v53 }
 0x424   : > { %11860 = vmatprep.mubr.msk.f32.mxu1 %vm3466_vm11, %v15094_v44 }
 0x427   : > { %11861 = vmatmul.mubr.msk.f32.gmra.mrb[58].mxu1 %vm3466_vm11, %v15099_v49 }
 0x428   : > { %11863 = vmatprep.mubr.msk.f32.mxu1 %vm3466_vm11, %v15322_v18 }
 0x42b   : > { %11864 = vmatmul.mubr.msk.f32.gmra.mrb[60].mxu1 %vm3466_vm11, %v15327_v0 }
 0x42c   : > { %11866 = vmatprep.mubr.msk.f32.mxu1 %vm3466_vm11, %v15322_v18 }
 0x42f   : > { %11867 = vmatmul.mubr.msk.f32.gmra.mrb[62].mxu1 %vm3466_vm11, %v15327_v0 }
 0x4c6   : > { %v11823_v39 = vpop.f32.mrb[32].mxu1 }
 0x4c7   : > { %vm6010_vm14 = vcmp.ge.f32.partialorder %v11823_v39, 0.0  ;;  %v6042_v48 = vmul.f32 0.01, %v11823_v39  ;;  %v5818_v29 = vpop.f32.mrb[33].mxu1 }
 0x4c8   : > { %vm6009_vm15 = vcmp.ge.f32.partialorder %v5818_v29, 0.0  ;;  %v6041_v47 = vmul.f32 0.01, %v5818_v29 }
 0x4c9   : > { %v6074_v35 = vsel %vm6010_vm14, %v11823_v39, %v6042_v48 }
 0x4ca   : > { %v6138_v50 = vrot.slane %v6074_v35, 7  ;;  %v6217_v8 = vrot.slane %v6074_v35, 6  ;;  %v6073_v46 = vsel %vm6009_vm15, %v5818_v29, %v6041_v47  ;;  %v11826_v55 = vpop.f32.mrb[34].mxu1 }
 0x4cb   : > { %v6137_v53 = vrot.slane %v6073_v46, 7  ;;  %vm6012_vm0 = vcmp.ge.f32.partialorder %v11826_v55, 0.0  ;;  %v6044_v44 = vmul.f32 0.01, %v11826_v55  ;;  %v5828_v0 = vpop.f32.mrb[35].mxu1 }
 0x4cc   : > { %v15533_v49 = vsel %vm260_vm1, %v6138_v50, %v6217_v8  ;;  %vm6011_vm3 = vcmp.ge.f32.partialorder %v5828_v0, 0.0  ;;  %v6043_v63 = vmul.f32 0.01, %v5828_v0 }
 0x4cd   : > { %v6315_v6 = vrot.slane %v15533_v49, 1  ;;  %v15537_v52 = vsel %vm260_vm1, %v6137_v53, %v6138_v50  ;;  %v15540_v17 = vsel %vm260_vm1, %v6073_v46, %v6137_v53  ;;  %v6076_v16 = vsel %vm6012_vm0, %v11826_v55, %v6044_v44 }
 0x4ce   : > { %v6075_v57 = vsel %vm6011_vm3, %v5828_v0, %v6043_v63  ;;  %v11829_v21 = vpop.f32.mrb[36].mxu1  ;;  %v6312_v59 = vrot.slane %v15540_v17, 1  ;;  %v6313_v54 = vrot.slane %v15537_v52, 1  ;;  %v6141_v27 = vrot.slane %v6076_v16, 7 }
 0x4cf   : > { %v6218_v19 = vrot.slane %v6076_v16, 6  ;;  %v6140_v7 = vrot.slane %v6075_v57, 7  ;;  %vm6014_vm5 = vcmp.ge.f32.partialorder %v11829_v21, 0.0  ;;  %v5838_v11 = vpop.f32.mrb[37].mxu1  ;;  %v6046_v18 = vmul.f32 0.01, %v11829_v21 }
 0x4d0   : > { %vm6013_vm6 = vcmp.ge.f32.partialorder %v5838_v11, 0.0  ;;  %v6045_v20 = vmul.f32 0.01, %v5838_v11  ;;  %v15545_v40 = vsel %vm436_vm2, %v6312_v59, %v6313_v54  ;;  %v15556_v34 = vsel %vm436_vm2, %v6313_v54, %v6315_v6 }
 0x4d1   : > { %17128 = vst [vmem:[#allocation5_spill] sm:$0xff] %v15545_v40  ;;  %v15548_v23 = vsel %vm260_vm1, %v6140_v7, %v6141_v27  ;;  %v15551_v61 = vsel %vm260_vm1, %v6075_v57, %v6140_v7  ;;  %11871 = vmatprep.mubr.msk.f32.mxu0 %vm3466_vm11, %v15545_v40  ;;  %17129 = vst [vmem:[#allocation22_spill] sm:$0xff] %v15556_v34  ;;  %v15559_v62 = vsel %vm260_vm1, %v6141_v27, %v6218_v19 }
 0x4d2   : > { %v6078_v5 = vsel %vm6014_vm5, %v11829_v21, %v6046_v18  ;;  %v6077_v12 = vsel %vm6013_vm6, %v5838_v11, %v6045_v20  ;;  %v11832_v4 = vpop.f32.mrb[38].mxu1  ;;  %11872 = vmatmul.mubr.msk.f32.vlgmr.msra.gmra.mrb[32].mxu0 %vm3466_vm11, %v15556_v34  ;;  %v6317_v14 = vrot.slane %v15551_v61, 1  ;;  %v6318_v26 = vrot.slane %v15548_v23, 1 }
 0x4d3   : > { %v6144_v30 = vrot.slane %v6078_v5, 7  ;;  %v6219_v51 = vrot.slane %v6078_v5, 6  ;;  %v6143_v15 = vrot.slane %v6077_v12, 7  ;;  %vm6016_vm7 = vcmp.ge.f32.partialorder %v11832_v4, 0.0  ;;  %11920 = vmatpush3.msra.mxu0 %v6281_v22  ;;  %v5848_v43 = vpop.f32.mrb[39].mxu1  ;;  %11874 = vmatprep.mubr.msk.f32.mxu0 %vm3466_vm11, %v15545_v40 }
 0x4d4   : > { %v6048_v28 = vmul.f32 0.01, %v11832_v4  ;;  %vm6015_vm8 = vcmp.ge.f32.partialorder %v5848_v43, 0.0  ;;  %v6047_v24 = vmul.f32 0.01, %v5848_v43  ;;  %v15573_v31 = vsel %vm436_vm2, %v6317_v14, %v6318_v26  ;;  %11969 = vmatprep.subr.mxu0 %v15564_v60 }
 0x4d5   : > { %17130 = vst [vmem:[#allocation25_spill] sm:$0xff] %v15573_v31  ;;  %v15577_v25 = vsel %vm260_vm1, %v6143_v15, %v6144_v30  ;;  %v15580_v32 = vsel %vm260_vm1, %v6077_v12, %v6143_v15  ;;  %v6320_v33 = vrot.slane %v15559_v62, 1  ;;  %v15584_v36 = vsel %vm260_vm1, %v6144_v30, %v6219_v51 }
 0x4d6   : > { %v6080_v1 = vsel %vm6016_vm7, %v11832_v4, %v6048_v28  ;;  %v6079_v10 = vsel %vm6015_vm8, %v5848_v43, %v6047_v24  ;;  %v11835_v9 = vpop.f32.mrb[40].mxu1  ;;  %11875 = vmatmul.mubr.msk.f32.gmra.mrb[34].mxu0 %vm3466_vm11, %v15556_v34  ;;  %v6322_v56 = vrot.slane %v15580_v32, 1  ;;  %v6323_v38 = vrot.slane %v15577_v25, 1 }
 0x4d7   : > { %v6147_v45 = vrot.slane %v6080_v1, 7  ;;  %v6220_v3 = vrot.slane %v6080_v1, 6  ;;  %v6146_v2 = vrot.slane %v6079_v10, 7  ;;  %vm6018_vm9 = vcmp.ge.f32.partialorder %v11835_v9, 0.0  ;;  %v5858_v37 = vpop.f32.mrb[41].mxu1  ;;  %11877 = vmatprep.mubr.msk.f32.mxu0 %vm3466_vm11, %v15573_v31 }
 0x4d8   : > { %v6050_v41 = vmul.f32 0.01, %v11835_v9  ;;  %vm6017_vm10 = vcmp.ge.f32.partialorder %v5858_v37, 0.0  ;;  %v6049_v58 = vmul.f32 0.01, %v5858_v37  ;;  %v15593_v42 = vsel %vm436_vm2, %v6318_v26, %v6320_v33 }
 0x4d9   : > { %17131 = vst [vmem:[#allocation16_spill] sm:$0xff] %v15593_v42  ;;  %v15596_v13 = vsel %vm260_vm1, %v6146_v2, %v6147_v45  ;;  %v15599_v22 = vsel %vm260_vm1, %v6079_v10, %v6146_v2  ;;  %v15602_v39 = vsel %vm436_vm2, %v6322_v56, %v6323_v38  ;;  %v6325_v48 = vrot.slane %v15584_v36, 1 }
 0x4da   : > { %17132 = vst [vmem:[#allocation44_spill] sm:$0xff] %v15602_v39  ;;  %v6082_v29 = vsel %vm6018_vm9, %v11835_v9, %v6050_v41  ;;  %v6081_v47 = vsel %vm6017_vm10, %v5858_v37, %v6049_v58  ;;  %v11838_v35 = vpop.f32.mrb[42].mxu1  ;;  %11878 = vmatmul.mubr.msk.f32.gmra.mrb[36].mxu0 %vm3466_vm11, %v15593_v42  ;;  %v6327_v50 = vrot.slane %v15599_v22, 1  ;;  %v6328_v8 = vrot.slane %v15596_v13, 1 }
 0x4db   : > { %v6150_v46 = vrot.slane %v6082_v29, 7  ;;  %v6149_v55 = vrot.slane %v6081_v47, 7  ;;  %vm6020_vm12 = vcmp.ge.f32.partialorder %v11838_v35, 0.0  ;;  %v5868_v53 = vpop.f32.mrb[43].mxu1  ;;  %11880 = vmatprep.mubr.msk.f32.mxu0 %vm3466_vm11, %v15602_v39  ;;  %v6221_v44 = vrot.slane %v6082_v29, 6 }
 0x4dc   : > { %v6052_v0 = vmul.f32 0.01, %v11838_v35  ;;  %vm6019_vm13 = vcmp.ge.f32.partialorder %v5868_v53, 0.0  ;;  %v6051_v63 = vmul.f32 0.01, %v5868_v53  ;;  %v15618_v57 = vsel %vm436_vm2, %v6323_v38, %v6325_v48 }
 0x4dd   : > { %v15612_v6 = vsel %vm260_vm1, %v6149_v55, %v6150_v46  ;;  %v15615_v16 = vsel %vm260_vm1, %v6081_v47, %v6149_v55  ;;  %17133 = vst [vmem:[#allocation18_spill] sm:$0xff] %v15618_v57  ;;  %v15621_v21 = vsel %vm260_vm1, %v6147_v45, %v6220_v3  ;;  %v15626_v19 = vsel %vm436_vm2, %v6327_v50, %v6328_v8 }
 0x4de   : > { %v6084_v59 = vsel %vm6020_vm12, %v11838_v35, %v6052_v0  ;;  %v6083_v54 = vsel %vm6019_vm13, %v5868_v53, %v6051_v63  ;;  %v11841_v27 = vpop.f32.mrb[44].mxu1  ;;  %11881 = vmatmul.mubr.msk.f32.gmra.mrb[38].mxu0 %vm3466_vm11, %v15618_v57  ;;  %17134 = vst [vmem:[#allocation20_spill] sm:$0xff] %v15626_v19  ;;  %v6330_v7 = vrot.slane %v15621_v21, 1  ;;  %v6332_v5 = vrot.slane %v15615_v16, 1 }
 0x4df   : > { %v6153_v11 = vrot.slane %v6084_v59, 7  ;;  %v6152_v18 = vrot.slane %v6083_v54, 7  ;;  %vm6022_vm14 = vcmp.ge.f32.partialorder %v11841_v27, 0.0  ;;  %v5878_v20 = vpop.f32.mrb[45].mxu1  ;;  %11883 = vmatprep.mubr.msk.f32.mxu0 %vm3466_vm11, %v15626_v19  ;;  %v6054_v12 = vmul.f32 0.01, %v11841_v27 }
 0x4e0   : > { %vm6021_vm15 = vcmp.ge.f32.partialorder %v5878_v20, 0.0  ;;  %v6053_v4 = vmul.f32 0.01, %v5878_v20  ;;  %v15633_v14 = vsel %vm436_vm2, %v6328_v8, %v6330_v7  ;;  %v6333_v51 = vrot.slane %v15612_v6, 1 }
 0x4e1   : > { %17135 = vst [vmem:[#allocation21_spill] sm:$0xff] %v15633_v14  ;;  %v15636_v26 = vsel %vm260_vm1, %v6152_v18, %v6153_v11  ;;  %v15639_v30 = vsel %vm260_vm1, %v6083_v54, %v6152_v18  ;;  %v15643_v15 = vsel %vm260_vm1, %v6150_v46, %v6221_v44  ;;  %v6222_v43 = vrot.slane %v6084_v59, 6 }
 0x4e2   : > { %v6086_v28 = vsel %vm6022_vm14, %v11841_v27, %v6054_v12  ;;  %v6085_v24 = vsel %vm6021_vm15, %v5878_v20, %v6053_v4  ;;  %v11844_v33 = vpop.f32.mrb[46].mxu1  ;;  %11884 = vmatmul.mubr.msk.f32.gmra.mrb[40].mxu0 %vm3466_vm11, %v15633_v14  ;;  %v6335_v1 = vrot.slane %v15643_v15, 1  ;;  %v6337_v38 = vrot.slane %v15639_v30, 1 }
 0x4e3   : > { %v6156_v10 = vrot.slane %v6086_v28, 7  ;;  %v6155_v9 = vrot.slane %v6085_v24, 7  ;;  %vm6024_vm0 = vcmp.ge.f32.partialorder %v11844_v33, 0.0  ;;  %v5888_v56 = vpop.f32.mrb[47].mxu1  ;;  %v6056_v45 = vmul.f32 0.01, %v11844_v33 }
 0x4e4   : > { %vm6023_vm3 = vcmp.ge.f32.partialorder %v5888_v56, 0.0  ;;  %v6055_v3 = vmul.f32 0.01, %v5888_v56  ;;  %v15650_v2 = vsel %vm436_vm2, %v6332_v5, %v6333_v51  ;;  %v15661_v58 = vsel %vm436_vm2, %v6333_v51, %v6335_v1 }
 0x4e5   : > { %17136 = vst [vmem:[#allocation24_spill] sm:$0xff] %v15650_v2  ;;  %v15653_v37 = vsel %vm260_vm1, %v6155_v9, %v6156_v10  ;;  %v15656_v41 = vsel %vm260_vm1, %v6085_v24, %v6155_v9  ;;  %11886 = vmatprep.mubr.msk.f32.mxu0 %vm3466_vm11, %v15650_v2  ;;  %17137 = vst [vmem:[#allocation40_spill] sm:$0xff] %v15661_v58  ;;  %v6338_v48 = vrot.slane %v15636_v26, 1  ;;  %v6223_v29 = vrot.slane %v6086_v28, 6 }
 0x4e6   : > { %v6088_v47 = vsel %vm6024_vm0, %v11844_v33, %v6056_v45  ;;  %v6087_v35 = vsel %vm6023_vm3, %v5888_v56, %v6055_v3  ;;  %v11847_v50 = vpop.f32.mrb[48].mxu1  ;;  %11887 = vmatmul.mubr.msk.f32.gmra.mrb[42].mxu0 %vm3466_vm11, %v15661_v58  ;;  %v15667_v8 = vsel %vm260_vm1, %v6153_v11, %v6222_v43  ;;  %v6342_v44 = vrot.slane %v15656_v41, 1 }
 0x4e7   : > { %v6159_v46 = vrot.slane %v6088_v47, 7  ;;  %v6158_v55 = vrot.slane %v6087_v35, 7  ;;  %vm6026_vm5 = vcmp.ge.f32.partialorder %v11847_v50, 0.0  ;;  %v5898_v53 = vpop.f32.mrb[49].mxu1  ;;  %v6058_v0 = vmul.f32 0.01, %v11847_v50 }
 0x4e8   : > { %vm6025_vm6 = vcmp.ge.f32.partialorder %v5898_v53, 0.0  ;;  %v6057_v63 = vmul.f32 0.01, %v5898_v53  ;;  %v15671_v59 = vsel %vm436_vm2, %v6337_v38, %v6338_v48  ;;  %v6224_v54 = vrot.slane %v6088_v47, 6 }
 0x4e9   : > { %17138 = vst [vmem:[#allocation45_spill] sm:$0xff] %v15671_v59  ;;  %v15674_v27 = vsel %vm260_vm1, %v6158_v55, %v6159_v46  ;;  %11889 = vmatprep.mubr.msk.f32.mxu0 %vm3466_vm11, %v15671_v59  ;;  %v6340_v7 = vrot.slane %v15667_v8, 1  ;;  %v6343_v11 = vrot.slane %v15653_v37, 1  ;;  %v15681_v18 = vsel %vm260_vm1, %v6087_v35, %v6158_v55 }
 0x4ea   : > { %v6090_v20 = vsel %vm6026_vm5, %v11847_v50, %v6058_v0  ;;  %v6089_v5 = vsel %vm6025_vm6, %v5898_v53, %v6057_v63  ;;  %v11850_v12 = vpop.f32.mrb[50].mxu1  ;;  %v15684_v4 = vsel %vm260_vm1, %v6156_v10, %v6223_v29  ;;  %v6347_v38 = vrot.slane %v15681_v18, 1 }
 0x4eb   : > { %v6162_v51 = vrot.slane %v6090_v20, 7  ;;  %v6161_v43 = vrot.slane %v6089_v5, 7  ;;  %vm6028_vm7 = vcmp.ge.f32.partialorder %v11850_v12, 0.0  ;;  %v5908_v28 = vpop.f32.mrb[51].mxu1  ;;  %v6060_v24 = vmul.f32 0.01, %v11850_v12 }
 0x4ec   : > { %v15687_v33 = vsel %vm436_vm2, %v6338_v48, %v6340_v7  ;;  %vm6027_vm8 = vcmp.ge.f32.partialorder %v5908_v28, 0.0  ;;  %v6059_v1 = vmul.f32 0.01, %v5908_v28  ;;  %v15695_v56 = vsel %vm436_vm2, %v6342_v44, %v6343_v11 }
 0x4ed   : > { %17139 = vst [vmem:[#allocation46_spill] sm:$0xff] %v15687_v33  ;;  %v15690_v9 = vsel %vm260_vm1, %v6161_v43, %v6162_v51  ;;  %11890 = vmatmul.mubr.msk.f32.gmra.mrb[44].mxu0 %vm3466_vm11, %v15687_v33  ;;  %17140 = vst [vmem:[#allocation47_spill] sm:$0xff] %v15695_v56  ;;  %v6345_v10 = vrot.slane %v15684_v4, 1  ;;  %v6092_v45 = vsel %vm6028_vm7, %v11850_v12, %v6060_v24  ;;  %v6348_v29 = vrot.slane %v15674_v27, 1 }
 0x4ee   : > { %v6091_v3 = vsel %vm6027_vm8, %v5908_v28, %v6059_v1  ;;  %11892 = vmatprep.mubr.msk.f32.mxu0 %vm3466_vm11, %v15695_v56  ;;  %v11853_v48 = vpop.f32.mrb[52].mxu1  ;;  %v15703_v47 = vsel %vm260_vm1, %v6159_v46, %v6224_v54  ;;  %v15706_v35 = vsel %vm260_vm1, %v6089_v5, %v6161_v43  ;;  %v6165_v50 = vrot.slane %v6092_v45, 7 }
 0x4ef   : > { %v6164_v55 = vrot.slane %v6091_v3, 7  ;;  %vm6030_vm9 = vcmp.ge.f32.partialorder %v11853_v48, 0.0  ;;  %v5918_v53 = vpop.f32.mrb[53].mxu1  ;;  %v6062_v44 = vmul.f32 0.01, %v11853_v48  ;;  %v15709_v0 = vsel %vm436_vm2, %v6343_v11, %v6345_v10 }
 0x4f0   : > { %17141 = vst [vmem:[#allocation50_spill] sm:$0xff] %v15709_v0  ;;  %vm6029_vm10 = vcmp.ge.f32.partialorder %v5918_v53, 0.0  ;;  %v6061_v63 = vmul.f32 0.01, %v5918_v53  ;;  %v6225_v7 = vrot.slane %v6090_v20, 6  ;;  %v15717_v46 = vsel %vm436_vm2, %v6347_v38, %v6348_v29 }
 0x4f1   : > { %v15712_v12 = vsel %vm260_vm1, %v6164_v55, %v6165_v50  ;;  %11893 = vmatmul.mubr.msk.f32.gmra.mrb[46].mxu0 %vm3466_vm11, %v15709_v0  ;;  %17142 = vst [vmem:[#allocation14_spill] sm:$0xff] %v15717_v46  ;;  %v6350_v54 = vrot.slane %v15703_v47, 1  ;;  %v15720_v5 = vsel %vm6030_vm9, %v11853_v48, %v6062_v44  ;;  %v6352_v20 = vrot.slane %v15706_v35, 1 }
 0x4f2   : > { %v6093_v43 = vsel %vm6029_vm10, %v5918_v53, %v6061_v63  ;;  %11895 = vmatprep.mubr.msk.f32.mxu0 %vm3466_vm11, %v15717_v46  ;;  %v11856_v11 = vpop.f32.mrb[54].mxu1  ;;  %v6353_v28 = vrot.slane %v15690_v9, 1  ;;  %v15727_v24 = vsel %vm260_vm1, %v6091_v3, %v6164_v55  ;;  %v6168_v1 = vrot.slane %v15720_v5, 7 }
 0x4f3   : > { %v6167_v10 = vrot.slane %v6093_v43, 7  ;;  %vm6032_vm12 = vcmp.ge.f32.partialorder %v11856_v11, 0.0  ;;  %v5928_v38 = vpop.f32.mrb[55].mxu1  ;;  %v6064_v0 = vmul.f32 0.01, %v11856_v11  ;;  %v15731_v48 = vsel %vm436_vm2, %v6348_v29, %v6350_v54 }
 0x4f4   : > { %17143 = vst [vmem:[#allocation27_spill] sm:$0xff] %v15731_v48  ;;  %vm6031_vm13 = vcmp.ge.f32.partialorder %v5928_v38, 0.0  ;;  %v6063_v53 = vmul.f32 0.01, %v5928_v38  ;;  %v6226_v44 = vrot.slane %v6092_v45, 6  ;;  %v15739_v3 = vsel %vm436_vm2, %v6352_v20, %v6353_v28 }
 0x4f5   : > { %v15734_v63 = vsel %vm260_vm1, %v6167_v10, %v6168_v1  ;;  %11896 = vmatmul.mubr.msk.f32.gmra.mrb[48].mxu0 %vm3466_vm11, %v15731_v48  ;;  %17144 = vst [vmem:[#allocation28_spill] sm:$0xff] %v15739_v3  ;;  %v15742_v55 = vsel %vm260_vm1, %v6162_v51, %v6225_v7  ;;  %v15745_v46 = vsel %vm260_vm1, %v6093_v43, %v6167_v10  ;;  %v6357_v20 = vrot.slane %v15727_v24, 1 }
 0x4f6   : > { %v6096_v29 = vsel %vm6032_vm12, %v11856_v11, %v6064_v0  ;;  %v6095_v54 = vsel %vm6031_vm13, %v5928_v38, %v6063_v53  ;;  %11898 = vmatprep.mubr.msk.f32.mxu0 %vm3466_vm11, %v15739_v3  ;;  %v11859_v45 = vpop.f32.mrb[56].mxu1  ;;  %v6355_v56 = vrot.slane %v15742_v55, 1  ;;  %v6227_v0 = vrot.slane %v15720_v5, 6 }
 0x4f7   : > { %v6171_v33 = vrot.slane %v6096_v29, 7  ;;  %v6170_v59 = vrot.slane %v6095_v54, 7  ;;  %vm6034_vm14 = vcmp.ge.f32.partialorder %v11859_v45, 0.0  ;;  %v5938_v48 = vpop.f32.mrb[57].mxu1  ;;  %v6066_v58 = vmul.f32 0.01, %v11859_v45 }
 0x4f8   : > { %v15752_v51 = vsel %vm436_vm2, %v6353_v28, %v6355_v56  ;;  %vm6033_vm15 = vcmp.ge.f32.partialorder %v5938_v48, 0.0  ;;  %v6065_v7 = vmul.f32 0.01, %v5938_v48  ;;  %v6358_v11 = vrot.slane %v15712_v12, 1 }
 0x4f9   : > { %17145 = vst [vmem:[#allocation33_spill] sm:$0xff] %v15752_v51  ;;  %v15756_v43 = vsel %vm260_vm1, %v6170_v59, %v6171_v33  ;;  %11899 = vmatmul.mubr.msk.f32.gmra.mrb[50].mxu0 %vm3466_vm11, %v15752_v51  ;;  %v15762_v10 = vsel %vm260_vm1, %v6165_v50, %v6226_v44  ;;  %v15765_v38 = vsel %vm260_vm1, %v6095_v54, %v6170_v59  ;;  %v6362_v51 = vrot.slane %v15745_v46, 1 }
 0x4fa   : > { %v6098_v56 = vsel %vm6034_vm14, %v11859_v45, %v6066_v58  ;;  %v6097_v28 = vsel %vm6033_vm15, %v5938_v48, %v6065_v7  ;;  %v11862_v53 = vpop.f32.mrb[58].mxu1  ;;  %v6360_v3 = vrot.slane %v15762_v10, 1  ;;  %v15769_v14 = vsel %vm436_vm2, %v6357_v20, %v6358_v11 }
 0x4fb   : > { %v6174_v5 = vrot.slane %v6098_v56, 7  ;;  %v6173_v2 = vrot.slane %v6097_v28, 7  ;;  %17146 = vst [vmem:[#allocation8_spill] sm:$0xff] %v15769_v14  ;;  %v5948_v19 = vpop.f32.mrb[59].mxu1  ;;  %11901 = vmatprep.mubr.msk.f32.mxu0 %vm3466_vm11, %v15769_v14  ;;  %vm6036_vm0 = vcmp.ge.f32.partialorder %v11862_v53, 0.0  ;;  %v6228_v58 = vrot.slane %v6096_v29, 6 }
 0x4fc   : > { %v6068_v50 = vmul.f32 0.01, %v11862_v53  ;;  %v15775_v59 = vsel %vm436_vm2, %v6358_v11, %v6360_v3  ;;  %vm6035_vm3 = vcmp.ge.f32.partialorder %v5948_v19, 0.0  ;;  %v6067_v44 = vmul.f32 0.01, %v5948_v19 }
 0x4fd   : > { %17147 = vst [vmem:[#allocation9_spill] sm:$0xff] %v15775_v59  ;;  %v15778_v48 = vsel %vm260_vm1, %v6173_v2, %v6174_v5  ;;  %11902 = vmatmul.mubr.msk.f32.gmra.mrb[52].mxu0 %vm3466_vm11, %v15775_v59  ;;  %v6363_v54 = vrot.slane %v15734_v63, 1  ;;  %v15784_v7 = vsel %vm260_vm1, %v6168_v1, %v6227_v0  ;;  %v6367_v14 = vrot.slane %v15765_v38, 1 }
 0x4fe   : > { %v6100_v45 = vsel %vm6036_vm0, %v11862_v53, %v6068_v50  ;;  %v11865_v20 = vpop.f32.mrb[60].mxu1  ;;  %v6099_v11 = vsel %vm6035_vm3, %v5948_v19, %v6067_v44  ;;  %v6368_v39 = vrot.slane %v15756_v43, 1  ;;  %v6365_v50 = vrot.slane %v15784_v7, 1 }
 0x4ff   : > { %v6177_v3 = vrot.slane %v6100_v45, 7  ;;  %v15788_v29 = vsel %vm436_vm2, %v6362_v51, %v6363_v54  ;;  %v5958_v57 = vpop.f32.mrb[61].mxu1  ;;  %v6176_v42 = vrot.slane %v6099_v11, 7  ;;  %vm6038_vm5 = vcmp.ge.f32.partialorder %v11865_v20, 0.0 }
 0x500   : > { %17148 = vst [vmem:[#allocation11_spill] sm:$0xff] %v15788_v29  ;;  %11904 = vmatprep.mubr.msk.f32.mxu0 %vm3466_vm11, %v15788_v29  ;;  %v6070_v53 = vmul.f32 0.01, %v11865_v20  ;;  %v6229_v1 = vrot.slane %v6098_v56, 6  ;;  %vm6037_vm6 = vcmp.ge.f32.partialorder %v5958_v57, 0.0  ;;  %v15795_v59 = vsel %vm260_vm1, %v6171_v33, %v6228_v58 }
 0x501   : > { %v6069_v0 = vmul.f32 0.01, %v5958_v57  ;;  %v15798_v19 = vsel %vm260_vm1, %v6097_v28, %v6173_v2  ;;  %v15801_v51 = vsel %vm260_vm1, %v6176_v42, %v6177_v3  ;;  %v15804_v31 = vsel %vm436_vm2, %v6363_v54, %v6365_v50 }
 0x502   : > { %v6102_v44 = vsel %vm6038_vm5, %v11865_v20, %v6070_v53  ;;  %17149 = vst [vmem:[#allocation12_spill] sm:$0xff] %v15804_v31  ;;  %v11868_v29 = vpop.f32.mrb[62].mxu1  ;;  %11905 = vmatmul.mubr.msk.f32.gmra.mrb[54].mxu0 %vm3466_vm11, %v15804_v31  ;;  %v15809_v40 = vsel %vm436_vm2, %v6367_v14, %v6368_v39  ;;  %v6230_v58 = vrot.slane %v6100_v45, 6  ;;  %v6370_v28 = vrot.slane %v15795_v59, 1 }
 0x503   : > { %v6180_v34 = vrot.slane %v6102_v44, 7  ;;  %v6101_v56 = vsel %vm6037_vm6, %v5958_v57, %v6069_v0  ;;  %17150 = vst [vmem:[#allocation13_spill] sm:$0xff] %v15809_v40  ;;  %v5968_v33 = vpop.f32.mrb[63].mxu1  ;;  %11907 = vmatprep.mubr.msk.f32.mxu0 %vm3466_vm11, %v15809_v40  ;;  %v15815_v54 = vsel %vm260_vm1, %v6099_v11, %v6176_v42  ;;  %v6372_v20 = vrot.slane %v15798_v19, 1 }
 0x504   : > { %v6179_v2 = vrot.slane %v6101_v56, 7  ;;  %v6373_v53 = vrot.slane %v15778_v48, 1  ;;  %v15820_v57 = vsel %vm260_vm1, %v6174_v5, %v6229_v1  ;;  %v15826_v45 = vsel %vm436_vm2, %v6368_v39, %v6370_v28 }
 0x505   : > { %17151 = vst [vmem:[#allocation15_spill] sm:$0xff] %v15826_v45  ;;  %v6231_v50 = vrot.slane %v6102_v44, 6  ;;  %v6375_v5 = vrot.slane %v15820_v57, 1  ;;  %v6377_v1 = vrot.slane %v15815_v54, 1  ;;  %v6378_v39 = vrot.slane %v15801_v51, 1 }
 0x506   : > { %v15823_v14 = vsel %vm260_vm1, %v6179_v2, %v6180_v34  ;;  %11908 = vmatmul.mubr.msk.f32.gmra.mrb[56].mxu0 %vm3466_vm11, %v15826_v45  ;;  %v15831_v42 = vsel %vm436_vm2, %v6372_v20, %v6373_v53  ;;  %v15834_v11 = vsel %vm260_vm1, %v6101_v56, %v6179_v2  ;;  %v15842_v0 = vsel %vm260_vm1, %v6177_v3, %v6230_v58 }
 0x507   : > { %17152 = vst [vmem:[#allocation42_spill] sm:$0xff] %v15831_v42  ;;  %11910 = vmatprep.mubr.msk.f32.mxu0 %vm3466_vm11, %v15831_v42  ;;  %v15845_v44 = vsel %vm436_vm2, %v6373_v53, %v6375_v5  ;;  %v6380_v28 = vrot.slane %v15842_v0, 1  ;;  %v15851_v56 = vsel %vm436_vm2, %v6377_v1, %v6378_v39  ;;  %v6382_v2 = vrot.slane %v15834_v11, 1 }
 0x508   : > { %17153 = vst [vmem:[#allocation23_spill] sm:$0xff] %v15851_v56  ;;  %v6383_v20 = vrot.slane %v15823_v14, 1  ;;  %v15856_v42 = vsel %vm260_vm1, %v6180_v34, %v6231_v50  ;;  %v6072_v5 = vmul.f32 0.01, %v11868_v29  ;;  %v6071_v34 = vmul.f32 0.01, %v5968_v33 }
 0x509   : > { %v15861_v3 = vsel %vm436_vm2, %v6378_v39, %v6380_v28  ;;  %v6385_v58 = vrot.slane %v15856_v42, 1  ;;  %vm6040_vm7 = vcmp.ge.f32.partialorder %v11868_v29, 0.0  ;;  %vm6039_vm8 = vcmp.ge.f32.partialorder %v5968_v33, 0.0  ;;  %v9873_v28 = vld [vmem:[%s16650_s3 + $0x18] sm:$0xff] }
 0x50a   : > { %11911 = vmatmul.mubr.msk.f32.gmra.mrb[58].mxu0 %vm3466_vm11, %v15845_v44  ;;  %17154 = vst [vmem:[#allocation7_spill] sm:$0xff] %v15861_v3  ;;  %v15867_v53 = vsel %vm436_vm2, %v6382_v2, %v6383_v20  ;;  %v15878_v1 = vsel %vm6040_vm7, %v11868_v29, %v6072_v5  ;;  %v15880_v39 = vsel %vm6039_vm8, %v5968_v33, %v6071_v34  ;;  %v6959_v29 = vrot.slane %v15540_v17, 2 }
 0x50b   : > { %11913 = vmatprep.mubr.msk.f32.mxu0 %vm3466_vm11, %v15851_v56  ;;  %v15872_v50 = vsel %vm436_vm2, %v6383_v20, %v6385_v58  ;;  %v16858_v2 = vrot.slane %v15878_v1, 7  ;;  %v16859_v20 = vrot.slane %v15880_v39, 7  ;;  %v6960_v33 = vrot.slane %v15537_v52, 2 }
 0x50c   : > { %17155 = vst [vmem:[#allocation26_spill] sm:$0xff] %v15872_v50  ;;  %v6962_v58 = vrot.slane %v15533_v49, 2  ;;  %v6964_v49 = vrot.slane %v15551_v61, 2 }
 0x50d   : > { %v15961_v5 = vsel %vm1092_vm4, %v6959_v29, %v6960_v33  ;;  %v6967_v29 = vrot.slane %v15559_v62, 2 }
 0x50e   : > { %11914 = vmatmul.mubr.msk.f32.gmra.mrb[60].mxu0 %vm3466_vm11, %v15861_v3  ;;  %17156 = vst [vmem:[#allocation6_spill] sm:$0xff] %v15961_v5  ;;  %v15966_v34 = vsel %vm1092_vm4, %v6960_v33, %v6962_v58  ;;  %v6969_v58 = vrot.slane %v15580_v32, 2 }
 0x50f   : > { %11916 = vmatprep.mubr.msk.f32.mxu0 %vm3466_vm11, %v15867_v53  ;;  %17157 = vst [vmem:[#allocation29_spill] sm:$0xff] %v15966_v34 }
 0x512   : > { %11917 = vmatmul.mubr.msk.f32.gmra.mrb[62].mxu0 %vm3466_vm11, %v15872_v50  ;;  %v6970_v50 = vrot.slane %v15577_v25, 2 }
 0x513   : > { %11921 = vmatprep.mubr.msk.f32.mxu0 %vm3466_vm11, %v15540_v17 }
 0x514   : > { %v15997_v62 = vsel %vm1092_vm4, %v6969_v58, %v6970_v50  ;;  %v6980_v58 = vrot.slane %v15612_v6, 2 }
 0x515   : > { %17159 = vst [vmem:[#allocation32_spill] sm:$0xff] %v15997_v62 }
 0x516   : > { %11922 = vmatmul.mubr.msk.f32.vlgmr.msra.gmra.mrb[32].mxu0 %vm3466_vm11, %v15537_v52 }
 0x517   : > { %11970 = vmatpush3.msra.mxu0 %v15564_v60  ;;  %11924 = vmatprep.mubr.msk.f32.mxu0 %vm3466_vm11, %v15540_v17  ;;  %v15901_v60 = vsel %vm260_vm1, %v16859_v20, %v16858_v2  ;;  %v15971_v2 = vld [vmem:[%s16650_s3 + $0x20] sm:$0xff]  ;;  %v6965_v20 = vrot.slane %v15548_v23, 2 }
 0x518   : > { %12019 = vmatprep.subr.mxu0 %v9873_v28 }
 0x519   : > { %v15984_v33 = vsel %vm1092_vm4, %v6964_v49, %v6965_v20  ;;  %v6974_v49 = vrot.slane %v15599_v22, 2 }
 0x51a   : > { %11925 = vmatmul.mubr.msk.f32.gmra.mrb[34].mxu0 %vm3466_vm11, %v15537_v52  ;;  %17158 = vst [vmem:[#allocation31_spill] sm:$0xff] %v15984_v33 }
 0x51b   : > { %11927 = vmatprep.mubr.msk.f32.mxu0 %vm3466_vm11, %v15551_v61 }
 0x51e   : > { %11928 = vmatmul.mubr.msk.f32.gmra.mrb[36].mxu0 %vm3466_vm11, %v15548_v23 }
 0x51f   : > { %11930 = vmatprep.mubr.msk.f32.mxu0 %vm3466_vm11, %v15580_v32 }
 0x522   : > { %11931 = vmatmul.mubr.msk.f32.gmra.mrb[38].mxu0 %vm3466_vm11, %v15577_v25 }
 0x523   : > { %11933 = vmatprep.mubr.msk.f32.mxu0 %vm3466_vm11, %v15599_v22 }
 0x526   : > { %11934 = vmatmul.mubr.msk.f32.gmra.mrb[40].mxu0 %vm3466_vm11, %v15596_v13 }
 0x527   : > { %11936 = vmatprep.mubr.msk.f32.mxu0 %vm3466_vm11, %v15615_v16 }
 0x52a   : > { %11937 = vmatmul.mubr.msk.f32.gmra.mrb[42].mxu0 %vm3466_vm11, %v15612_v6 }
 0x52b   : > { %11939 = vmatprep.mubr.msk.f32.mxu0 %vm3466_vm11, %v15639_v30 }
 0x52e   : > { %11940 = vmatmul.mubr.msk.f32.gmra.mrb[44].mxu0 %vm3466_vm11, %v15636_v26 }
 0x52f   : > { %11942 = vmatprep.mubr.msk.f32.mxu0 %vm3466_vm11, %v15656_v41 }
 0x532   : > { %11943 = vmatmul.mubr.msk.f32.gmra.mrb[46].mxu0 %vm3466_vm11, %v15653_v37 }
 0x533   : > { %11945 = vmatprep.mubr.msk.f32.mxu0 %vm3466_vm11, %v15681_v18 }
 0x536   : > { %11946 = vmatmul.mubr.msk.f32.gmra.mrb[48].mxu0 %vm3466_vm11, %v15674_v27 }
 0x537   : > { %11948 = vmatprep.mubr.msk.f32.mxu0 %vm3466_vm11, %v15706_v35 }
 0x53a   : > { %11949 = vmatmul.mubr.msk.f32.gmra.mrb[50].mxu0 %vm3466_vm11, %v15690_v9 }
 0x53b   : > { %11951 = vmatprep.mubr.msk.f32.mxu0 %vm3466_vm11, %v15727_v24 }
 0x53e   : > { %11952 = vmatmul.mubr.msk.f32.gmra.mrb[52].mxu0 %vm3466_vm11, %v15712_v12 }
 0x53f   : > { %11954 = vmatprep.mubr.msk.f32.mxu0 %vm3466_vm11, %v15745_v46 }
 0x542   : > { %11955 = vmatmul.mubr.msk.f32.gmra.mrb[54].mxu0 %vm3466_vm11, %v15734_v63 }
 0x543   : > { %11957 = vmatprep.mubr.msk.f32.mxu0 %vm3466_vm11, %v15765_v38 }
 0x546   : > { %11958 = vmatmul.mubr.msk.f32.gmra.mrb[56].mxu0 %vm3466_vm11, %v15756_v43 }
 0x547   : > { %11960 = vmatprep.mubr.msk.f32.mxu0 %vm3466_vm11, %v15798_v19 }
 0x54a   : > { %11961 = vmatmul.mubr.msk.f32.gmra.mrb[58].mxu0 %vm3466_vm11, %v15778_v48 }
 0x54b   : > { %11963 = vmatprep.mubr.msk.f32.mxu0 %vm3466_vm11, %v15815_v54 }
 0x54e   : > { %11964 = vmatmul.mubr.msk.f32.gmra.mrb[60].mxu0 %vm3466_vm11, %v15801_v51 }
 0x54f   : > { %11966 = vmatprep.mubr.msk.f32.mxu0 %vm3466_vm11, %v15834_v11 }
 0x552   : > { %11967 = vmatmul.mubr.msk.f32.gmra.mrb[62].mxu0 %vm3466_vm11, %v15823_v14 }
 0x553   : > { %11971 = vmatprep.mubr.msk.f32.mxu0 %vm3466_vm11, %v15961_v5 }
 0x556   : > { %11972 = vmatmul.mubr.msk.f32.vlgmr.msra.gmra.mrb[32].mxu0 %vm3466_vm11, %v15966_v34 }
 0x557   : > { %12020 = vmatpush3.msra.mxu0 %v9873_v28  ;;  %11974 = vmatprep.mubr.msk.f32.mxu0 %vm3466_vm11, %v15961_v5  ;;  %v15991_v28 = vsel %vm1092_vm4, %v6965_v20, %v6967_v29  ;;  %v6972_v5 = vrot.slane %v15584_v36, 2  ;;  %v6977_v20 = vrot.slane %v15621_v21, 2  ;;  %v6979_v29 = vrot.slane %v15615_v16, 2 }
 0x558   : > { %12069 = vmatprep.subr.mxu0 %v15971_v2 }
 0x559   : > { %v16023_v21 = vsel %vm1092_vm4, %v6979_v29, %v6980_v58  ;;  %v6990_v29 = vrot.slane %v15653_v37, 2 }
 0x55a   : > { %11975 = vmatmul.mubr.msk.f32.gmra.mrb[34].mxu0 %vm3466_vm11, %v15966_v34  ;;  %v6975_v34 = vrot.slane %v15596_v13, 2  ;;  %17161 = vst [vmem:[#allocation35_spill] sm:$0xff] %v16023_v21 }
 0x55b   : > { %11977 = vmatprep.mubr.msk.f32.mxu0 %vm3466_vm11, %v15984_v33  ;;  %v16004_v33 = vsel %vm1092_vm4, %v6970_v50, %v6972_v5  ;;  %v6982_v50 = vrot.slane %v15643_v15, 2  ;;  %v6984_v5 = vrot.slane %v15639_v30, 2 }
 0x55c   : > { %v16010_v36 = vsel %vm1092_vm4, %v6974_v49, %v6975_v34  ;;  %v6985_v49 = vrot.slane %v15636_v26, 2 }
 0x55d   : > { %17160 = vst [vmem:[#allocation34_spill] sm:$0xff] %v16010_v36 }
 0x55e   : > { %11978 = vmatmul.mubr.msk.f32.gmra.mrb[36].mxu0 %vm3466_vm11, %v15991_v28  ;;  %v16036_v15 = vsel %vm1092_vm4, %v6984_v5, %v6985_v49  ;;  %v6995_v5 = vrot.slane %v15674_v27, 2 }
 0x55f   : > { %11980 = vmatprep.mubr.msk.f32.mxu0 %vm3466_vm11, %v15997_v62  ;;  %v16017_v62 = vsel %vm1092_vm4, %v6975_v34, %v6977_v20  ;;  %v6987_v34 = vrot.slane %v15667_v8, 2  ;;  %17162 = vst [vmem:[#allocation36_spill] sm:$0xff] %v16036_v15  ;;  %v6989_v20 = vrot.slane %v15656_v41, 2 }
 0x561   : > { %v16049_v8 = vsel %vm1092_vm4, %v6989_v20, %v6990_v29  ;;  %v7000_v20 = vrot.slane %v15690_v9, 2 }
 0x562   : > { %11981 = vmatmul.mubr.msk.f32.gmra.mrb[38].mxu0 %vm3466_vm11, %v16004_v33  ;;  %17163 = vst [vmem:[#allocation39_spill] sm:$0xff] %v16049_v8 }
 0x563   : > { %11983 = vmatprep.mubr.msk.f32.mxu0 %vm3466_vm11, %v16010_v36  ;;  %v16030_v36 = vsel %vm1092_vm4, %v6980_v58, %v6982_v50  ;;  %v6992_v58 = vrot.slane %v15684_v4, 2  ;;  %v6994_v50 = vrot.slane %v15681_v18, 2 }
 0x565   : > { %v16062_v4 = vsel %vm1092_vm4, %v6994_v50, %v6995_v5  ;;  %v7005_v50 = vrot.slane %v15712_v12, 2 }
 0x566   : > { %11984 = vmatmul.mubr.msk.f32.gmra.mrb[40].mxu0 %vm3466_vm11, %v16017_v62  ;;  %17164 = vst [vmem:[#allocation41_spill] sm:$0xff] %v16062_v4 }
 0x567   : > { %11986 = vmatprep.mubr.msk.f32.mxu0 %vm3466_vm11, %v16023_v21  ;;  %v16043_v21 = vsel %vm1092_vm4, %v6985_v49, %v6987_v34  ;;  %v6997_v49 = vrot.slane %v15703_v47, 2  ;;  %v6999_v34 = vrot.slane %v15706_v35, 2 }
 0x569   : > { %v16075_v47 = vsel %vm1092_vm4, %v6999_v34, %v7000_v20  ;;  %v7010_v34 = vrot.slane %v15734_v63, 2 }
 0x56a   : > { %11987 = vmatmul.mubr.msk.f32.gmra.mrb[42].mxu0 %vm3466_vm11, %v16030_v36  ;;  %17165 = vst [vmem:[#allocation37_spill] sm:$0xff] %v16075_v47 }
 0x56b   : > { %11989 = vmatprep.mubr.msk.f32.mxu0 %vm3466_vm11, %v16036_v15  ;;  %v16056_v15 = vsel %vm1092_vm4, %v6990_v29, %v6992_v58  ;;  %v7002_v29 = vrot.slane %v15742_v55, 2  ;;  %v7004_v58 = vrot.slane %v15727_v24, 2 }
 0x56d   : > { %v16088_v55 = vsel %vm1092_vm4, %v7004_v58, %v7005_v50  ;;  %v7015_v58 = vrot.slane %v15756_v43, 2 }
 0x56e   : > { %11990 = vmatmul.mubr.msk.f32.gmra.mrb[44].mxu0 %vm3466_vm11, %v16043_v21  ;;  %17166 = vst [vmem:[#allocation38_spill] sm:$0xff] %v16088_v55 }
 0x56f   : > { %11992 = vmatprep.mubr.msk.f32.mxu0 %vm3466_vm11, %v16049_v8  ;;  %v16069_v8 = vsel %vm1092_vm4, %v6995_v5, %v6997_v49  ;;  %v7007_v5 = vrot.slane %v15762_v10, 2  ;;  %v7009_v49 = vrot.slane %v15745_v46, 2 }
 0x571   : > { %v16101_v10 = vsel %vm1092_vm4, %v7009_v49, %v7010_v34  ;;  %v7020_v49 = vrot.slane %v15778_v48, 2 }
 0x572   : > { %11993 = vmatmul.mubr.msk.f32.gmra.mrb[46].mxu0 %vm3466_vm11, %v16056_v15  ;;  %17167 = vst [vmem:[#allocation48_spill] sm:$0xff] %v16101_v10 }
 0x573   : > { %11995 = vmatprep.mubr.msk.f32.mxu0 %vm3466_vm11, %v16062_v4  ;;  %v16082_v4 = vsel %vm1092_vm4, %v7000_v20, %v7002_v29  ;;  %v7012_v20 = vrot.slane %v15784_v7, 2  ;;  %v7014_v29 = vrot.slane %v15765_v38, 2 }
 0x575   : > { %v16114_v7 = vsel %vm1092_vm4, %v7014_v29, %v7015_v58  ;;  %v7025_v29 = vrot.slane %v15801_v51, 2 }
 0x576   : > { %11996 = vmatmul.mubr.msk.f32.gmra.mrb[48].mxu0 %vm3466_vm11, %v16069_v8  ;;  %17169 = vst [vmem:[#allocation30_spill] sm:$0xff] %v16114_v7 }
 0x577   : > { %11998 = vmatprep.mubr.msk.f32.mxu0 %vm3466_vm11, %v16075_v47  ;;  %v16095_v47 = vsel %vm1092_vm4, %v7005_v50, %v7007_v5  ;;  %v7017_v50 = vrot.slane %v15795_v59, 2  ;;  %v7019_v5 = vrot.slane %v15798_v19, 2 }
 0x579   : > { %v16127_v59 = vsel %vm1092_vm4, %v7019_v5, %v7020_v49  ;;  %v7030_v5 = vrot.slane %v15823_v14, 2 }
 0x57a   : > { %11999 = vmatmul.mubr.msk.f32.gmra.mrb[50].mxu0 %vm3466_vm11, %v16082_v4  ;;  %17171 = vst [vmem:[#allocation43_spill] sm:$0xff] %v16127_v59 }
 0x57b   : > { %12001 = vmatprep.mubr.msk.f32.mxu0 %vm3466_vm11, %v16088_v55  ;;  %v16108_v55 = vsel %vm1092_vm4, %v7010_v34, %v7012_v20  ;;  %v7022_v34 = vrot.slane %v15820_v57, 2  ;;  %v7024_v20 = vrot.slane %v15815_v54, 2 }
 0x57c   : > { %17168 = vst [vmem:[#allocation49_spill] sm:$0xff] %v16108_v55 }
 0x57d   : > { %v16140_v57 = vsel %vm1092_vm4, %v7024_v20, %v7025_v29  ;;  %v9972_v20 = vld [vmem:[%s16650_s3 + $0x30] sm:$0xff] }
 0x57e   : > { %12002 = vmatmul.mubr.msk.f32.gmra.mrb[52].mxu0 %vm3466_vm11, %v16095_v47  ;;  %17172 = vst [vmem:[#allocation17_spill] sm:$0xff] %v16140_v57 }
 0x57f   : > { %12004 = vmatprep.mubr.msk.f32.mxu0 %vm3466_vm11, %v16101_v10  ;;  %v16121_v10 = vsel %vm1092_vm4, %v7015_v58, %v7017_v50  ;;  %v7027_v58 = vrot.slane %v15842_v0, 2  ;;  %v7029_v50 = vrot.slane %v15834_v11, 2 }
 0x580   : > { %17170 = vst [vmem:[#allocation10_spill] sm:$0xff] %v16121_v10 }
 0x581   : > { %v16153_v0 = vsel %vm1092_vm4, %v7029_v50, %v7030_v5  ;;  %v17178_v50 = vld [vmem:[#allocation44_spill] sm:$0xff] }
 0x582   : > { %12005 = vmatmul.mubr.msk.f32.gmra.mrb[54].mxu0 %vm3466_vm11, %v16108_v55 }
 0x583   : > { %12007 = vmatprep.mubr.msk.f32.mxu0 %vm3466_vm11, %v16114_v7  ;;  %v16134_v7 = vsel %vm1092_vm4, %v7020_v49, %v7022_v34  ;;  %v7032_v49 = vrot.slane %v15856_v42, 2  ;;  %v9939_v42 = vld [vmem:[%s16650_s3 + $0x28] sm:$0xff] }
 0x585   : > { %v16158_v34 = vsel %vm1092_vm4, %v7030_v5, %v7032_v49  ;;  %v17179_v5 = vld [vmem:[#allocation18_spill] sm:$0xff]  ;;  %v17180_v49 = vld [vmem:[#allocation20_spill] sm:$0xff] }
 0x586   : > { %12008 = vmatmul.mubr.msk.f32.gmra.mrb[56].mxu0 %vm3466_vm11, %v16121_v10 }
 0x587   : > { %12010 = vmatprep.mubr.msk.f32.mxu0 %vm3466_vm11, %v16127_v59  ;;  %v16147_v59 = vsel %vm1092_vm4, %v7025_v29, %v7027_v58  ;;  %v17175_v29 = vld [vmem:[#allocation22_spill] sm:$0xff]  ;;  %v17177_v58 = vld [vmem:[#allocation16_spill] sm:$0xff] }
 0x58a   : > { %12011 = vmatmul.mubr.msk.f32.gmra.mrb[58].mxu0 %vm3466_vm11, %v16134_v7 }
 0x58b   : > { %12013 = vmatprep.mubr.msk.f32.mxu0 %vm3466_vm11, %v16140_v57 }
 0x58e   : > { %12014 = vmatmul.mubr.msk.f32.gmra.mrb[60].mxu0 %vm3466_vm11, %v16147_v59 }
 0x58f   : > { %12016 = vmatprep.mubr.msk.f32.mxu0 %vm3466_vm11, %v16153_v0 }
 0x592   : > { %12017 = vmatmul.mubr.msk.f32.gmra.mrb[62].mxu0 %vm3466_vm11, %v16158_v34 }
 0x593   : > { %12021 = vmatprep.mubr.msk.f32.mxu0 %vm3466_vm11, %v15540_v17 }
 0x596   : > { %12022 = vmatmul.mubr.msk.f32.vlgmr.msra.gmra.mrb[32].mxu0 %vm3466_vm11, %v15537_v52  ;;  %v17173_v52 = vrot.slane %v15880_v39, 7 }
 0x597   : > { %12070 = vmatpush3.msra.mxu0 %v15971_v2  ;;  %12024 = vmatprep.mubr.msk.f32.mxu0 %vm3466_vm11, %v15551_v61  ;;  %v17174_v2 = vld [vmem:[#allocation5_spill] sm:$0xff] }
 0x598   : > { %12119 = vmatprep.subr.mxu0 %v9939_v42  ;;  %v16228_v17 = vsel %vm260_vm1, %v15880_v39, %v17173_v52  ;;  %v17176_v39 = vld [vmem:[#allocation25_spill] sm:$0xff] }
 0x599   : > { %v17181_v52 = vld [vmem:[#allocation21_spill] sm:$0xff] }
 0x59a   : > { %12025 = vmatmul.mubr.msk.f32.gmra.mrb[34].mxu0 %vm3466_vm11, %v15548_v23 }
 0x59b   : > { %12027 = vmatprep.mubr.msk.f32.mxu0 %vm3466_vm11, %v15580_v32 }
 0x59e   : > { %12028 = vmatmul.mubr.msk.f32.gmra.mrb[36].mxu0 %vm3466_vm11, %v15577_v25 }
 0x59f   : > { %12030 = vmatprep.mubr.msk.f32.mxu0 %vm3466_vm11, %v15599_v22 }
 0x5a2   : > { %12031 = vmatmul.mubr.msk.f32.gmra.mrb[38].mxu0 %vm3466_vm11, %v15596_v13 }
 0x5a3   : > { %12033 = vmatprep.mubr.msk.f32.mxu0 %vm3466_vm11, %v15615_v16 }
 0x5a6   : > { %12034 = vmatmul.mubr.msk.f32.gmra.mrb[40].mxu0 %vm3466_vm11, %v15612_v6 }
 0x5a7   : > { %12036 = vmatprep.mubr.msk.f32.mxu0 %vm3466_vm11, %v15639_v30 }
 0x5aa   : > { %12037 = vmatmul.mubr.msk.f32.gmra.mrb[42].mxu0 %vm3466_vm11, %v15636_v26 }
 0x5ab   : > { %12039 = vmatprep.mubr.msk.f32.mxu0 %vm3466_vm11, %v15656_v41 }
 0x5ae   : > { %12040 = vmatmul.mubr.msk.f32.gmra.mrb[44].mxu0 %vm3466_vm11, %v15653_v37 }
 0x5af   : > { %12042 = vmatprep.mubr.msk.f32.mxu0 %vm3466_vm11, %v15681_v18 }
 0x5b2   : > { %12043 = vmatmul.mubr.msk.f32.gmra.mrb[46].mxu0 %vm3466_vm11, %v15674_v27 }
 0x5b3   : > { %12045 = vmatprep.mubr.msk.f32.mxu0 %vm3466_vm11, %v15706_v35 }
 0x5b6   : > { %12046 = vmatmul.mubr.msk.f32.gmra.mrb[48].mxu0 %vm3466_vm11, %v15690_v9 }
 0x5b7   : > { %12048 = vmatprep.mubr.msk.f32.mxu0 %vm3466_vm11, %v15727_v24 }
 0x5ba   : > { %12049 = vmatmul.mubr.msk.f32.gmra.mrb[50].mxu0 %vm3466_vm11, %v15712_v12 }
 0x5bb   : > { %12051 = vmatprep.mubr.msk.f32.mxu0 %vm3466_vm11, %v15745_v46 }
 0x5be   : > { %12052 = vmatmul.mubr.msk.f32.gmra.mrb[52].mxu0 %vm3466_vm11, %v15734_v63 }
 0x5bf   : > { %12054 = vmatprep.mubr.msk.f32.mxu0 %vm3466_vm11, %v15765_v38 }
 0x5c2   : > { %12055 = vmatmul.mubr.msk.f32.gmra.mrb[54].mxu0 %vm3466_vm11, %v15756_v43 }
 0x5c3   : > { %12057 = vmatprep.mubr.msk.f32.mxu0 %vm3466_vm11, %v15798_v19 }
 0x5c6   : > { %12058 = vmatmul.mubr.msk.f32.gmra.mrb[56].mxu0 %vm3466_vm11, %v15778_v48 }
 0x5c7   : > { %12060 = vmatprep.mubr.msk.f32.mxu0 %vm3466_vm11, %v15815_v54 }
 0x5ca   : > { %12061 = vmatmul.mubr.msk.f32.gmra.mrb[58].mxu0 %vm3466_vm11, %v15801_v51 }
 0x5cb   : > { %12063 = vmatprep.mubr.msk.f32.mxu0 %vm3466_vm11, %v15834_v11 }
 0x5ce   : > { %12064 = vmatmul.mubr.msk.f32.gmra.mrb[60].mxu0 %vm3466_vm11, %v15823_v14 }
 0x5cf   : > { %12066 = vmatprep.mubr.msk.f32.mxu0 %vm3466_vm11, %v16228_v17 }
 0x5d2   : > { %12067 = vmatmul.mubr.msk.f32.gmra.mrb[62].mxu0 %vm3466_vm11, %v15901_v60 }
 0x5d3   : > { %12071 = vmatprep.mubr.msk.f32.mxu0 %vm3466_vm11, %v17174_v2  ;;  %v17183_v2 = vld [vmem:[#allocation40_spill] sm:$0xff] }
 0x5d6   : > { %12072 = vmatmul.mubr.msk.f32.vlgmr.msra.gmra.mrb[32].mxu0 %vm3466_vm11, %v17175_v29  ;;  %v17184_v29 = vld [vmem:[#allocation45_spill] sm:$0xff] }
 0x5d7   : > { %12120 = vmatpush3.msra.mxu0 %v9939_v42  ;;  %12074 = vmatprep.mubr.msk.f32.mxu0 %vm3466_vm11, %v17176_v39  ;;  %v17182_v42 = vld [vmem:[#allocation24_spill] sm:$0xff] }
 0x5d8   : > { %12169 = vmatprep.subr.mxu0 %v9972_v20 }
 0x5da   : > { %12075 = vmatmul.mubr.msk.f32.gmra.mrb[34].mxu0 %vm3466_vm11, %v17177_v58  ;;  %v17185_v58 = vld [vmem:[#allocation46_spill] sm:$0xff] }
 0x5db   : > { %12077 = vmatprep.mubr.msk.f32.mxu0 %vm3466_vm11, %v17178_v50  ;;  %v17186_v50 = vld [vmem:[#allocation47_spill] sm:$0xff] }
 0x5de   : > { %12078 = vmatmul.mubr.msk.f32.gmra.mrb[36].mxu0 %vm3466_vm11, %v17179_v5  ;;  %v17187_v5 = vld [vmem:[#allocation50_spill] sm:$0xff] }
 0x5df   : > { %12080 = vmatprep.mubr.msk.f32.mxu0 %vm3466_vm11, %v17180_v49  ;;  %v17188_v49 = vld [vmem:[#allocation14_spill] sm:$0xff] }
 0x5e2   : > { %12081 = vmatmul.mubr.msk.f32.gmra.mrb[38].mxu0 %vm3466_vm11, %v17181_v52  ;;  %v17189_v52 = vld [vmem:[#allocation27_spill] sm:$0xff] }
 0x5e3   : > { %12083 = vmatprep.mubr.msk.f32.mxu0 %vm3466_vm11, %v17182_v42  ;;  %v17190_v42 = vld [vmem:[#allocation28_spill] sm:$0xff] }
 0x5e6   : > { %12084 = vmatmul.mubr.msk.f32.gmra.mrb[40].mxu0 %vm3466_vm11, %v17183_v2  ;;  %v17191_v2 = vld [vmem:[#allocation33_spill] sm:$0xff] }
 0x5e7   : > { %12086 = vmatprep.mubr.msk.f32.mxu0 %vm3466_vm11, %v17184_v29  ;;  %v17192_v29 = vld [vmem:[#allocation8_spill] sm:$0xff] }
 0x5ea   : > { %12087 = vmatmul.mubr.msk.f32.gmra.mrb[42].mxu0 %vm3466_vm11, %v17185_v58  ;;  %v17193_v58 = vld [vmem:[#allocation9_spill] sm:$0xff] }
 0x5eb   : > { %12089 = vmatprep.mubr.msk.f32.mxu0 %vm3466_vm11, %v17186_v50  ;;  %v17194_v50 = vld [vmem:[#allocation11_spill] sm:$0xff] }
 0x5ee   : > { %12090 = vmatmul.mubr.msk.f32.gmra.mrb[44].mxu0 %vm3466_vm11, %v17187_v5 }
 0x5ef   : > { %12092 = vmatprep.mubr.msk.f32.mxu0 %vm3466_vm11, %v17188_v49 }
 0x5f2   : > { %12093 = vmatmul.mubr.msk.f32.gmra.mrb[46].mxu0 %vm3466_vm11, %v17189_v52 }
 0x5f3   : > { %12095 = vmatprep.mubr.msk.f32.mxu0 %vm3466_vm11, %v17190_v42  ;;  %v17195_v42 = vld [vmem:[#allocation42_spill] sm:$0xff] }
 0x5f6   : > { %12096 = vmatmul.mubr.msk.f32.gmra.mrb[48].mxu0 %vm3466_vm11, %v17191_v2 }
 0x5f7   : > { %12098 = vmatprep.mubr.msk.f32.mxu0 %vm3466_vm11, %v17192_v29  ;;  %v6232_v29 = vrot.slane %v15878_v1, 6 }
 0x5fa   : > { %12099 = vmatmul.mubr.msk.f32.gmra.mrb[50].mxu0 %vm3466_vm11, %v17193_v58  ;;  %v17197_v58 = vld [vmem:[#allocation26_spill] sm:$0xff] }
 0x5fb   : > { %12101 = vmatprep.mubr.msk.f32.mxu0 %vm3466_vm11, %v17194_v50 }
 0x5fe   : > { %12102 = vmatmul.mubr.msk.f32.gmra.mrb[52].mxu0 %vm3466_vm11, %v15804_v31  ;;  %v7618_v31 = vrot.slane %v16228_v17, 1 }
 0x5ff   : > { %12104 = vmatprep.mubr.msk.f32.mxu0 %vm3466_vm11, %v15809_v40  ;;  %v7619_v40 = vrot.slane %v15901_v60, 1 }
 0x602   : > { %12105 = vmatmul.mubr.msk.f32.gmra.mrb[54].mxu0 %vm3466_vm11, %v15826_v45  ;;  %v17196_v45 = vrot.slane %v15878_v1, 7  ;;  %v10005_v1 = vld [vmem:[%s16650_s3 + $0x38] sm:$0xff] }
 0x603   : > { %12107 = vmatprep.mubr.msk.f32.mxu0 %vm3466_vm11, %v17195_v42 }
 0x604   : > { %v6280_v50 = vsel %vm260_vm1, %v17196_v45, %v6232_v29  ;;  %v17198_v45 = vld [vmem:[#allocation6_spill] sm:$0xff]  ;;  %v17199_v29 = vld [vmem:[#allocation29_spill] sm:$0xff] }
 0x605   : > { %v7621_v42 = vrot.slane %v6280_v50, 1 }
 0x606   : > { %12108 = vmatmul.mubr.msk.f32.gmra.mrb[56].mxu0 %vm3466_vm11, %v15845_v44 }
 0x607   : > { %12110 = vmatprep.mubr.msk.f32.mxu0 %vm3466_vm11, %v15851_v56  ;;  %v16306_v56 = vsel %vm436_vm2, %v7618_v31, %v7619_v40  ;;  %v17200_v31 = vld [vmem:[#allocation31_spill] sm:$0xff] }
 0x60a   : > { %12111 = vmatmul.mubr.msk.f32.gmra.mrb[58].mxu0 %vm3466_vm11, %v15861_v3  ;;  %v16311_v3 = vsel %vm436_vm2, %v7619_v40, %v7621_v42  ;;  %v17201_v40 = vld [vmem:[#allocation32_spill] sm:$0xff]  ;;  %v17202_v42 = vld [vmem:[#allocation34_spill] sm:$0xff] }
 0x60b   : > { %12113 = vmatprep.mubr.msk.f32.mxu0 %vm3466_vm11, %v15867_v53 }
 0x60e   : > { %12114 = vmatmul.mubr.msk.f32.gmra.mrb[60].mxu0 %vm3466_vm11, %v17197_v58 }
 0x60f   : > { %12116 = vmatprep.mubr.msk.f32.mxu0 %vm3466_vm11, %v16306_v56 }
 0x612   : > { %12117 = vmatmul.mubr.msk.f32.gmra.mrb[62].mxu0 %vm3466_vm11, %v16311_v3 }
 0x613   : > { %12121 = vmatprep.mubr.msk.f32.mxu0 %vm3466_vm11, %v17198_v45  ;;  %v17204_v45 = vld [vmem:[#allocation36_spill] sm:$0xff] }
 0x616   : > { %12122 = vmatmul.mubr.msk.f32.vlgmr.msra.gmra.mrb[32].mxu0 %vm3466_vm11, %v17199_v29  ;;  %v17205_v29 = vld [vmem:[#allocation39_spill] sm:$0xff] }
 0x617   : > { %12170 = vmatpush3.msra.mxu0 %v9972_v20  ;;  %12124 = vmatprep.mubr.msk.f32.mxu0 %vm3466_vm11, %v17200_v31  ;;  %v17203_v20 = vld [vmem:[#allocation35_spill] sm:$0xff] }
 0x618   : > { %12219 = vmatprep.subr.mxu0 %v10005_v1 }
 0x61a   : > { %12125 = vmatmul.mubr.msk.f32.gmra.mrb[34].mxu0 %vm3466_vm11, %v15991_v28 }
 0x61b   : > { %12127 = vmatprep.mubr.msk.f32.mxu0 %vm3466_vm11, %v17201_v40 }
 0x61e   : > { %12128 = vmatmul.mubr.msk.f32.gmra.mrb[36].mxu0 %vm3466_vm11, %v16004_v33 }
 0x61f   : > { %12130 = vmatprep.mubr.msk.f32.mxu0 %vm3466_vm11, %v17202_v42  ;;  %v17206_v42 = vld [vmem:[#allocation41_spill] sm:$0xff] }
 0x622   : > { %12131 = vmatmul.mubr.msk.f32.gmra.mrb[38].mxu0 %vm3466_vm11, %v16017_v62 }
 0x623   : > { %12133 = vmatprep.mubr.msk.f32.mxu0 %vm3466_vm11, %v17203_v20  ;;  %v17207_v20 = vld [vmem:[#allocation37_spill] sm:$0xff] }
 0x626   : > { %12134 = vmatmul.mubr.msk.f32.gmra.mrb[40].mxu0 %vm3466_vm11, %v16030_v36 }
 0x627   : > { %12136 = vmatprep.mubr.msk.f32.mxu0 %vm3466_vm11, %v17204_v45  ;;  %v17208_v45 = vld [vmem:[#allocation38_spill] sm:$0xff] }
 0x62a   : > { %12137 = vmatmul.mubr.msk.f32.gmra.mrb[42].mxu0 %vm3466_vm11, %v16043_v21 }
 0x62b   : > { %12139 = vmatprep.mubr.msk.f32.mxu0 %vm3466_vm11, %v17205_v29  ;;  %v17209_v29 = vld [vmem:[#allocation48_spill] sm:$0xff] }
 0x62e   : > { %12140 = vmatmul.mubr.msk.f32.gmra.mrb[44].mxu0 %vm3466_vm11, %v16056_v15 }
 0x62f   : > { %12142 = vmatprep.mubr.msk.f32.mxu0 %vm3466_vm11, %v17206_v42  ;;  %v17210_v42 = vld [vmem:[#allocation30_spill] sm:$0xff] }
 0x632   : > { %12143 = vmatmul.mubr.msk.f32.gmra.mrb[46].mxu0 %vm3466_vm11, %v16069_v8 }
 0x633   : > { %12145 = vmatprep.mubr.msk.f32.mxu0 %vm3466_vm11, %v17207_v20  ;;  %v17211_v20 = vld [vmem:[#allocation43_spill] sm:$0xff] }
 0x636   : > { %12146 = vmatmul.mubr.msk.f32.gmra.mrb[48].mxu0 %vm3466_vm11, %v16082_v4 }
 0x637   : > { %12148 = vmatprep.mubr.msk.f32.mxu0 %vm3466_vm11, %v17208_v45 }
 0x63a   : > { %12149 = vmatmul.mubr.msk.f32.gmra.mrb[50].mxu0 %vm3466_vm11, %v16095_v47 }
 0x63b   : > { %12151 = vmatprep.mubr.msk.f32.mxu0 %vm3466_vm11, %v17209_v29  ;;  %v7887_v29 = vrot.slane %v15901_v60, 2 }
 0x63e   : > { %12152 = vmatmul.mubr.msk.f32.gmra.mrb[52].mxu0 %vm3466_vm11, %v16108_v55  ;;  %v7886_v55 = vrot.slane %v16228_v17, 2 }
 0x63f   : > { %12154 = vmatprep.mubr.msk.f32.mxu0 %vm3466_vm11, %v17210_v42 }
 0x642   : > { %12155 = vmatmul.mubr.msk.f32.gmra.mrb[54].mxu0 %vm3466_vm11, %v16121_v10  ;;  %v7889_v10 = vrot.slane %v6280_v50, 2  ;;  %v10038_v50 = vld [vmem:[%s16650_s3 + $0x40] sm:$0xff] }
 0x643   : > { %12157 = vmatprep.mubr.msk.f32.mxu0 %vm3466_vm11, %v17211_v20  ;;  %v16381_v20 = vsel %vm1092_vm4, %v7886_v55, %v7887_v29 }
 0x646   : > { %12158 = vmatmul.mubr.msk.f32.gmra.mrb[56].mxu0 %vm3466_vm11, %v16134_v7 }
 0x647   : > { %12160 = vmatprep.mubr.msk.f32.mxu0 %vm3466_vm11, %v16140_v57  ;;  %v16386_v57 = vsel %vm1092_vm4, %v7887_v29, %v7889_v10 }
 0x64a   : > { %12161 = vmatmul.mubr.msk.f32.gmra.mrb[58].mxu0 %vm3466_vm11, %v16147_v59 }
 0x64b   : > { %12163 = vmatprep.mubr.msk.f32.mxu0 %vm3466_vm11, %v16153_v0 }
 0x64e   : > { %12164 = vmatmul.mubr.msk.f32.gmra.mrb[60].mxu0 %vm3466_vm11, %v16158_v34 }
 0x64f   : > { %12166 = vmatprep.mubr.msk.f32.mxu0 %vm3466_vm11, %v16381_v20 }
 0x652   : > { %12167 = vmatmul.mubr.msk.f32.gmra.mrb[62].mxu0 %vm3466_vm11, %v16386_v57 }
 0x653   : > { %12171 = vmatprep.mubr.msk.f32.mxu0 %vm3466_vm11, %v15551_v61  ;;  %v17213_v61 = vld [vmem:[#allocation44_spill] sm:$0xff] }
 0x656   : > { %12172 = vmatmul.mubr.msk.f32.vlgmr.msra.gmra.mrb[32].mxu0 %vm3466_vm11, %v15548_v23  ;;  %v17212_v23 = vld [vmem:[#allocation16_spill] sm:$0xff] }
 0x657   : > { %12220 = vmatpush3.msra.mxu0 %v10005_v1  ;;  %12174 = vmatprep.mubr.msk.f32.mxu0 %vm3466_vm11, %v15580_v32  ;;  %v17215_v32 = vld [vmem:[#allocation20_spill] sm:$0xff] }
 0x658   : > { %12269 = vmatprep.subr.mxu0 %v10038_v50 }
 0x65a   : > { %12175 = vmatmul.mubr.msk.f32.gmra.mrb[34].mxu0 %vm3466_vm11, %v15577_v25  ;;  %v17214_v25 = vld [vmem:[#allocation18_spill] sm:$0xff] }
 0x65b   : > { %12177 = vmatprep.mubr.msk.f32.mxu0 %vm3466_vm11, %v15599_v22  ;;  %v17217_v22 = vld [vmem:[#allocation24_spill] sm:$0xff] }
 0x65e   : > { %12178 = vmatmul.mubr.msk.f32.gmra.mrb[36].mxu0 %vm3466_vm11, %v15596_v13  ;;  %v17216_v13 = vld [vmem:[#allocation21_spill] sm:$0xff] }
 0x65f   : > { %12180 = vmatprep.mubr.msk.f32.mxu0 %vm3466_vm11, %v15615_v16  ;;  %v17219_v16 = vld [vmem:[#allocation45_spill] sm:$0xff] }
 0x662   : > { %12181 = vmatmul.mubr.msk.f32.gmra.mrb[38].mxu0 %vm3466_vm11, %v15612_v6  ;;  %v17218_v6 = vld [vmem:[#allocation40_spill] sm:$0xff] }
 0x663   : > { %12183 = vmatprep.mubr.msk.f32.mxu0 %vm3466_vm11, %v15639_v30  ;;  %v17221_v30 = vld [vmem:[#allocation47_spill] sm:$0xff] }
 0x666   : > { %12184 = vmatmul.mubr.msk.f32.gmra.mrb[40].mxu0 %vm3466_vm11, %v15636_v26  ;;  %v17220_v26 = vld [vmem:[#allocation46_spill] sm:$0xff] }
 0x667   : > { %12186 = vmatprep.mubr.msk.f32.mxu0 %vm3466_vm11, %v15656_v41  ;;  %v17223_v41 = vld [vmem:[#allocation8_spill] sm:$0xff] }
 0x66a   : > { %12187 = vmatmul.mubr.msk.f32.gmra.mrb[42].mxu0 %vm3466_vm11, %v15653_v37  ;;  %v17222_v37 = vld [vmem:[#allocation28_spill] sm:$0xff] }
 0x66b   : > { %12189 = vmatprep.mubr.msk.f32.mxu0 %vm3466_vm11, %v15681_v18  ;;  %v17225_v18 = vld [vmem:[#allocation11_spill] sm:$0xff] }
 0x66e   : > { %12190 = vmatmul.mubr.msk.f32.gmra.mrb[44].mxu0 %vm3466_vm11, %v15674_v27  ;;  %v17224_v27 = vld [vmem:[#allocation9_spill] sm:$0xff] }
 0x66f   : > { %12192 = vmatprep.mubr.msk.f32.mxu0 %vm3466_vm11, %v15706_v35  ;;  %v17227_v35 = vld [vmem:[#allocation13_spill] sm:$0xff] }
 0x672   : > { %12193 = vmatmul.mubr.msk.f32.gmra.mrb[46].mxu0 %vm3466_vm11, %v15690_v9  ;;  %v17226_v9 = vld [vmem:[#allocation12_spill] sm:$0xff] }
 0x673   : > { %12195 = vmatprep.mubr.msk.f32.mxu0 %vm3466_vm11, %v15727_v24  ;;  %v17230_v24 = vld [vmem:[#allocation23_spill] sm:$0xff] }
 0x676   : > { %12196 = vmatmul.mubr.msk.f32.gmra.mrb[48].mxu0 %vm3466_vm11, %v15712_v12  ;;  %v17228_v12 = vld [vmem:[#allocation15_spill] sm:$0xff] }
 0x677   : > { %12198 = vmatprep.mubr.msk.f32.mxu0 %vm3466_vm11, %v15745_v46  ;;  %v17229_v46 = vld [vmem:[#allocation42_spill] sm:$0xff] }
 0x67a   : > { %12199 = vmatmul.mubr.msk.f32.gmra.mrb[50].mxu0 %vm3466_vm11, %v15734_v63  ;;  %v17231_v63 = vld [vmem:[#allocation7_spill] sm:$0xff] }
 0x67b   : > { %12201 = vmatprep.mubr.msk.f32.mxu0 %vm3466_vm11, %v15765_v38  ;;  %v17233_v38 = vld [vmem:[#allocation35_spill] sm:$0xff] }
 0x67e   : > { %12202 = vmatmul.mubr.msk.f32.gmra.mrb[52].mxu0 %vm3466_vm11, %v15756_v43  ;;  %v17232_v43 = vld [vmem:[#allocation34_spill] sm:$0xff] }
 0x67f   : > { %12204 = vmatprep.mubr.msk.f32.mxu0 %vm3466_vm11, %v15798_v19  ;;  %v17235_v19 = vld [vmem:[#allocation39_spill] sm:$0xff] }
 0x682   : > { %12205 = vmatmul.mubr.msk.f32.gmra.mrb[54].mxu0 %vm3466_vm11, %v15778_v48  ;;  %v17234_v48 = vld [vmem:[#allocation36_spill] sm:$0xff] }
 0x683   : > { %12207 = vmatprep.mubr.msk.f32.mxu0 %vm3466_vm11, %v15815_v54  ;;  %v17237_v54 = vld [vmem:[#allocation37_spill] sm:$0xff] }
 0x686   : > { %12208 = vmatmul.mubr.msk.f32.gmra.mrb[56].mxu0 %vm3466_vm11, %v15801_v51  ;;  %v17236_v51 = vld [vmem:[#allocation41_spill] sm:$0xff] }
 0x687   : > { %12210 = vmatprep.mubr.msk.f32.mxu0 %vm3466_vm11, %v15834_v11  ;;  %v17239_v11 = vld [vmem:[#allocation49_spill] sm:$0xff] }
 0x68a   : > { %12211 = vmatmul.mubr.msk.f32.gmra.mrb[58].mxu0 %vm3466_vm11, %v15823_v14  ;;  %v17238_v14 = vld [vmem:[#allocation48_spill] sm:$0xff] }
 0x68b   : > { %12213 = vmatprep.mubr.msk.f32.mxu0 %vm3466_vm11, %v16228_v17 }
 0x68e   : > { %12214 = vmatmul.mubr.msk.f32.gmra.mrb[60].mxu0 %vm3466_vm11, %v15901_v60 }
 0x68f   : > { %12216 = vmatprep.mubr.msk.f32.mxu0 %vm3466_vm11, %v16228_v17 }
 0x692   : > { %12217 = vmatmul.mubr.msk.f32.gmra.mrb[62].mxu0 %vm3466_vm11, %v15901_v60 }
 0x693   : > { %12221 = vmatprep.mubr.msk.f32.mxu0 %vm3466_vm11, %v17176_v39 }
 0x696   : > { %12222 = vmatmul.mubr.msk.f32.vlgmr.msra.gmra.mrb[32].mxu0 %vm3466_vm11, %v17212_v23 }
 0x697   : > { %12270 = vmatpush3.msra.mxu0 %v10038_v50  ;;  %12224 = vmatprep.mubr.msk.f32.mxu0 %vm3466_vm11, %v17213_v61 }
 0x69a   : > { %12225 = vmatmul.mubr.msk.f32.gmra.mrb[34].mxu0 %vm3466_vm11, %v17214_v25 }
 0x69b   : > { %12227 = vmatprep.mubr.msk.f32.mxu0 %vm3466_vm11, %v17215_v32 }
 0x69e   : > { %12228 = vmatmul.mubr.msk.f32.gmra.mrb[36].mxu0 %vm3466_vm11, %v17216_v13 }
 0x69f   : > { %12230 = vmatprep.mubr.msk.f32.mxu0 %vm3466_vm11, %v17217_v22 }
 0x6a2   : > { %12231 = vmatmul.mubr.msk.f32.gmra.mrb[38].mxu0 %vm3466_vm11, %v17218_v6 }
 0x6a3   : > { %12233 = vmatprep.mubr.msk.f32.mxu0 %vm3466_vm11, %v17219_v16 }
 0x6a6   : > { %12234 = vmatmul.mubr.msk.f32.gmra.mrb[40].mxu0 %vm3466_vm11, %v17220_v26 }
 0x6a7   : > { %12236 = vmatprep.mubr.msk.f32.mxu0 %vm3466_vm11, %v17221_v30 }
 0x6aa   : > { %12237 = vmatmul.mubr.msk.f32.gmra.mrb[42].mxu0 %vm3466_vm11, %v17187_v5 }
 0x6ab   : > { %12239 = vmatprep.mubr.msk.f32.mxu0 %vm3466_vm11, %v17188_v49 }
 0x6ae   : > { %12240 = vmatmul.mubr.msk.f32.gmra.mrb[44].mxu0 %vm3466_vm11, %v17189_v52 }
 0x6af   : > { %12242 = vmatprep.mubr.msk.f32.mxu0 %vm3466_vm11, %v17222_v37 }
 0x6b2   : > { %12243 = vmatmul.mubr.msk.f32.gmra.mrb[46].mxu0 %vm3466_vm11, %v17191_v2 }
 0x6b3   : > { %12245 = vmatprep.mubr.msk.f32.mxu0 %vm3466_vm11, %v17223_v41 }
 0x6b6   : > { %12246 = vmatmul.mubr.msk.f32.gmra.mrb[48].mxu0 %vm3466_vm11, %v17224_v27 }
 0x6b7   : > { %12248 = vmatprep.mubr.msk.f32.mxu0 %vm3466_vm11, %v17225_v18 }
 0x6ba   : > { %12249 = vmatmul.mubr.msk.f32.gmra.mrb[50].mxu0 %vm3466_vm11, %v17226_v9 }
 0x6bb   : > { %12251 = vmatprep.mubr.msk.f32.mxu0 %vm3466_vm11, %v17227_v35 }
 0x6be   : > { %12252 = vmatmul.mubr.msk.f32.gmra.mrb[52].mxu0 %vm3466_vm11, %v17228_v12 }
 0x6bf   : > { %12254 = vmatprep.mubr.msk.f32.mxu0 %vm3466_vm11, %v17229_v46 }
 0x6c2   : > { %12255 = vmatmul.mubr.msk.f32.gmra.mrb[54].mxu0 %vm3466_vm11, %v15845_v44  ;;  %v17240_v44 = vld [vmem:[#allocation10_spill] sm:$0xff] }
 0x6c3   : > { %12257 = vmatprep.mubr.msk.f32.mxu0 %vm3466_vm11, %v17230_v24 }
 0x6c6   : > { %12258 = vmatmul.mubr.msk.f32.gmra.mrb[56].mxu0 %vm3466_vm11, %v17231_v63 }
 0x6c7   : > { %12260 = vmatprep.mubr.msk.f32.mxu0 %vm3466_vm11, %v15867_v53 }
 0x6ca   : > { %12261 = vmatmul.mubr.msk.f32.gmra.mrb[58].mxu0 %vm3466_vm11, %v17197_v58 }
 0x6cb   : > { %12263 = vmatprep.mubr.msk.f32.mxu0 %vm3466_vm11, %v16306_v56 }
 0x6ce   : > { %12264 = vmatmul.mubr.msk.f32.gmra.mrb[60].mxu0 %vm3466_vm11, %v16311_v3 }
 0x6cf   : > { %12266 = vmatprep.mubr.msk.f32.mxu0 %vm3466_vm11, %v16306_v56  ;;  %v17241_v56 = vld [vmem:[#allocation43_spill] sm:$0xff] }
 0x6d2   : > { %12267 = vmatmul.mubr.msk.f32.gmra.mrb[62].mxu0 %vm3466_vm11, %v16311_v3  ;;  %v17242_v3 = vld [vmem:[#allocation17_spill] sm:$0xff] }
 0x6d3   : > { %12271 = vmatprep.mubr.msk.f32.mxu0 %vm3466_vm11, %v17200_v31 }
 0x6d6   : > { %12272 = vmatmul.mubr.msk.f32.vlgmr.msra.gmra.mrb[32].mxu0 %vm3466_vm11, %v15991_v28 }
 0x6d7   : > { %12274 = vmatprep.mubr.msk.f32.mxu0 %vm3466_vm11, %v17201_v40 }
 0x6da   : > { %12275 = vmatmul.mubr.msk.f32.gmra.mrb[34].mxu0 %vm3466_vm11, %v16004_v33 }
 0x6db   : > { %12277 = vmatprep.mubr.msk.f32.mxu0 %vm3466_vm11, %v17232_v43 }
 0x6de   : > { %12278 = vmatmul.mubr.msk.f32.gmra.mrb[36].mxu0 %vm3466_vm11, %v16017_v62 }
 0x6df   : > { %12280 = vmatprep.mubr.msk.f32.mxu0 %vm3466_vm11, %v17233_v38 }
 0x6e2   : > { %12281 = vmatmul.mubr.msk.f32.gmra.mrb[38].mxu0 %vm3466_vm11, %v16030_v36 }
 0x6e3   : > { %12283 = vmatprep.mubr.msk.f32.mxu0 %vm3466_vm11, %v17234_v48 }
 0x6e6   : > { %12284 = vmatmul.mubr.msk.f32.gmra.mrb[40].mxu0 %vm3466_vm11, %v16043_v21 }
 0x6e7   : > { %12286 = vmatprep.mubr.msk.f32.mxu0 %vm3466_vm11, %v17235_v19 }
 0x6ea   : > { %12287 = vmatmul.mubr.msk.f32.gmra.mrb[42].mxu0 %vm3466_vm11, %v16056_v15 }
 0x6eb   : > { %12289 = vmatprep.mubr.msk.f32.mxu0 %vm3466_vm11, %v17236_v51 }
 0x6ee   : > { %12290 = vmatmul.mubr.msk.f32.gmra.mrb[44].mxu0 %vm3466_vm11, %v16069_v8 }
 0x6ef   : > { %12292 = vmatprep.mubr.msk.f32.mxu0 %vm3466_vm11, %v17237_v54 }
 0x6f2   : > { %12293 = vmatmul.mubr.msk.f32.gmra.mrb[46].mxu0 %vm3466_vm11, %v16082_v4 }
 0x6f3   : > { %12295 = vmatprep.mubr.msk.f32.mxu0 %vm3466_vm11, %v17208_v45 }
 0x6f6   : > { %12296 = vmatmul.mubr.msk.f32.gmra.mrb[48].mxu0 %vm3466_vm11, %v16095_v47 }
 0x6f7   : > { %12298 = vmatprep.mubr.msk.f32.mxu0 %vm3466_vm11, %v17238_v14 }
 0x6fa   : > { %12299 = vmatmul.mubr.msk.f32.gmra.mrb[50].mxu0 %vm3466_vm11, %v17239_v11 }
 0x6fb   : > { %12301 = vmatprep.mubr.msk.f32.mxu0 %vm3466_vm11, %v17210_v42 }
 0x6fe   : > { %12302 = vmatmul.mubr.msk.f32.gmra.mrb[52].mxu0 %vm3466_vm11, %v17240_v44 }
 0x6ff   : > { %12304 = vmatprep.mubr.msk.f32.mxu0 %vm3466_vm11, %v17241_v56 }
 0x702   : > { %12305 = vmatmul.mubr.msk.f32.gmra.mrb[54].mxu0 %vm3466_vm11, %v16134_v7 }
 0x703   : > { %12307 = vmatprep.mubr.msk.f32.mxu0 %vm3466_vm11, %v17242_v3 }
 0x706   : > { %12308 = vmatmul.mubr.msk.f32.gmra.mrb[56].mxu0 %vm3466_vm11, %v16147_v59 }
 0x707   : > { %12310 = vmatprep.mubr.msk.f32.mxu0 %vm3466_vm11, %v16153_v0 }
 0x70a   : > { %12311 = vmatmul.mubr.msk.f32.gmra.mrb[58].mxu0 %vm3466_vm11, %v16158_v34 }
 0x70b   : > { %12313 = vmatprep.mubr.msk.f32.mxu0 %vm3466_vm11, %v16381_v20 }
 0x70e   : > { %12314 = vmatmul.mubr.msk.f32.gmra.mrb[60].mxu0 %vm3466_vm11, %v16386_v57 }
 0x70f   : > { %12316 = vmatprep.mubr.msk.f32.mxu0 %vm3466_vm11, %v16381_v20 }
 0x712   : > { %12317 = vmatmul.mubr.msk.f32.gmra.mrb[62].mxu0 %vm3466_vm11, %v16386_v57 }
 0x7a9   : > { %v12273_v53 = vpop.f32.mrb[32].mxu0 }
 0x7aa   : > { %v8740_v60 = vpop.f32.mrb[33].mxu0  ;;  %v8964_v28 = vmul.f32 0.01, %v12273_v53  ;;  %vm8932_vm2 = vcmp.ge.f32.partialorder %v12273_v53, 0.0 }
 0x7ab   : > { %v8963_v33 = vmul.f32 0.01, %v8740_v60  ;;  %vm8931_vm1 = vcmp.ge.f32.partialorder %v8740_v60, 0.0 }
 0x7ac   : > { %v8996_v4 = vsel %vm8932_vm2, %v12273_v53, %v8964_v28 }
 0x7ad   : > { %v12276_v62 = vpop.f32.mrb[34].mxu0  ;;  %v8995_v36 = vsel %vm8931_vm1, %v8740_v60, %v8963_v33 }
 0x7ae   : > { %9027 = vxpose.xlu0.b32.start [1/16] (narrow) %v8995_v36, 8  ;;  %v8750_v21 = vpop.f32.mrb[35].mxu0  ;;  %v8966_v55 = vmul.f32 0.01, %v12276_v62  ;;  %vm8934_vm11 = vcmp.ge.f32.partialorder %v12276_v62, 0.0 }
 0x7af   : > { %v8965_v15 = vmul.f32 0.01, %v8750_v21  ;;  %vm8933_vm4 = vcmp.ge.f32.partialorder %v8750_v21, 0.0 }
 0x7b0   : > { %v8998_v34 = vsel %vm8934_vm11, %v12276_v62, %v8966_v55 }
 0x7b1   : > { %v12279_v8 = vpop.f32.mrb[36].mxu0  ;;  %v8997_v7 = vsel %vm8933_vm4, %v8750_v21, %v8965_v15 }
 0x7b2   : > { %9028 = vxpose.xlu0.b32.cont [2/16] (narrow) %v8996_v4, 8  ;;  %v8760_v47 = vpop.f32.mrb[37].mxu0  ;;  %v8968_v39 = vmul.f32 0.01, %v12279_v8  ;;  %vm8936_vm10 = vcmp.ge.f32.partialorder %v12279_v8, 0.0 }
 0x7b3   : > { %v8967_v57 = vmul.f32 0.01, %v8760_v47  ;;  %vm8935_vm9 = vcmp.ge.f32.partialorder %v8760_v47, 0.0 }
 0x7b4   : > { %v9000_v1 = vsel %vm8936_vm10, %v12279_v8, %v8968_v39 }
 0x7b5   : > { %v12282_v10 = vpop.f32.mrb[38].mxu0  ;;  %v8999_v5 = vsel %vm8935_vm9, %v8760_v47, %v8967_v57 }
 0x7b6   : > { %9029 = vxpose.xlu0.b32.cont [3/16] (narrow) %v8997_v7, 8  ;;  %v8770_v59 = vpop.f32.mrb[39].mxu0  ;;  %v8970_v40 = vmul.f32 0.01, %v12282_v10  ;;  %vm8938_vm13 = vcmp.ge.f32.partialorder %v12282_v10, 0.0 }
 0x7b7   : > { %v8969_v52 = vmul.f32 0.01, %v8770_v59  ;;  %vm8937_vm12 = vcmp.ge.f32.partialorder %v8770_v59, 0.0 }
 0x7b8   : > { %v9002_v23 = vsel %vm8938_vm13, %v12282_v10, %v8970_v40 }
 0x7b9   : > { %v12285_v0 = vpop.f32.mrb[40].mxu0  ;;  %v9001_v20 = vsel %vm8937_vm12, %v8770_v59, %v8969_v52 }
 0x7ba   : > { %9030 = vxpose.xlu0.b32.cont [4/16] (narrow) %v8998_v34, 8  ;;  %v8780_v17 = vpop.f32.mrb[41].mxu0  ;;  %v8972_v32 = vmul.f32 0.01, %v12285_v0  ;;  %vm8940_vm0 = vcmp.ge.f32.partialorder %v12285_v0, 0.0 }
 0x7bb   : > { %v8971_v29 = vmul.f32 0.01, %v8780_v17  ;;  %vm8939_vm14 = vcmp.ge.f32.partialorder %v8780_v17, 0.0 }
 0x7bc   : > { %v9004_v27 = vsel %vm8940_vm0, %v12285_v0, %v8972_v32 }
 0x7bd   : > { %v12288_v58 = vpop.f32.mrb[42].mxu0  ;;  %v9003_v6 = vsel %vm8939_vm14, %v8780_v17, %v8971_v29 }
 0x7be   : > { %9031 = vxpose.xlu0.b32.cont [5/16] (narrow) %v8999_v5, 8  ;;  %v8790_v49 = vpop.f32.mrb[43].mxu0  ;;  %v8974_v35 = vmul.f32 0.01, %v12288_v58  ;;  %vm8942_vm7 = vcmp.ge.f32.partialorder %v12288_v58, 0.0 }
 0x7bf   : > { %v8973_v30 = vmul.f32 0.01, %v8790_v49  ;;  %vm8941_vm5 = vcmp.ge.f32.partialorder %v8790_v49, 0.0 }
 0x7c0   : > { %v9006_v51 = vsel %vm8942_vm7, %v12288_v58, %v8974_v35 }
 0x7c1   : > { %v16585_v2 = vpop.f32.mrb[44].mxu0  ;;  %v9005_v24 = vsel %vm8941_vm5, %v8790_v49, %v8973_v30 }
 0x7c2   : > { %9032 = vxpose.xlu0.b32.cont [6/16] (narrow) %v9000_v1, 8  ;;  %v8800_v31 = vpop.f32.mrb[45].mxu0  ;;  %v8976_v11 = vmul.f32 0.01, %v16585_v2  ;;  %vm8944_vm4 = vcmp.ge.f32.partialorder %v16585_v2, 0.0 }
 0x7c3   : > { %v8975_v38 = vmul.f32 0.01, %v8800_v31  ;;  %vm8943_vm1 = vcmp.ge.f32.partialorder %v8800_v31, 0.0 }
 0x7c4   : > { %v9008_v36 = vsel %vm8944_vm4, %v16585_v2, %v8976_v11 }
 0x7c5   : > { %v16587_v42 = vpop.f32.mrb[46].mxu0  ;;  %v9007_v3 = vsel %vm8943_vm1, %v8800_v31, %v8975_v38 }
 0x7c6   : > { %9033 = vxpose.xlu0.b32.cont [7/16] (narrow) %v9001_v20, 8  ;;  %v16589_v45 = vpop.f32.mrb[47].mxu0  ;;  %v8978_v8 = vmul.f32 0.01, %v16587_v42  ;;  %vm8946_vm12 = vcmp.ge.f32.partialorder %v16587_v42, 0.0 }
 0x7c7   : > { %v8977_v33 = vmul.f32 0.01, %v16589_v45  ;;  %vm8945_vm9 = vcmp.ge.f32.partialorder %v16589_v45, 0.0 }
 0x7c8   : > { %v9010_v57 = vsel %vm8946_vm12, %v16587_v42, %v8978_v8 }
 0x7c9   : > { %v12297_v50 = vpop.f32.mrb[48].mxu0  ;;  %v9009_v55 = vsel %vm8945_vm9, %v16589_v45, %v8977_v33 }
 0x7ca   : > { %9034 = vxpose.xlu0.b32.cont [8/16] (narrow) %v9002_v23, 8  ;;  %v8820_v61 = vpop.f32.mrb[49].mxu0  ;;  %v8980_v13 = vmul.f32 0.01, %v12297_v50  ;;  %vm8948_vm3 = vcmp.ge.f32.partialorder %v12297_v50, 0.0 }
 0x7cb   : > { %v8979_v25 = vmul.f32 0.01, %v8820_v61  ;;  %vm8947_vm15 = vcmp.ge.f32.partialorder %v8820_v61, 0.0 }
 0x7cc   : > { %v9012_v18 = vsel %vm8948_vm3, %v12297_v50, %v8980_v13 }
 0x7cd   : > { %v12300_v22 = vpop.f32.mrb[50].mxu0  ;;  %v9011_v16 = vsel %vm8947_vm15, %v8820_v61, %v8979_v25 }
 0x7ce   : > { %9035 = vxpose.xlu0.b32.cont [9/16] (narrow) %v9003_v6, 8  ;;  %9059 = vxpose.xlu1.b32.start [1/16] (narrow) %v9011_v16, 8  ;;  %v8830_v26 = vpop.f32.mrb[51].mxu0  ;;  %v8982_v12 = vmul.f32 0.01, %v12300_v22  ;;  %vm8950_vm8 = vcmp.ge.f32.partialorder %v12300_v22, 0.0 }
 0x7cf   : > { %v8981_v37 = vmul.f32 0.01, %v8830_v26  ;;  %vm8949_vm6 = vcmp.ge.f32.partialorder %v8830_v26, 0.0 }
 0x7d0   : > { %v9014_v54 = vsel %vm8950_vm8, %v12300_v22, %v8982_v12 }
 0x7d1   : > { %v12303_v41 = vpop.f32.mrb[52].mxu0  ;;  %v9013_v63 = vsel %vm8949_vm6, %v8830_v26, %v8981_v37 }
 0x7d2   : > { %9036 = vxpose.xlu0.b32.cont [10/16] (narrow) %v9004_v27, 8  ;;  %9060 = vxpose.xlu1.b32.cont [2/16] (narrow) %v9012_v18, 8  ;;  %v8840_v9 = vpop.f32.mrb[53].mxu0  ;;  %v8984_v44 = vmul.f32 0.01, %v12303_v41  ;;  %vm8952_vm11 = vcmp.ge.f32.partialorder %v12303_v41, 0.0 }
 0x7d3   : > { %v8983_v48 = vmul.f32 0.01, %v8840_v9  ;;  %vm8951_vm2 = vcmp.ge.f32.partialorder %v8840_v9, 0.0 }
 0x7d4   : > { %v9016_v21 = vsel %vm8952_vm11, %v12303_v41, %v8984_v44 }
 0x7d5   : > { %v12306_v46 = vpop.f32.mrb[54].mxu0  ;;  %v9015_v53 = vsel %vm8951_vm2, %v8840_v9, %v8983_v48 }
 0x7d6   : > { %9037 = vxpose.xlu0.b32.cont [11/16] (narrow) %v9005_v24, 8  ;;  %9061 = vxpose.xlu1.b32.cont [3/16] (narrow) %v9013_v63, 8  ;;  %v8850_v43 = vpop.f32.mrb[55].mxu0  ;;  %v8986_v4 = vmul.f32 0.01, %v12306_v46  ;;  %vm8954_vm13 = vcmp.ge.f32.partialorder %v12306_v46, 0.0 }
 0x7d7   : > { %v8985_v28 = vmul.f32 0.01, %v8850_v43  ;;  %vm8953_vm10 = vcmp.ge.f32.partialorder %v8850_v43, 0.0 }
 0x7d8   : > { %v9018_v0 = vsel %vm8954_vm13, %v12306_v46, %v8986_v4 }
 0x7d9   : > { %v12309_v19 = vpop.f32.mrb[56].mxu0  ;;  %v9017_v10 = vsel %vm8953_vm10, %v8850_v43, %v8985_v28 }
 0x7da   : > { %9038 = vxpose.xlu0.b32.cont [12/16] (narrow) %v9006_v51, 8  ;;  %9062 = vxpose.xlu1.b32.cont [4/16] (narrow) %v9014_v54, 8  ;;  %v8860_v14 = vpop.f32.mrb[57].mxu0  ;;  %v8988_v34 = vmul.f32 0.01, %v12309_v19  ;;  %vm8956_vm15 = vcmp.ge.f32.partialorder %v12309_v19, 0.0 }
 0x7db   : > { %v8987_v59 = vmul.f32 0.01, %v8860_v14  ;;  %vm8955_vm14 = vcmp.ge.f32.partialorder %v8860_v14, 0.0 }
 0x7dc   : > { %v9020_v58 = vsel %vm8956_vm15, %v12309_v19, %v8988_v34 }
 0x7dd   : > { %v12312_v56 = vpop.f32.mrb[58].mxu0  ;;  %v9019_v17 = vsel %vm8955_vm14, %v8860_v14, %v8987_v59 }
 0x7de   : > { %9039 = vxpose.xlu0.b32.cont [13/16] (narrow) %v9007_v3, 8  ;;  %9063 = vxpose.xlu1.b32.cont [5/16] (narrow) %v9015_v53, 8  ;;  %v8870_v60 = vpop.f32.mrb[59].mxu0  ;;  %v8990_v5 = vmul.f32 0.01, %v12312_v56  ;;  %vm8958_vm3 = vcmp.ge.f32.partialorder %v12312_v56, 0.0 }
 0x7df   : > { %v8989_v39 = vmul.f32 0.01, %v8870_v60  ;;  %vm8957_vm0 = vcmp.ge.f32.partialorder %v8870_v60, 0.0 }
 0x7e0   : > { %v9022_v2 = vsel %vm8958_vm3, %v12312_v56, %v8990_v5 }
 0x7e1   : > { %v12315_v62 = vpop.f32.mrb[60].mxu0  ;;  %v9021_v49 = vsel %vm8957_vm0, %v8870_v60, %v8989_v39 }
 0x7e2   : > { %9040 = vxpose.xlu0.b32.cont [14/16] (narrow) %v9008_v36, 8  ;;  %9064 = vxpose.xlu1.b32.cont [6/16] (narrow) %v9016_v21, 8  ;;  %v8880_v15 = vpop.f32.mrb[61].mxu0  ;;  %v8992_v1 = vmul.f32 0.01, %v12315_v62  ;;  %vm8960_vm6 = vcmp.ge.f32.partialorder %v12315_v62, 0.0 }
 0x7e3   : > { %v8991_v52 = vmul.f32 0.01, %v8880_v15  ;;  %vm8959_vm5 = vcmp.ge.f32.partialorder %v8880_v15, 0.0 }
 0x7e4   : > { %v9024_v42 = vsel %vm8960_vm6, %v12315_v62, %v8992_v1 }
 0x7e5   : > { %v12318_v47 = vpop.f32.mrb[62].mxu0  ;;  %v9023_v31 = vsel %vm8959_vm5, %v8880_v15, %v8991_v52 }
 0x7e6   : > { %9041 = vxpose.xlu0.b32.cont [15/16] (narrow) %v9009_v55, 8  ;;  %9065 = vxpose.xlu1.b32.cont [7/16] (narrow) %v9017_v10, 8  ;;  %v8890_v7 = vpop.f32.mrb[63].mxu0  ;;  %v8994_v20 = vmul.f32 0.01, %v12318_v47  ;;  %vm8962_vm8 = vcmp.ge.f32.partialorder %v12318_v47, 0.0 }
 0x7e7   : > { %v8993_v40 = vmul.f32 0.01, %v8890_v7  ;;  %vm8961_vm7 = vcmp.ge.f32.partialorder %v8890_v7, 0.0 }
 0x7e8   : > { %v9026_v29 = vsel %vm8962_vm8, %v12318_v47, %v8994_v20 }
 0x7e9   : > { %v9025_v45 = vsel %vm8961_vm7, %v8890_v7, %v8993_v40 }
 0x7ea   : > { %9042 = vxpose.xlu0.b32.end [16/16] (narrow) %v9010_v57, 8  ;;  %9066 = vxpose.xlu1.b32.cont [8/16] (narrow) %v9018_v0, 8 }
 0x7ee   : > { %9067 = vxpose.xlu1.b32.cont [9/16] (narrow) %v9019_v17, 8 }
 0x7f2   : > { %9068 = vxpose.xlu1.b32.cont [10/16] (narrow) %v9020_v58, 8 }
 0x7f6   : > { %9069 = vxpose.xlu1.b32.cont [11/16] (narrow) %v9021_v49, 8 }
 0x7fa   : > { %9070 = vxpose.xlu1.b32.cont [12/16] (narrow) %v9022_v2, 8 }
 0x7fe   : > { %9071 = vxpose.xlu1.b32.cont [13/16] (narrow) %v9023_v31, 8 }
 0x802   : > { %9072 = vxpose.xlu1.b32.cont [14/16] (narrow) %v9024_v42, 8 }
 0x806   : > { %9073 = vxpose.xlu1.b32.cont [15/16] (narrow) %v9025_v45, 8 }
 0x80a   : > { %9074 = vxpose.xlu1.b32.end [16/16] (narrow) %v9026_v29, 8 }
 0x82e   : > { %v9043_v50 = vpop.trf.xlu0 }
 0x82f   : > { %9091 = vst [vmem:[%s190_s13] sm:$0xff] %v9043_v50 }
 0x84e   : > { %v9075_v23 = vpop.trf.xlu1 }
 0x84f   : > { %9092 = vst [vmem:[%s190_s13 + $0x8] sm:$0xff] %v9075_v23 }
 0x850   : > { %13142 = shalt.err (!%p13139_p3)
}
 0x851   : > { %s13143_s6 = scalar_lea.hbm %s16607_s27, 256  ;;  %s13147_s9 = scalar_lea.hbm %s16651_s4, 512 }
 0x852   : > { %p13144_p4 = scmp.ne.s32.totalorder %s16607_s27, %s13143_s6  ;;  %p13148_p9 = scmp.lt.u32.totalorder %s16607_s27, %s16651_s4 }
 0x853   : > { %p13149_p10 = scmp.lt.u32.totalorder %s13147_s9, %s13143_s6  ;;  %p13151_p12 = scmp.lt.u32.totalorder %s13143_s6, %s16607_s27 }
 0x854   : > { %p13145_p7 = pnand %p13144_p4, %p13257_p5 }
 0x855   : > { %p13150_p11 = por %p13149_p10, %p13148_p9 }
 0x856   : > { %p13146_p8 = pneg %p13145_p7 }
 0x857   : > { %p13152_p13 = por %p13151_p12, %p13150_p11 }
 0x859   : > { %p13153_p0 = pnand %p13152_p13, %p13146_p8 }
 0x85b   : > { %13156 = shalt.err (!%p13153_p0)
}
 0x85c   : > { %13089 = dma.vmem_to_hbm [thread:$0]  (%p13257_p5), %s16602_s14, 256, %s16607_s27, %s9094_s28  }
 0x85d PF: > { %p13095_p1 = scmp.ge.s32.totalorder %s13191_s18, 2  ;;  %s9120_s12 = sand.u32 1, %s13179_s15  }
 0x85e   : > { %s9121_s13 = scalar_lea.sflag [#allocation3], %s9120_s12 }
 0x85f   : > { %p13092_p2 = pnand %p13095_p1, %p13261_p6 }
 0x861   : > { %13174 = dma.done.wait (!%p13092_p2), %s9121_s13, 256  }
 0x862   : > { %13176 = vsyncadd (!%p13092_p2), %s9121_s13, 4294967040  ;;  %p14_p3 = scmp.ge.s32.totalorder %s13244_s21, 4   ;;  %s17243_s15 = smov %s13183_s16 }
 0x863   : > { %s17244_s16 = smov %s13187_s17  ;;  %s17245_s17 = smov %s13255_s24 }
 0x864   : > { %s17246_s18 = smov %s13244_s21  ;;  %16 = sbr.rel (!%p14_p3) target bundleno = 3 (0x3), region = 95 }
 0x86b   :  { %9126 = vsyncpa [#allocation3], 1 }
 0x86c   :  { %9128 = vsyncpa [#allocation3 + $0x1], 1 }

</bundles_post_ra>
